<compile_context>
chip_gen: v7x
topology: tpu7x:2x2x1
jax: 0.10.0
libtpu: 0.0.40
codegen_flags: <defaults>
</compile_context>

<pallas_src>
import functools

import jax
import jax.numpy as jnp
from jax.experimental import pallas as pl
from jax.experimental.pallas import tpu as pltpu


# ---------------------------------------------------------------------------
# helpers
# ---------------------------------------------------------------------------

def _rup(n, m):
    return ((n + m - 1) // m) * m


def _fs(shape):
    """Full-array BlockSpec (block == whole array, single grid point)."""
    return pl.BlockSpec(shape, lambda *_: (0,) * len(shape))


# ---------------------------------------------------------------------------
# Fused decoder kernel
# ---------------------------------------------------------------------------

def _make_decoder_kernel(T, B_pad, H, num_layers, num_dirs, G_pad):
    ND = num_dirs
    bf16 = jnp.bfloat16
    f32 = jnp.float32

    def cell(gates, c):
        # Packed gate layout: lanes [0:H]=i, [H:2H]=f, [2H:3H]=g, [3H:4H]=o.
        # One sigmoid + one tanh over the whole packed vreg, then lane-select.
        sig = jax.nn.sigmoid(gates)
        tnh = jnp.tanh(gates)
        i = sig[:, 0 * H:1 * H]
        f = sig[:, 1 * H:2 * H]
        g = tnh[:, 2 * H:3 * H]
        o = sig[:, 3 * H:4 * H]
        c_new = f * c + i * g
        h_new = o * jnp.tanh(c_new)
        return h_new, c_new

    def kernel(*refs):
        x_ref, l2h_w, l2h_b = refs[:3]
        lstm = refs[3:3 + 3 * num_layers]
        out_w = refs[3 + 3 * num_layers]
        out_b = refs[4 + 3 * num_layers]
        o_ref = refs[5 + 3 * num_layers]
        scratch = refs[6 + 3 * num_layers:]
        seq_bufs = scratch[:2]                         # ping-pong layer outputs
        xg_buf = scratch[2] if num_layers > 1 else None

        # ---- latent2hidden --------------------------------------------------
        hidden = (jnp.dot(x_ref[...], l2h_w[...],
                          preferred_element_type=f32) + l2h_b[...])
        hidden_bf = hidden.astype(bf16)                # [B_pad, H]

        def run_layer(layer, xg_lookup, cur):
            """Runs one (bi)LSTM layer; xg_lookup(row, d) -> [B_pad, G_pad]."""
            w_hh = lstm[3 * layer + 2]                 # [ND*H, ND*G_pad] block-diag
            h = [jnp.zeros((B_pad, H), f32) for _ in range(ND)]
            c = [jnp.zeros((B_pad, H), f32) for _ in range(ND)]
            for t in range(T):
                # fwd/bwd recurrent matmuls fused: one dot of K = ND*H per step
                h_cat = h[0] if ND == 1 else jnp.concatenate(h, axis=1)
                hh = jnp.dot(h_cat.astype(bf16), w_hh[...],
                             preferred_element_type=f32)   # [B_pad, ND*G_pad]
                for d in range(ND):
                    row = t if d == 0 else T - 1 - t   # backward -> reversed slot
                    gates = xg_lookup(row, d) + hh[:, d * G_pad:(d + 1) * G_pad]
                    h[d], c[d] = cell(gates, c[d])
                    cur[row * B_pad:(row + 1) * B_pad, d * H:(d + 1) * H] = h[d]

        # ---- layer 0: time-broadcast input => one fused xg for both dirs ----
        w_ih0, b0 = lstm[0], lstm[1]
        xg0 = (jnp.dot(hidden_bf, w_ih0[...], preferred_element_type=f32)
               + b0[...])                              # [B_pad, ND*G_pad], in vregs
        cur = seq_bufs[0]
        run_layer(0, lambda row, d: xg0[:, d * G_pad:(d + 1) * G_pad], cur)
        prev = cur

        # ---- layers 1 .. L-1 -------------------------------------------------
        for layer in range(1, num_layers):
            cur = seq_bufs[layer % 2]
            w_ih, b = lstm[3 * layer], lstm[3 * layer + 1]
            prev_bf = prev[...].astype(bf16)           # [T*B_pad, ND*H]
            # both directions' input projection in ONE matmul, stored to VMEM
            xg_buf[...] = (jnp.dot(prev_bf, w_ih[...],
                                   preferred_element_type=f32) + b[...])
            run_layer(
                layer,
                lambda row, d: xg_buf[row * B_pad:(row + 1) * B_pad,
                                      d * G_pad:(d + 1) * G_pad],
                cur)
            prev = cur

        # ---- outputs2vocab + log_softmax (lane-dense padded vocab, f32) -----
        seq_bf = prev[...].astype(bf16)                # [T*B_pad, ND*H]
        logits = (jnp.dot(seq_bf, out_w[...],
                          preferred_element_type=f32) + out_b[...])
        m = jnp.max(logits, axis=-1, keepdims=True)
        s = logits - m
        lse = jnp.log(jnp.sum(jnp.exp(s), axis=-1, keepdims=True))
        o_ref[...] = s - lse

    return kernel


# ---------------------------------------------------------------------------
# Parameter init (deterministic, synthetic — mirrors nn.Linear / nn.LSTM shapes)
# ---------------------------------------------------------------------------

def init_params(key, vocab_size, embedding_size, latent_size, hidden_size,
                num_layers, bidirectional):
    num_dirs = 2 if bidirectional else 1
    H = hidden_size

    def uni(k, shape, bound):
        return jax.random.uniform(k, shape, jnp.float32, -bound, bound)

    keys = jax.random.split(key, 4 + 4 * num_layers * num_dirs)
    ki = iter(keys)

    bound_h = 1.0 / jnp.sqrt(hidden_size)
    params = {
        # latent2hidden: Linear(latent_size, hidden_size); stored transposed
        "l2h_w_t": uni(next(ki), (latent_size, H), 1.0 / jnp.sqrt(latent_size)),
        "l2h_b": uni(next(ki), (H,), 1.0 / jnp.sqrt(latent_size)),
        # outputs2vocab: Linear(H * num_dirs, vocab_size); stored transposed
        "out_w_t": uni(next(ki), (H * num_dirs, vocab_size),
                       1.0 / jnp.sqrt(H * num_dirs)),
        "out_b": uni(next(ki), (vocab_size,), 1.0 / jnp.sqrt(H * num_dirs)),
        "lstm": [],
    }

    for layer in range(num_layers):
        in_size = embedding_size if layer == 0 else H * num_dirs
        dirs = []
        for _ in range(num_dirs):
            w_ih_t = uni(next(ki), (in_size, 4 * H), bound_h)   # [in, 4H] i|f|g|o
            b_ih = uni(next(ki), (4 * H,), bound_h)
            w_hh_t = uni(next(ki), (H, 4 * H), bound_h)         # [H, 4H]
            b_hh = uni(next(ki), (4 * H,), bound_h)
            dirs.append((w_ih_t, b_ih, w_hh_t, b_hh))
        params["lstm"].append(dirs)
    return params


# ---------------------------------------------------------------------------
# One-time parameter preparation (pad / pack / concat / cast) — done OUTSIDE
# the per-call jitted forward so the padded copies never hit the per-call path.
# ---------------------------------------------------------------------------

def prepare_params(params, embedding_size):
    f32, bf16 = jnp.float32, jnp.bfloat16
    H = params["l2h_w_t"].shape[1]
    if embedding_size != H:
        raise ValueError(
            "TextDecoder feeds latent2hidden output straight into the LSTM, "
            "so embedding_size must equal hidden_size.")
    num_layers = len(params["lstm"])
    ND = len(params["lstm"][0])
    V = params["out_b"].shape[0]
    L = params["l2h_w_t"].shape[0]
    G = 4 * H
    G_pad = _rup(G, 128)
    L_pad = _rup(L, 128)
    V_pad = _rup(V, 128)

    prep = {
        "l2h_w": jnp.pad(params["l2h_w_t"].astype(f32), ((0, L_pad - L), (0, 0))),
        "l2h_b": params["l2h_b"].astype(f32).reshape(1, H),
        "lstm": [],
        # bf16 weights for the matmuls (f32 accumulation in-kernel)
        "out_w": jnp.pad(params["out_w_t"].astype(f32),
                         ((0, 0), (0, V_pad - V))).astype(bf16),
        # padded vocab columns get a huge negative bias -> vanish in log_softmax
        # (kept f32; never cast to bf16)
        "out_b": jnp.pad(params["out_b"].astype(f32), (0, V_pad - V),
                         constant_values=-1e30).reshape(1, V_pad),
    }

    for layer in range(num_layers):
        in_size = embedding_size if layer == 0 else ND * H
        w_ih_cat = jnp.zeros((in_size, ND * G_pad), f32)        # dirs fused on N
        b_cat = jnp.zeros((1, ND * G_pad), f32)
        w_hh_bd = jnp.zeros((ND * H, ND * G_pad), f32)          # block-diagonal
        for d in range(ND):
            w_ih_t, b_ih, w_hh_t, b_hh = params["lstm"][layer][d]
            w_ih_cat = w_ih_cat.at[:, d * G_pad:d * G_pad + G].set(
                w_ih_t.astype(f32))
            b_cat = b_cat.at[0, d * G_pad:d * G_pad + G].set(
                (b_ih + b_hh).astype(f32))
            w_hh_bd = w_hh_bd.at[d * H:(d + 1) * H,
                                 d * G_pad:d * G_pad + G].set(w_hh_t.astype(f32))
        prep["lstm"].append((w_ih_cat.astype(bf16), b_cat, w_hh_bd.astype(bf16)))
    return prep


# ---------------------------------------------------------------------------
# Forward pass (matches TextDecoder.forward semantics)
# ---------------------------------------------------------------------------

@functools.partial(jax.jit, static_argnames=("max_length", "hidden_size",
                                             "vocab_size", "num_dirs"))
def text_decoder_forward(prep, x, *, max_length, hidden_size, vocab_size,
                         num_dirs):
    B, L = x.shape
    T = max_length
    H = hidden_size
    ND = num_dirs
    V = vocab_size
    num_layers = len(prep["lstm"])
    G_pad = prep["lstm"][0][0].shape[1] // ND
    L_pad = prep["l2h_w"].shape[0]
    V_pad = prep["out_b"].shape[1]
    B_pad = _rup(B, 8)
    f32 = jnp.float32

    # only the tiny latent input is padded per call
    x_p = jnp.pad(x.astype(f32), ((0, B_pad - B), (0, L_pad - L)))

    lstm_flat = [a for layer_arrays in prep["lstm"] for a in layer_arrays]
    in_arrays = [x_p, prep["l2h_w"], prep["l2h_b"], *lstm_flat,
                 prep["out_w"], prep["out_b"]]

    kernel = _make_decoder_kernel(T, B_pad, H, num_layers, ND, G_pad)

    scratch = [pltpu.VMEM((T * B_pad, ND * H), f32),     # seq ping
               pltpu.VMEM((T * B_pad, ND * H), f32)]     # seq pong
    if num_layers > 1:
        scratch.append(pltpu.VMEM((T * B_pad, ND * G_pad), f32))  # fused xg

    out_tm = pl.pallas_call(
        kernel,
        out_shape=jax.ShapeDtypeStruct((T * B_pad, V_pad), f32),
        grid=(1,),
        in_specs=[_fs(a.shape) for a in in_arrays],
        out_specs=_fs((T * B_pad, V_pad)),
        scratch_shapes=tuple(scratch),
        compiler_params=pltpu.CompilerParams(
            dimension_semantics=("arbitrary",)),
    )(*in_arrays)

    # kernel output is time-major rows (t, b); convert to batch-first & unpad
    logp = jnp.transpose(out_tm.reshape(T, B_pad, V_pad), (1, 0, 2))
    return logp[:B, :, :V]


# ---------------------------------------------------------------------------
# Demo
# ---------------------------------------------------------------------------

if __name__ == "__main__":
    vocab_size = 50
    hidden_size = 32
    embedding_size = 32     # must equal hidden_size (module feeds hidden -> LSTM)
    latent_size = 8
    max_len = 8
    num_layers = 2
    bidirectional = True
    batch = 2

    assert embedding_size == hidden_size

    key = jax.random.PRNGKey(0)
    kx, kp = jax.random.split(key)

    x = jax.random.normal(kx, (batch, latent_size), dtype=jnp.float32)
    params = init_params(kp, vocab_size, embedding_size, latent_size,
                         hidden_size, num_layers, bidirectional)
    prep = prepare_params(params, embedding_size)   # one-time pad/pack/cast

    logp = text_decoder_forward(prep, x, max_length=max_len,
                                hidden_size=hidden_size,
                                vocab_size=vocab_size,
                                num_dirs=2 if bidirectional else 1)
    jax.block_until_ready(logp)

    assert logp.shape == (batch, max_len, vocab_size), logp.shape
    # log_softmax rows should sum (in prob space) to ~1
    assert jnp.allclose(jnp.sum(jnp.exp(logp), axis=-1), 1.0, atol=1e-4)
    print("KERNEL_OK")
</pallas_src>

<mosaic_0001>
module attributes {stable_mosaic.version = 11 : i64} {
  func.func @kernel(%arg0: i32, %arg1: memref<8x128xf32, #tpu.memory_space<vmem>>, %arg2: memref<128x32xf32, #tpu.memory_space<vmem>>, %arg3: memref<1x32xf32, #tpu.memory_space<vmem>>, %arg4: memref<32x256xbf16, #tpu.memory_space<vmem>>, %arg5: memref<1x256xf32, #tpu.memory_space<vmem>>, %arg6: memref<64x256xbf16, #tpu.memory_space<vmem>>, %arg7: memref<64x256xbf16, #tpu.memory_space<vmem>>, %arg8: memref<1x256xf32, #tpu.memory_space<vmem>>, %arg9: memref<64x256xbf16, #tpu.memory_space<vmem>>, %arg10: memref<64x128xbf16, #tpu.memory_space<vmem>>, %arg11: memref<1x128xf32, #tpu.memory_space<vmem>>, %arg12: memref<64x128xf32, #tpu.memory_space<vmem>>, %arg13: memref<64x64xf32, #tpu.memory_space<vmem>>, %arg14: memref<64x64xf32, #tpu.memory_space<vmem>>, %arg15: memref<64x256xf32, #tpu.memory_space<vmem>>) attributes {dimension_semantics = [#tpu.dimension_semantics<arbitrary>], iteration_bounds = array<i64: 1>, scalar_prefetch = 0 : i64, scratch_operands = 3 : i64, tpu.core_type = #tpu.core_type<tc>, window_params = [{pipeline_mode = #tpu.pipeline_mode<synchronous>, transform_indices = @transform_0, window_bounds = array<i64: 8, 128>}, {pipeline_mode = #tpu.pipeline_mode<synchronous>, transform_indices = @transform_1, window_bounds = array<i64: 128, 32>}, {pipeline_mode = #tpu.pipeline_mode<synchronous>, transform_indices = @transform_2, window_bounds = array<i64: 1, 32>}, {pipeline_mode = #tpu.pipeline_mode<synchronous>, transform_indices = @transform_3, window_bounds = array<i64: 32, 256>}, {pipeline_mode = #tpu.pipeline_mode<synchronous>, transform_indices = @transform_4, window_bounds = array<i64: 1, 256>}, {pipeline_mode = #tpu.pipeline_mode<synchronous>, transform_indices = @transform_5, window_bounds = array<i64: 64, 256>}, {pipeline_mode = #tpu.pipeline_mode<synchronous>, transform_indices = @transform_6, window_bounds = array<i64: 64, 256>}, {pipeline_mode = #tpu.pipeline_mode<synchronous>, transform_indices = @transform_7, window_bounds = array<i64: 1, 256>}, {pipeline_mode = #tpu.pipeline_mode<synchronous>, transform_indices = @transform_8, window_bounds = array<i64: 64, 256>}, {pipeline_mode = #tpu.pipeline_mode<synchronous>, transform_indices = @transform_9, window_bounds = array<i64: 64, 128>}, {pipeline_mode = #tpu.pipeline_mode<synchronous>, transform_indices = @transform_10, window_bounds = array<i64: 1, 128>}, {pipeline_mode = #tpu.pipeline_mode<synchronous>, transform_indices = @transform_11, window_bounds = array<i64: 64, 128>}]} {
    %c0 = arith.constant 0 : index
    %c0_0 = arith.constant 0 : index
    %0 = vector.load %arg1[%c0, %c0_0] : memref<8x128xf32, #tpu.memory_space<vmem>>, vector<8x128xf32>
    %c0_1 = arith.constant 0 : index
    %c0_2 = arith.constant 0 : index
    %1 = vector.load %arg2[%c0_1, %c0_2] : memref<128x32xf32, #tpu.memory_space<vmem>>, vector<128x32xf32>
    %cst = arith.constant dense<0.000000e+00> : vector<8x32xf32>
    %2 = tpu.matmul %0, %1, %cst {dimension_numbers = #tpu.dot_dimension_numbers<[1], [0], [0], [1], [0, 0, 1, 1], [], []>} : vector<8x128xf32>, vector<128x32xf32>, vector<8x32xf32> -> vector<8x32xf32>
    %c0_3 = arith.constant 0 : index
    %c0_4 = arith.constant 0 : index
    %3 = vector.load %arg3[%c0_3, %c0_4] : memref<1x32xf32, #tpu.memory_space<vmem>>, vector<1x32xf32>
    %4 = vector.broadcast %3 : vector<1x32xf32> to vector<8x32xf32>
    %5 = arith.addf %2, %4 : vector<8x32xf32>
    %6 = arith.truncf %5 : vector<8x32xf32> to vector<8x32xbf16>
    %c0_5 = arith.constant 0 : index
    %c0_6 = arith.constant 0 : index
    %7 = vector.load %arg4[%c0_5, %c0_6] : memref<32x256xbf16, #tpu.memory_space<vmem>>, vector<32x256xbf16>
    %cst_7 = arith.constant dense<0.000000e+00> : vector<8x256xf32>
    %8 = tpu.matmul %6, %7, %cst_7 {dimension_numbers = #tpu.dot_dimension_numbers<[1], [0], [0], [1], [0, 0, 1, 1], [], []>} : vector<8x32xbf16>, vector<32x256xbf16>, vector<8x256xf32> -> vector<8x256xf32>
    %c0_8 = arith.constant 0 : index
    %c0_9 = arith.constant 0 : index
    %9 = vector.load %arg5[%c0_8, %c0_9] : memref<1x256xf32, #tpu.memory_space<vmem>>, vector<1x256xf32>
    %10 = vector.broadcast %9 : vector<1x256xf32> to vector<8x256xf32>
    %11 = arith.addf %8, %10 : vector<8x256xf32>
    %cst_10 = arith.constant 0.000000e+00 : f32
    %12 = vector.broadcast %cst_10 : f32 to vector<8x32xf32>
    %cst_11 = arith.constant 0.000000e+00 : f32
    %13 = vector.broadcast %cst_11 : f32 to vector<8x32xf32>
    %cst_12 = arith.constant 0.000000e+00 : f32
    %14 = vector.broadcast %cst_12 : f32 to vector<8x32xf32>
    %cst_13 = arith.constant 0.000000e+00 : f32
    %15 = vector.broadcast %cst_13 : f32 to vector<8x32xf32>
    %16 = tpu.concatenate %12, %13 in 1 : vector<8x32xf32>, vector<8x32xf32> -> vector<8x64xf32>
    %17 = arith.truncf %16 : vector<8x64xf32> to vector<8x64xbf16>
    %c0_14 = arith.constant 0 : index
    %c0_15 = arith.constant 0 : index
    %18 = vector.load %arg6[%c0_14, %c0_15] : memref<64x256xbf16, #tpu.memory_space<vmem>>, vector<64x256xbf16>
    %cst_16 = arith.constant dense<0.000000e+00> : vector<8x256xf32>
    %19 = tpu.matmul %17, %18, %cst_16 {dimension_numbers = #tpu.dot_dimension_numbers<[1], [0], [0], [1], [0, 0, 1, 1], [], []>} : vector<8x64xbf16>, vector<64x256xbf16>, vector<8x256xf32> -> vector<8x256xf32>
    %20 = vector.extract_strided_slice %11 {offsets = [0, 0], sizes = [8, 128], strides = [1, 1]} : vector<8x256xf32> to vector<8x128xf32>
    %21 = vector.extract_strided_slice %19 {offsets = [0, 0], sizes = [8, 128], strides = [1, 1]} : vector<8x256xf32> to vector<8x128xf32>
    %22 = arith.addf %20, %21 : vector<8x128xf32>
    %23 = arith.negf %22 : vector<8x128xf32>
    %24 = math.exp %23 : vector<8x128xf32>
    %cst_17 = arith.constant 1.000000e+00 : f32
    %25 = vector.broadcast %cst_17 : f32 to vector<8x128xf32>
    %26 = arith.addf %25, %24 : vector<8x128xf32>
    %27 = arith.divf %25, %26 : vector<8x128xf32>
    %28 = math.tanh %22 : vector<8x128xf32>
    %29 = vector.extract_strided_slice %27 {offsets = [0, 0], sizes = [8, 32], strides = [1, 1]} : vector<8x128xf32> to vector<8x32xf32>
    %30 = vector.extract_strided_slice %27 {offsets = [0, 32], sizes = [8, 32], strides = [1, 1]} : vector<8x128xf32> to vector<8x32xf32>
    %31 = vector.extract_strided_slice %28 {offsets = [0, 64], sizes = [8, 32], strides = [1, 1]} : vector<8x128xf32> to vector<8x32xf32>
    %32 = vector.extract_strided_slice %27 {offsets = [0, 96], sizes = [8, 32], strides = [1, 1]} : vector<8x128xf32> to vector<8x32xf32>
    %33 = arith.mulf %30, %14 : vector<8x32xf32>
    %34 = arith.mulf %29, %31 : vector<8x32xf32>
    %35 = arith.addf %33, %34 : vector<8x32xf32>
    %36 = math.tanh %35 : vector<8x32xf32>
    %37 = arith.mulf %32, %36 : vector<8x32xf32>
    %c0_18 = arith.constant 0 : index
    %c0_19 = arith.constant 0 : index
    %38 = vector.load %arg13[%c0_18, %c0_19] : memref<64x64xf32, #tpu.memory_space<vmem>>, vector<8x32xf32>
    tpu.vector_store %arg13[%c0_18, %c0_19], %37 {strides = array<i32>} : memref<64x64xf32, #tpu.memory_space<vmem>>, vector<8x32xf32>,
    %39 = vector.extract_strided_slice %11 {offsets = [0, 128], sizes = [8, 128], strides = [1, 1]} : vector<8x256xf32> to vector<8x128xf32>
    %40 = vector.extract_strided_slice %19 {offsets = [0, 128], sizes = [8, 128], strides = [1, 1]} : vector<8x256xf32> to vector<8x128xf32>
    %41 = arith.addf %39, %40 : vector<8x128xf32>
    %42 = arith.negf %41 : vector<8x128xf32>
    %43 = math.exp %42 : vector<8x128xf32>
    %cst_20 = arith.constant 1.000000e+00 : f32
    %44 = vector.broadcast %cst_20 : f32 to vector<8x128xf32>
    %45 = arith.addf %44, %43 : vector<8x128xf32>
    %46 = arith.divf %44, %45 : vector<8x128xf32>
    %47 = math.tanh %41 : vector<8x128xf32>
    %48 = vector.extract_strided_slice %46 {offsets = [0, 0], sizes = [8, 32], strides = [1, 1]} : vector<8x128xf32> to vector<8x32xf32>
    %49 = vector.extract_strided_slice %46 {offsets = [0, 32], sizes = [8, 32], strides = [1, 1]} : vector<8x128xf32> to vector<8x32xf32>
    %50 = vector.extract_strided_slice %47 {offsets = [0, 64], sizes = [8, 32], strides = [1, 1]} : vector<8x128xf32> to vector<8x32xf32>
    %51 = vector.extract_strided_slice %46 {offsets = [0, 96], sizes = [8, 32], strides = [1, 1]} : vector<8x128xf32> to vector<8x32xf32>
    %52 = arith.mulf %49, %15 : vector<8x32xf32>
    %53 = arith.mulf %48, %50 : vector<8x32xf32>
    %54 = arith.addf %52, %53 : vector<8x32xf32>
    %55 = math.tanh %54 : vector<8x32xf32>
    %56 = arith.mulf %51, %55 : vector<8x32xf32>
    %c56 = arith.constant 56 : index
    %c32 = arith.constant 32 : index
    %57 = vector.load %arg13[%c56, %c32] : memref<64x64xf32, #tpu.memory_space<vmem>>, vector<8x32xf32>
    tpu.vector_store %arg13[%c56, %c32], %56 {strides = array<i32>} : memref<64x64xf32, #tpu.memory_space<vmem>>, vector<8x32xf32>,
    %58 = tpu.concatenate %37, %56 in 1 : vector<8x32xf32>, vector<8x32xf32> -> vector<8x64xf32>
    %59 = arith.truncf %58 : vector<8x64xf32> to vector<8x64xbf16>
    %c0_21 = arith.constant 0 : index
    %c0_22 = arith.constant 0 : index
    %60 = vector.load %arg6[%c0_21, %c0_22] : memref<64x256xbf16, #tpu.memory_space<vmem>>, vector<64x256xbf16>
    %cst_23 = arith.constant dense<0.000000e+00> : vector<8x256xf32>
    %61 = tpu.matmul %59, %60, %cst_23 {dimension_numbers = #tpu.dot_dimension_numbers<[1], [0], [0], [1], [0, 0, 1, 1], [], []>} : vector<8x64xbf16>, vector<64x256xbf16>, vector<8x256xf32> -> vector<8x256xf32>
    %62 = vector.extract_strided_slice %11 {offsets = [0, 0], sizes = [8, 128], strides = [1, 1]} : vector<8x256xf32> to vector<8x128xf32>
    %63 = vector.extract_strided_slice %61 {offsets = [0, 0], sizes = [8, 128], strides = [1, 1]} : vector<8x256xf32> to vector<8x128xf32>
    %64 = arith.addf %62, %63 : vector<8x128xf32>
    %65 = arith.negf %64 : vector<8x128xf32>
    %66 = math.exp %65 : vector<8x128xf32>
    %cst_24 = arith.constant 1.000000e+00 : f32
    %67 = vector.broadcast %cst_24 : f32 to vector<8x128xf32>
    %68 = arith.addf %67, %66 : vector<8x128xf32>
    %69 = arith.divf %67, %68 : vector<8x128xf32>
    %70 = math.tanh %64 : vector<8x128xf32>
    %71 = vector.extract_strided_slice %69 {offsets = [0, 0], sizes = [8, 32], strides = [1, 1]} : vector<8x128xf32> to vector<8x32xf32>
    %72 = vector.extract_strided_slice %69 {offsets = [0, 32], sizes = [8, 32], strides = [1, 1]} : vector<8x128xf32> to vector<8x32xf32>
    %73 = vector.extract_strided_slice %70 {offsets = [0, 64], sizes = [8, 32], strides = [1, 1]} : vector<8x128xf32> to vector<8x32xf32>
    %74 = vector.extract_strided_slice %69 {offsets = [0, 96], sizes = [8, 32], strides = [1, 1]} : vector<8x128xf32> to vector<8x32xf32>
    %75 = arith.mulf %72, %35 : vector<8x32xf32>
    %76 = arith.mulf %71, %73 : vector<8x32xf32>
    %77 = arith.addf %75, %76 : vector<8x32xf32>
    %78 = math.tanh %77 : vector<8x32xf32>
    %79 = arith.mulf %74, %78 : vector<8x32xf32>
    %c8 = arith.constant 8 : index
    %c0_25 = arith.constant 0 : index
    %80 = vector.load %arg13[%c8, %c0_25] : memref<64x64xf32, #tpu.memory_space<vmem>>, vector<8x32xf32>
    tpu.vector_store %arg13[%c8, %c0_25], %79 {strides = array<i32>} : memref<64x64xf32, #tpu.memory_space<vmem>>, vector<8x32xf32>,
    %81 = vector.extract_strided_slice %11 {offsets = [0, 128], sizes = [8, 128], strides = [1, 1]} : vector<8x256xf32> to vector<8x128xf32>
    %82 = vector.extract_strided_slice %61 {offsets = [0, 128], sizes = [8, 128], strides = [1, 1]} : vector<8x256xf32> to vector<8x128xf32>
    %83 = arith.addf %81, %82 : vector<8x128xf32>
    %84 = arith.negf %83 : vector<8x128xf32>
    %85 = math.exp %84 : vector<8x128xf32>
    %cst_26 = arith.constant 1.000000e+00 : f32
    %86 = vector.broadcast %cst_26 : f32 to vector<8x128xf32>
    %87 = arith.addf %86, %85 : vector<8x128xf32>
    %88 = arith.divf %86, %87 : vector<8x128xf32>
    %89 = math.tanh %83 : vector<8x128xf32>
    %90 = vector.extract_strided_slice %88 {offsets = [0, 0], sizes = [8, 32], strides = [1, 1]} : vector<8x128xf32> to vector<8x32xf32>
    %91 = vector.extract_strided_slice %88 {offsets = [0, 32], sizes = [8, 32], strides = [1, 1]} : vector<8x128xf32> to vector<8x32xf32>
    %92 = vector.extract_strided_slice %89 {offsets = [0, 64], sizes = [8, 32], strides = [1, 1]} : vector<8x128xf32> to vector<8x32xf32>
    %93 = vector.extract_strided_slice %88 {offsets = [0, 96], sizes = [8, 32], strides = [1, 1]} : vector<8x128xf32> to vector<8x32xf32>
    %94 = arith.mulf %91, %54 : vector<8x32xf32>
    %95 = arith.mulf %90, %92 : vector<8x32xf32>
    %96 = arith.addf %94, %95 : vector<8x32xf32>
    %97 = math.tanh %96 : vector<8x32xf32>
    %98 = arith.mulf %93, %97 : vector<8x32xf32>
    %c48 = arith.constant 48 : index
    %c32_27 = arith.constant 32 : index
    %99 = vector.load %arg13[%c48, %c32_27] : memref<64x64xf32, #tpu.memory_space<vmem>>, vector<8x32xf32>
    tpu.vector_store %arg13[%c48, %c32_27], %98 {strides = array<i32>} : memref<64x64xf32, #tpu.memory_space<vmem>>, vector<8x32xf32>,
    %100 = tpu.concatenate %79, %98 in 1 : vector<8x32xf32>, vector<8x32xf32> -> vector<8x64xf32>
    %101 = arith.truncf %100 : vector<8x64xf32> to vector<8x64xbf16>
    %c0_28 = arith.constant 0 : index
    %c0_29 = arith.constant 0 : index
    %102 = vector.load %arg6[%c0_28, %c0_29] : memref<64x256xbf16, #tpu.memory_space<vmem>>, vector<64x256xbf16>
    %cst_30 = arith.constant dense<0.000000e+00> : vector<8x256xf32>
    %103 = tpu.matmul %101, %102, %cst_30 {dimension_numbers = #tpu.dot_dimension_numbers<[1], [0], [0], [1], [0, 0, 1, 1], [], []>} : vector<8x64xbf16>, vector<64x256xbf16>, vector<8x256xf32> -> vector<8x256xf32>
    %104 = vector.extract_strided_slice %11 {offsets = [0, 0], sizes = [8, 128], strides = [1, 1]} : vector<8x256xf32> to vector<8x128xf32>
    %105 = vector.extract_strided_slice %103 {offsets = [0, 0], sizes = [8, 128], strides = [1, 1]} : vector<8x256xf32> to vector<8x128xf32>
    %106 = arith.addf %104, %105 : vector<8x128xf32>
    %107 = arith.negf %106 : vector<8x128xf32>
    %108 = math.exp %107 : vector<8x128xf32>
    %cst_31 = arith.constant 1.000000e+00 : f32
    %109 = vector.broadcast %cst_31 : f32 to vector<8x128xf32>
    %110 = arith.addf %109, %108 : vector<8x128xf32>
    %111 = arith.divf %109, %110 : vector<8x128xf32>
    %112 = math.tanh %106 : vector<8x128xf32>
    %113 = vector.extract_strided_slice %111 {offsets = [0, 0], sizes = [8, 32], strides = [1, 1]} : vector<8x128xf32> to vector<8x32xf32>
    %114 = vector.extract_strided_slice %111 {offsets = [0, 32], sizes = [8, 32], strides = [1, 1]} : vector<8x128xf32> to vector<8x32xf32>
    %115 = vector.extract_strided_slice %112 {offsets = [0, 64], sizes = [8, 32], strides = [1, 1]} : vector<8x128xf32> to vector<8x32xf32>
    %116 = vector.extract_strided_slice %111 {offsets = [0, 96], sizes = [8, 32], strides = [1, 1]} : vector<8x128xf32> to vector<8x32xf32>
    %117 = arith.mulf %114, %77 : vector<8x32xf32>
    %118 = arith.mulf %113, %115 : vector<8x32xf32>
    %119 = arith.addf %117, %118 : vector<8x32xf32>
    %120 = math.tanh %119 : vector<8x32xf32>
    %121 = arith.mulf %116, %120 : vector<8x32xf32>
    %c16 = arith.constant 16 : index
    %c0_32 = arith.constant 0 : index
    %122 = vector.load %arg13[%c16, %c0_32] : memref<64x64xf32, #tpu.memory_space<vmem>>, vector<8x32xf32>
    tpu.vector_store %arg13[%c16, %c0_32], %121 {strides = array<i32>} : memref<64x64xf32, #tpu.memory_space<vmem>>, vector<8x32xf32>,
    %123 = vector.extract_strided_slice %11 {offsets = [0, 128], sizes = [8, 128], strides = [1, 1]} : vector<8x256xf32> to vector<8x128xf32>
    %124 = vector.extract_strided_slice %103 {offsets = [0, 128], sizes = [8, 128], strides = [1, 1]} : vector<8x256xf32> to vector<8x128xf32>
    %125 = arith.addf %123, %124 : vector<8x128xf32>
    %126 = arith.negf %125 : vector<8x128xf32>
    %127 = math.exp %126 : vector<8x128xf32>
    %cst_33 = arith.constant 1.000000e+00 : f32
    %128 = vector.broadcast %cst_33 : f32 to vector<8x128xf32>
    %129 = arith.addf %128, %127 : vector<8x128xf32>
    %130 = arith.divf %128, %129 : vector<8x128xf32>
    %131 = math.tanh %125 : vector<8x128xf32>
    %132 = vector.extract_strided_slice %130 {offsets = [0, 0], sizes = [8, 32], strides = [1, 1]} : vector<8x128xf32> to vector<8x32xf32>
    %133 = vector.extract_strided_slice %130 {offsets = [0, 32], sizes = [8, 32], strides = [1, 1]} : vector<8x128xf32> to vector<8x32xf32>
    %134 = vector.extract_strided_slice %131 {offsets = [0, 64], sizes = [8, 32], strides = [1, 1]} : vector<8x128xf32> to vector<8x32xf32>
    %135 = vector.extract_strided_slice %130 {offsets = [0, 96], sizes = [8, 32], strides = [1, 1]} : vector<8x128xf32> to vector<8x32xf32>
    %136 = arith.mulf %133, %96 : vector<8x32xf32>
    %137 = arith.mulf %132, %134 : vector<8x32xf32>
    %138 = arith.addf %136, %137 : vector<8x32xf32>
    %139 = math.tanh %138 : vector<8x32xf32>
    %140 = arith.mulf %135, %139 : vector<8x32xf32>
    %c40 = arith.constant 40 : index
    %c32_34 = arith.constant 32 : index
    %141 = vector.load %arg13[%c40, %c32_34] : memref<64x64xf32, #tpu.memory_space<vmem>>, vector<8x32xf32>
    tpu.vector_store %arg13[%c40, %c32_34], %140 {strides = array<i32>} : memref<64x64xf32, #tpu.memory_space<vmem>>, vector<8x32xf32>,
    %142 = tpu.concatenate %121, %140 in 1 : vector<8x32xf32>, vector<8x32xf32> -> vector<8x64xf32>
    %143 = arith.truncf %142 : vector<8x64xf32> to vector<8x64xbf16>
    %c0_35 = arith.constant 0 : index
    %c0_36 = arith.constant 0 : index
    %144 = vector.load %arg6[%c0_35, %c0_36] : memref<64x256xbf16, #tpu.memory_space<vmem>>, vector<64x256xbf16>
    %cst_37 = arith.constant dense<0.000000e+00> : vector<8x256xf32>
    %145 = tpu.matmul %143, %144, %cst_37 {dimension_numbers = #tpu.dot_dimension_numbers<[1], [0], [0], [1], [0, 0, 1, 1], [], []>} : vector<8x64xbf16>, vector<64x256xbf16>, vector<8x256xf32> -> vector<8x256xf32>
    %146 = vector.extract_strided_slice %11 {offsets = [0, 0], sizes = [8, 128], strides = [1, 1]} : vector<8x256xf32> to vector<8x128xf32>
    %147 = vector.extract_strided_slice %145 {offsets = [0, 0], sizes = [8, 128], strides = [1, 1]} : vector<8x256xf32> to vector<8x128xf32>
    %148 = arith.addf %146, %147 : vector<8x128xf32>
    %149 = arith.negf %148 : vector<8x128xf32>
    %150 = math.exp %149 : vector<8x128xf32>
    %cst_38 = arith.constant 1.000000e+00 : f32
    %151 = vector.broadcast %cst_38 : f32 to vector<8x128xf32>
    %152 = arith.addf %151, %150 : vector<8x128xf32>
    %153 = arith.divf %151, %152 : vector<8x128xf32>
    %154 = math.tanh %148 : vector<8x128xf32>
    %155 = vector.extract_strided_slice %153 {offsets = [0, 0], sizes = [8, 32], strides = [1, 1]} : vector<8x128xf32> to vector<8x32xf32>
    %156 = vector.extract_strided_slice %153 {offsets = [0, 32], sizes = [8, 32], strides = [1, 1]} : vector<8x128xf32> to vector<8x32xf32>
    %157 = vector.extract_strided_slice %154 {offsets = [0, 64], sizes = [8, 32], strides = [1, 1]} : vector<8x128xf32> to vector<8x32xf32>
    %158 = vector.extract_strided_slice %153 {offsets = [0, 96], sizes = [8, 32], strides = [1, 1]} : vector<8x128xf32> to vector<8x32xf32>
    %159 = arith.mulf %156, %119 : vector<8x32xf32>
    %160 = arith.mulf %155, %157 : vector<8x32xf32>
    %161 = arith.addf %159, %160 : vector<8x32xf32>
    %162 = math.tanh %161 : vector<8x32xf32>
    %163 = arith.mulf %158, %162 : vector<8x32xf32>
    %c24 = arith.constant 24 : index
    %c0_39 = arith.constant 0 : index
    %164 = vector.load %arg13[%c24, %c0_39] : memref<64x64xf32, #tpu.memory_space<vmem>>, vector<8x32xf32>
    tpu.vector_store %arg13[%c24, %c0_39], %163 {strides = array<i32>} : memref<64x64xf32, #tpu.memory_space<vmem>>, vector<8x32xf32>,
    %165 = vector.extract_strided_slice %11 {offsets = [0, 128], sizes = [8, 128], strides = [1, 1]} : vector<8x256xf32> to vector<8x128xf32>
    %166 = vector.extract_strided_slice %145 {offsets = [0, 128], sizes = [8, 128], strides = [1, 1]} : vector<8x256xf32> to vector<8x128xf32>
    %167 = arith.addf %165, %166 : vector<8x128xf32>
    %168 = arith.negf %167 : vector<8x128xf32>
    %169 = math.exp %168 : vector<8x128xf32>
    %cst_40 = arith.constant 1.000000e+00 : f32
    %170 = vector.broadcast %cst_40 : f32 to vector<8x128xf32>
    %171 = arith.addf %170, %169 : vector<8x128xf32>
    %172 = arith.divf %170, %171 : vector<8x128xf32>
    %173 = math.tanh %167 : vector<8x128xf32>
    %174 = vector.extract_strided_slice %172 {offsets = [0, 0], sizes = [8, 32], strides = [1, 1]} : vector<8x128xf32> to vector<8x32xf32>
    %175 = vector.extract_strided_slice %172 {offsets = [0, 32], sizes = [8, 32], strides = [1, 1]} : vector<8x128xf32> to vector<8x32xf32>
    %176 = vector.extract_strided_slice %173 {offsets = [0, 64], sizes = [8, 32], strides = [1, 1]} : vector<8x128xf32> to vector<8x32xf32>
    %177 = vector.extract_strided_slice %172 {offsets = [0, 96], sizes = [8, 32], strides = [1, 1]} : vector<8x128xf32> to vector<8x32xf32>
    %178 = arith.mulf %175, %138 : vector<8x32xf32>
    %179 = arith.mulf %174, %176 : vector<8x32xf32>
    %180 = arith.addf %178, %179 : vector<8x32xf32>
    %181 = math.tanh %180 : vector<8x32xf32>
    %182 = arith.mulf %177, %181 : vector<8x32xf32>
    %c32_41 = arith.constant 32 : index
    %c32_42 = arith.constant 32 : index
    %183 = vector.load %arg13[%c32_41, %c32_42] : memref<64x64xf32, #tpu.memory_space<vmem>>, vector<8x32xf32>
    tpu.vector_store %arg13[%c32_41, %c32_42], %182 {strides = array<i32>} : memref<64x64xf32, #tpu.memory_space<vmem>>, vector<8x32xf32>,
    %184 = tpu.concatenate %163, %182 in 1 : vector<8x32xf32>, vector<8x32xf32> -> vector<8x64xf32>
    %185 = arith.truncf %184 : vector<8x64xf32> to vector<8x64xbf16>
    %c0_43 = arith.constant 0 : index
    %c0_44 = arith.constant 0 : index
    %186 = vector.load %arg6[%c0_43, %c0_44] : memref<64x256xbf16, #tpu.memory_space<vmem>>, vector<64x256xbf16>
    %cst_45 = arith.constant dense<0.000000e+00> : vector<8x256xf32>
    %187 = tpu.matmul %185, %186, %cst_45 {dimension_numbers = #tpu.dot_dimension_numbers<[1], [0], [0], [1], [0, 0, 1, 1], [], []>} : vector<8x64xbf16>, vector<64x256xbf16>, vector<8x256xf32> -> vector<8x256xf32>
    %188 = vector.extract_strided_slice %11 {offsets = [0, 0], sizes = [8, 128], strides = [1, 1]} : vector<8x256xf32> to vector<8x128xf32>
    %189 = vector.extract_strided_slice %187 {offsets = [0, 0], sizes = [8, 128], strides = [1, 1]} : vector<8x256xf32> to vector<8x128xf32>
    %190 = arith.addf %188, %189 : vector<8x128xf32>
    %191 = arith.negf %190 : vector<8x128xf32>
    %192 = math.exp %191 : vector<8x128xf32>
    %cst_46 = arith.constant 1.000000e+00 : f32
    %193 = vector.broadcast %cst_46 : f32 to vector<8x128xf32>
    %194 = arith.addf %193, %192 : vector<8x128xf32>
    %195 = arith.divf %193, %194 : vector<8x128xf32>
    %196 = math.tanh %190 : vector<8x128xf32>
    %197 = vector.extract_strided_slice %195 {offsets = [0, 0], sizes = [8, 32], strides = [1, 1]} : vector<8x128xf32> to vector<8x32xf32>
    %198 = vector.extract_strided_slice %195 {offsets = [0, 32], sizes = [8, 32], strides = [1, 1]} : vector<8x128xf32> to vector<8x32xf32>
    %199 = vector.extract_strided_slice %196 {offsets = [0, 64], sizes = [8, 32], strides = [1, 1]} : vector<8x128xf32> to vector<8x32xf32>
    %200 = vector.extract_strided_slice %195 {offsets = [0, 96], sizes = [8, 32], strides = [1, 1]} : vector<8x128xf32> to vector<8x32xf32>
    %201 = arith.mulf %198, %161 : vector<8x32xf32>
    %202 = arith.mulf %197, %199 : vector<8x32xf32>
    %203 = arith.addf %201, %202 : vector<8x32xf32>
    %204 = math.tanh %203 : vector<8x32xf32>
    %205 = arith.mulf %200, %204 : vector<8x32xf32>
    %c32_47 = arith.constant 32 : index
    %c0_48 = arith.constant 0 : index
    %206 = vector.load %arg13[%c32_47, %c0_48] : memref<64x64xf32, #tpu.memory_space<vmem>>, vector<8x32xf32>
    tpu.vector_store %arg13[%c32_47, %c0_48], %205 {strides = array<i32>} : memref<64x64xf32, #tpu.memory_space<vmem>>, vector<8x32xf32>,
    %207 = vector.extract_strided_slice %11 {offsets = [0, 128], sizes = [8, 128], strides = [1, 1]} : vector<8x256xf32> to vector<8x128xf32>
    %208 = vector.extract_strided_slice %187 {offsets = [0, 128], sizes = [8, 128], strides = [1, 1]} : vector<8x256xf32> to vector<8x128xf32>
    %209 = arith.addf %207, %208 : vector<8x128xf32>
    %210 = arith.negf %209 : vector<8x128xf32>
    %211 = math.exp %210 : vector<8x128xf32>
    %cst_49 = arith.constant 1.000000e+00 : f32
    %212 = vector.broadcast %cst_49 : f32 to vector<8x128xf32>
    %213 = arith.addf %212, %211 : vector<8x128xf32>
    %214 = arith.divf %212, %213 : vector<8x128xf32>
    %215 = math.tanh %209 : vector<8x128xf32>
    %216 = vector.extract_strided_slice %214 {offsets = [0, 0], sizes = [8, 32], strides = [1, 1]} : vector<8x128xf32> to vector<8x32xf32>
    %217 = vector.extract_strided_slice %214 {offsets = [0, 32], sizes = [8, 32], strides = [1, 1]} : vector<8x128xf32> to vector<8x32xf32>
    %218 = vector.extract_strided_slice %215 {offsets = [0, 64], sizes = [8, 32], strides = [1, 1]} : vector<8x128xf32> to vector<8x32xf32>
    %219 = vector.extract_strided_slice %214 {offsets = [0, 96], sizes = [8, 32], strides = [1, 1]} : vector<8x128xf32> to vector<8x32xf32>
    %220 = arith.mulf %217, %180 : vector<8x32xf32>
    %221 = arith.mulf %216, %218 : vector<8x32xf32>
    %222 = arith.addf %220, %221 : vector<8x32xf32>
    %223 = math.tanh %222 : vector<8x32xf32>
    %224 = arith.mulf %219, %223 : vector<8x32xf32>
    %c24_50 = arith.constant 24 : index
    %c32_51 = arith.constant 32 : index
    %225 = vector.load %arg13[%c24_50, %c32_51] : memref<64x64xf32, #tpu.memory_space<vmem>>, vector<8x32xf32>
    tpu.vector_store %arg13[%c24_50, %c32_51], %224 {strides = array<i32>} : memref<64x64xf32, #tpu.memory_space<vmem>>, vector<8x32xf32>,
    %226 = tpu.concatenate %205, %224 in 1 : vector<8x32xf32>, vector<8x32xf32> -> vector<8x64xf32>
    %227 = arith.truncf %226 : vector<8x64xf32> to vector<8x64xbf16>
    %c0_52 = arith.constant 0 : index
    %c0_53 = arith.constant 0 : index
    %228 = vector.load %arg6[%c0_52, %c0_53] : memref<64x256xbf16, #tpu.memory_space<vmem>>, vector<64x256xbf16>
    %cst_54 = arith.constant dense<0.000000e+00> : vector<8x256xf32>
    %229 = tpu.matmul %227, %228, %cst_54 {dimension_numbers = #tpu.dot_dimension_numbers<[1], [0], [0], [1], [0, 0, 1, 1], [], []>} : vector<8x64xbf16>, vector<64x256xbf16>, vector<8x256xf32> -> vector<8x256xf32>
    %230 = vector.extract_strided_slice %11 {offsets = [0, 0], sizes = [8, 128], strides = [1, 1]} : vector<8x256xf32> to vector<8x128xf32>
    %231 = vector.extract_strided_slice %229 {offsets = [0, 0], sizes = [8, 128], strides = [1, 1]} : vector<8x256xf32> to vector<8x128xf32>
    %232 = arith.addf %230, %231 : vector<8x128xf32>
    %233 = arith.negf %232 : vector<8x128xf32>
    %234 = math.exp %233 : vector<8x128xf32>
    %cst_55 = arith.constant 1.000000e+00 : f32
    %235 = vector.broadcast %cst_55 : f32 to vector<8x128xf32>
    %236 = arith.addf %235, %234 : vector<8x128xf32>
    %237 = arith.divf %235, %236 : vector<8x128xf32>
    %238 = math.tanh %232 : vector<8x128xf32>
    %239 = vector.extract_strided_slice %237 {offsets = [0, 0], sizes = [8, 32], strides = [1, 1]} : vector<8x128xf32> to vector<8x32xf32>
    %240 = vector.extract_strided_slice %237 {offsets = [0, 32], sizes = [8, 32], strides = [1, 1]} : vector<8x128xf32> to vector<8x32xf32>
    %241 = vector.extract_strided_slice %238 {offsets = [0, 64], sizes = [8, 32], strides = [1, 1]} : vector<8x128xf32> to vector<8x32xf32>
    %242 = vector.extract_strided_slice %237 {offsets = [0, 96], sizes = [8, 32], strides = [1, 1]} : vector<8x128xf32> to vector<8x32xf32>
    %243 = arith.mulf %240, %203 : vector<8x32xf32>
    %244 = arith.mulf %239, %241 : vector<8x32xf32>
    %245 = arith.addf %243, %244 : vector<8x32xf32>
    %246 = math.tanh %245 : vector<8x32xf32>
    %247 = arith.mulf %242, %246 : vector<8x32xf32>
    %c40_56 = arith.constant 40 : index
    %c0_57 = arith.constant 0 : index
    %248 = vector.load %arg13[%c40_56, %c0_57] : memref<64x64xf32, #tpu.memory_space<vmem>>, vector<8x32xf32>
    tpu.vector_store %arg13[%c40_56, %c0_57], %247 {strides = array<i32>} : memref<64x64xf32, #tpu.memory_space<vmem>>, vector<8x32xf32>,
    %249 = vector.extract_strided_slice %11 {offsets = [0, 128], sizes = [8, 128], strides = [1, 1]} : vector<8x256xf32> to vector<8x128xf32>
    %250 = vector.extract_strided_slice %229 {offsets = [0, 128], sizes = [8, 128], strides = [1, 1]} : vector<8x256xf32> to vector<8x128xf32>
    %251 = arith.addf %249, %250 : vector<8x128xf32>
    %252 = arith.negf %251 : vector<8x128xf32>
    %253 = math.exp %252 : vector<8x128xf32>
    %cst_58 = arith.constant 1.000000e+00 : f32
    %254 = vector.broadcast %cst_58 : f32 to vector<8x128xf32>
    %255 = arith.addf %254, %253 : vector<8x128xf32>
    %256 = arith.divf %254, %255 : vector<8x128xf32>
    %257 = math.tanh %251 : vector<8x128xf32>
    %258 = vector.extract_strided_slice %256 {offsets = [0, 0], sizes = [8, 32], strides = [1, 1]} : vector<8x128xf32> to vector<8x32xf32>
    %259 = vector.extract_strided_slice %256 {offsets = [0, 32], sizes = [8, 32], strides = [1, 1]} : vector<8x128xf32> to vector<8x32xf32>
    %260 = vector.extract_strided_slice %257 {offsets = [0, 64], sizes = [8, 32], strides = [1, 1]} : vector<8x128xf32> to vector<8x32xf32>
    %261 = vector.extract_strided_slice %256 {offsets = [0, 96], sizes = [8, 32], strides = [1, 1]} : vector<8x128xf32> to vector<8x32xf32>
    %262 = arith.mulf %259, %222 : vector<8x32xf32>
    %263 = arith.mulf %258, %260 : vector<8x32xf32>
    %264 = arith.addf %262, %263 : vector<8x32xf32>
    %265 = math.tanh %264 : vector<8x32xf32>
    %266 = arith.mulf %261, %265 : vector<8x32xf32>
    %c16_59 = arith.constant 16 : index
    %c32_60 = arith.constant 32 : index
    %267 = vector.load %arg13[%c16_59, %c32_60] : memref<64x64xf32, #tpu.memory_space<vmem>>, vector<8x32xf32>
    tpu.vector_store %arg13[%c16_59, %c32_60], %266 {strides = array<i32>} : memref<64x64xf32, #tpu.memory_space<vmem>>, vector<8x32xf32>,
    %268 = tpu.concatenate %247, %266 in 1 : vector<8x32xf32>, vector<8x32xf32> -> vector<8x64xf32>
    %269 = arith.truncf %268 : vector<8x64xf32> to vector<8x64xbf16>
    %c0_61 = arith.constant 0 : index
    %c0_62 = arith.constant 0 : index
    %270 = vector.load %arg6[%c0_61, %c0_62] : memref<64x256xbf16, #tpu.memory_space<vmem>>, vector<64x256xbf16>
    %cst_63 = arith.constant dense<0.000000e+00> : vector<8x256xf32>
    %271 = tpu.matmul %269, %270, %cst_63 {dimension_numbers = #tpu.dot_dimension_numbers<[1], [0], [0], [1], [0, 0, 1, 1], [], []>} : vector<8x64xbf16>, vector<64x256xbf16>, vector<8x256xf32> -> vector<8x256xf32>
    %272 = vector.extract_strided_slice %11 {offsets = [0, 0], sizes = [8, 128], strides = [1, 1]} : vector<8x256xf32> to vector<8x128xf32>
    %273 = vector.extract_strided_slice %271 {offsets = [0, 0], sizes = [8, 128], strides = [1, 1]} : vector<8x256xf32> to vector<8x128xf32>
    %274 = arith.addf %272, %273 : vector<8x128xf32>
    %275 = arith.negf %274 : vector<8x128xf32>
    %276 = math.exp %275 : vector<8x128xf32>
    %cst_64 = arith.constant 1.000000e+00 : f32
    %277 = vector.broadcast %cst_64 : f32 to vector<8x128xf32>
    %278 = arith.addf %277, %276 : vector<8x128xf32>
    %279 = arith.divf %277, %278 : vector<8x128xf32>
    %280 = math.tanh %274 : vector<8x128xf32>
    %281 = vector.extract_strided_slice %279 {offsets = [0, 0], sizes = [8, 32], strides = [1, 1]} : vector<8x128xf32> to vector<8x32xf32>
    %282 = vector.extract_strided_slice %279 {offsets = [0, 32], sizes = [8, 32], strides = [1, 1]} : vector<8x128xf32> to vector<8x32xf32>
    %283 = vector.extract_strided_slice %280 {offsets = [0, 64], sizes = [8, 32], strides = [1, 1]} : vector<8x128xf32> to vector<8x32xf32>
    %284 = vector.extract_strided_slice %279 {offsets = [0, 96], sizes = [8, 32], strides = [1, 1]} : vector<8x128xf32> to vector<8x32xf32>
    %285 = arith.mulf %282, %245 : vector<8x32xf32>
    %286 = arith.mulf %281, %283 : vector<8x32xf32>
    %287 = arith.addf %285, %286 : vector<8x32xf32>
    %288 = math.tanh %287 : vector<8x32xf32>
    %289 = arith.mulf %284, %288 : vector<8x32xf32>
    %c48_65 = arith.constant 48 : index
    %c0_66 = arith.constant 0 : index
    %290 = vector.load %arg13[%c48_65, %c0_66] : memref<64x64xf32, #tpu.memory_space<vmem>>, vector<8x32xf32>
    tpu.vector_store %arg13[%c48_65, %c0_66], %289 {strides = array<i32>} : memref<64x64xf32, #tpu.memory_space<vmem>>, vector<8x32xf32>,
    %291 = vector.extract_strided_slice %11 {offsets = [0, 128], sizes = [8, 128], strides = [1, 1]} : vector<8x256xf32> to vector<8x128xf32>
    %292 = vector.extract_strided_slice %271 {offsets = [0, 128], sizes = [8, 128], strides = [1, 1]} : vector<8x256xf32> to vector<8x128xf32>
    %293 = arith.addf %291, %292 : vector<8x128xf32>
    %294 = arith.negf %293 : vector<8x128xf32>
    %295 = math.exp %294 : vector<8x128xf32>
    %cst_67 = arith.constant 1.000000e+00 : f32
    %296 = vector.broadcast %cst_67 : f32 to vector<8x128xf32>
    %297 = arith.addf %296, %295 : vector<8x128xf32>
    %298 = arith.divf %296, %297 : vector<8x128xf32>
    %299 = math.tanh %293 : vector<8x128xf32>
    %300 = vector.extract_strided_slice %298 {offsets = [0, 0], sizes = [8, 32], strides = [1, 1]} : vector<8x128xf32> to vector<8x32xf32>
    %301 = vector.extract_strided_slice %298 {offsets = [0, 32], sizes = [8, 32], strides = [1, 1]} : vector<8x128xf32> to vector<8x32xf32>
    %302 = vector.extract_strided_slice %299 {offsets = [0, 64], sizes = [8, 32], strides = [1, 1]} : vector<8x128xf32> to vector<8x32xf32>
    %303 = vector.extract_strided_slice %298 {offsets = [0, 96], sizes = [8, 32], strides = [1, 1]} : vector<8x128xf32> to vector<8x32xf32>
    %304 = arith.mulf %301, %264 : vector<8x32xf32>
    %305 = arith.mulf %300, %302 : vector<8x32xf32>
    %306 = arith.addf %304, %305 : vector<8x32xf32>
    %307 = math.tanh %306 : vector<8x32xf32>
    %308 = arith.mulf %303, %307 : vector<8x32xf32>
    %c8_68 = arith.constant 8 : index
    %c32_69 = arith.constant 32 : index
    %309 = vector.load %arg13[%c8_68, %c32_69] : memref<64x64xf32, #tpu.memory_space<vmem>>, vector<8x32xf32>
    tpu.vector_store %arg13[%c8_68, %c32_69], %308 {strides = array<i32>} : memref<64x64xf32, #tpu.memory_space<vmem>>, vector<8x32xf32>,
    %310 = tpu.concatenate %289, %308 in 1 : vector<8x32xf32>, vector<8x32xf32> -> vector<8x64xf32>
    %311 = arith.truncf %310 : vector<8x64xf32> to vector<8x64xbf16>
    %c0_70 = arith.constant 0 : index
    %c0_71 = arith.constant 0 : index
    %312 = vector.load %arg6[%c0_70, %c0_71] : memref<64x256xbf16, #tpu.memory_space<vmem>>, vector<64x256xbf16>
    %cst_72 = arith.constant dense<0.000000e+00> : vector<8x256xf32>
    %313 = tpu.matmul %311, %312, %cst_72 {dimension_numbers = #tpu.dot_dimension_numbers<[1], [0], [0], [1], [0, 0, 1, 1], [], []>} : vector<8x64xbf16>, vector<64x256xbf16>, vector<8x256xf32> -> vector<8x256xf32>
    %314 = vector.extract_strided_slice %11 {offsets = [0, 0], sizes = [8, 128], strides = [1, 1]} : vector<8x256xf32> to vector<8x128xf32>
    %315 = vector.extract_strided_slice %313 {offsets = [0, 0], sizes = [8, 128], strides = [1, 1]} : vector<8x256xf32> to vector<8x128xf32>
    %316 = arith.addf %314, %315 : vector<8x128xf32>
    %317 = arith.negf %316 : vector<8x128xf32>
    %318 = math.exp %317 : vector<8x128xf32>
    %cst_73 = arith.constant 1.000000e+00 : f32
    %319 = vector.broadcast %cst_73 : f32 to vector<8x128xf32>
    %320 = arith.addf %319, %318 : vector<8x128xf32>
    %321 = arith.divf %319, %320 : vector<8x128xf32>
    %322 = math.tanh %316 : vector<8x128xf32>
    %323 = vector.extract_strided_slice %321 {offsets = [0, 0], sizes = [8, 32], strides = [1, 1]} : vector<8x128xf32> to vector<8x32xf32>
    %324 = vector.extract_strided_slice %321 {offsets = [0, 32], sizes = [8, 32], strides = [1, 1]} : vector<8x128xf32> to vector<8x32xf32>
    %325 = vector.extract_strided_slice %322 {offsets = [0, 64], sizes = [8, 32], strides = [1, 1]} : vector<8x128xf32> to vector<8x32xf32>
    %326 = vector.extract_strided_slice %321 {offsets = [0, 96], sizes = [8, 32], strides = [1, 1]} : vector<8x128xf32> to vector<8x32xf32>
    %327 = arith.mulf %324, %287 : vector<8x32xf32>
    %328 = arith.mulf %323, %325 : vector<8x32xf32>
    %329 = arith.addf %327, %328 : vector<8x32xf32>
    %330 = math.tanh %329 : vector<8x32xf32>
    %331 = arith.mulf %326, %330 : vector<8x32xf32>
    %c56_74 = arith.constant 56 : index
    %c0_75 = arith.constant 0 : index
    %332 = vector.load %arg13[%c56_74, %c0_75] : memref<64x64xf32, #tpu.memory_space<vmem>>, vector<8x32xf32>
    tpu.vector_store %arg13[%c56_74, %c0_75], %331 {strides = array<i32>} : memref<64x64xf32, #tpu.memory_space<vmem>>, vector<8x32xf32>,
    %333 = vector.extract_strided_slice %11 {offsets = [0, 128], sizes = [8, 128], strides = [1, 1]} : vector<8x256xf32> to vector<8x128xf32>
    %334 = vector.extract_strided_slice %313 {offsets = [0, 128], sizes = [8, 128], strides = [1, 1]} : vector<8x256xf32> to vector<8x128xf32>
    %335 = arith.addf %333, %334 : vector<8x128xf32>
    %336 = arith.negf %335 : vector<8x128xf32>
    %337 = math.exp %336 : vector<8x128xf32>
    %cst_76 = arith.constant 1.000000e+00 : f32
    %338 = vector.broadcast %cst_76 : f32 to vector<8x128xf32>
    %339 = arith.addf %338, %337 : vector<8x128xf32>
    %340 = arith.divf %338, %339 : vector<8x128xf32>
    %341 = math.tanh %335 : vector<8x128xf32>
    %342 = vector.extract_strided_slice %340 {offsets = [0, 0], sizes = [8, 32], strides = [1, 1]} : vector<8x128xf32> to vector<8x32xf32>
    %343 = vector.extract_strided_slice %340 {offsets = [0, 32], sizes = [8, 32], strides = [1, 1]} : vector<8x128xf32> to vector<8x32xf32>
    %344 = vector.extract_strided_slice %341 {offsets = [0, 64], sizes = [8, 32], strides = [1, 1]} : vector<8x128xf32> to vector<8x32xf32>
    %345 = vector.extract_strided_slice %340 {offsets = [0, 96], sizes = [8, 32], strides = [1, 1]} : vector<8x128xf32> to vector<8x32xf32>
    %346 = arith.mulf %343, %306 : vector<8x32xf32>
    %347 = arith.mulf %342, %344 : vector<8x32xf32>
    %348 = arith.addf %346, %347 : vector<8x32xf32>
    %349 = math.tanh %348 : vector<8x32xf32>
    %350 = arith.mulf %345, %349 : vector<8x32xf32>
    %c0_77 = arith.constant 0 : index
    %c32_78 = arith.constant 32 : index
    %351 = vector.load %arg13[%c0_77, %c32_78] : memref<64x64xf32, #tpu.memory_space<vmem>>, vector<8x32xf32>
    tpu.vector_store %arg13[%c0_77, %c32_78], %350 {strides = array<i32>} : memref<64x64xf32, #tpu.memory_space<vmem>>, vector<8x32xf32>,
    %c0_79 = arith.constant 0 : index
    %c0_80 = arith.constant 0 : index
    %352 = vector.load %arg13[%c0_79, %c0_80] : memref<64x64xf32, #tpu.memory_space<vmem>>, vector<64x64xf32>
    %353 = arith.truncf %352 : vector<64x64xf32> to vector<64x64xbf16>
    %c0_81 = arith.constant 0 : index
    %c0_82 = arith.constant 0 : index
    %354 = vector.load %arg7[%c0_81, %c0_82] : memref<64x256xbf16, #tpu.memory_space<vmem>>, vector<64x256xbf16>
    %cst_83 = arith.constant dense<0.000000e+00> : vector<64x256xf32>
    %355 = tpu.matmul %353, %354, %cst_83 {dimension_numbers = #tpu.dot_dimension_numbers<[1], [0], [0], [1], [0, 0, 1, 1], [], []>} : vector<64x64xbf16>, vector<64x256xbf16>, vector<64x256xf32> -> vector<64x256xf32>
    %c0_84 = arith.constant 0 : index
    %c0_85 = arith.constant 0 : index
    %356 = vector.load %arg8[%c0_84, %c0_85] : memref<1x256xf32, #tpu.memory_space<vmem>>, vector<1x256xf32>
    %357 = vector.broadcast %356 : vector<1x256xf32> to vector<64x256xf32>
    %358 = arith.addf %355, %357 : vector<64x256xf32>
    %c0_86 = arith.constant 0 : index
    %c0_87 = arith.constant 0 : index
    %359 = vector.load %arg15[%c0_86, %c0_87] : memref<64x256xf32, #tpu.memory_space<vmem>>, vector<64x256xf32>
    tpu.vector_store %arg15[%c0_86, %c0_87], %358 {strides = array<i32>} : memref<64x256xf32, #tpu.memory_space<vmem>>, vector<64x256xf32>,
    %cst_88 = arith.constant 0.000000e+00 : f32
    %360 = vector.broadcast %cst_88 : f32 to vector<8x32xf32>
    %cst_89 = arith.constant 0.000000e+00 : f32
    %361 = vector.broadcast %cst_89 : f32 to vector<8x32xf32>
    %cst_90 = arith.constant 0.000000e+00 : f32
    %362 = vector.broadcast %cst_90 : f32 to vector<8x32xf32>
    %cst_91 = arith.constant 0.000000e+00 : f32
    %363 = vector.broadcast %cst_91 : f32 to vector<8x32xf32>
    %364 = tpu.concatenate %360, %361 in 1 : vector<8x32xf32>, vector<8x32xf32> -> vector<8x64xf32>
    %365 = arith.truncf %364 : vector<8x64xf32> to vector<8x64xbf16>
    %c0_92 = arith.constant 0 : index
    %c0_93 = arith.constant 0 : index
    %366 = vector.load %arg9[%c0_92, %c0_93] : memref<64x256xbf16, #tpu.memory_space<vmem>>, vector<64x256xbf16>
    %cst_94 = arith.constant dense<0.000000e+00> : vector<8x256xf32>
    %367 = tpu.matmul %365, %366, %cst_94 {dimension_numbers = #tpu.dot_dimension_numbers<[1], [0], [0], [1], [0, 0, 1, 1], [], []>} : vector<8x64xbf16>, vector<64x256xbf16>, vector<8x256xf32> -> vector<8x256xf32>
    %c0_95 = arith.constant 0 : index
    %c0_96 = arith.constant 0 : index
    %368 = vector.load %arg15[%c0_95, %c0_96] : memref<64x256xf32, #tpu.memory_space<vmem>>, vector<8x128xf32>
    %369 = vector.extract_strided_slice %367 {offsets = [0, 0], sizes = [8, 128], strides = [1, 1]} : vector<8x256xf32> to vector<8x128xf32>
    %370 = arith.addf %368, %369 : vector<8x128xf32>
    %371 = arith.negf %370 : vector<8x128xf32>
    %372 = math.exp %371 : vector<8x128xf32>
    %cst_97 = arith.constant 1.000000e+00 : f32
    %373 = vector.broadcast %cst_97 : f32 to vector<8x128xf32>
    %374 = arith.addf %373, %372 : vector<8x128xf32>
    %375 = arith.divf %373, %374 : vector<8x128xf32>
    %376 = math.tanh %370 : vector<8x128xf32>
    %377 = vector.extract_strided_slice %375 {offsets = [0, 0], sizes = [8, 32], strides = [1, 1]} : vector<8x128xf32> to vector<8x32xf32>
    %378 = vector.extract_strided_slice %375 {offsets = [0, 32], sizes = [8, 32], strides = [1, 1]} : vector<8x128xf32> to vector<8x32xf32>
    %379 = vector.extract_strided_slice %376 {offsets = [0, 64], sizes = [8, 32], strides = [1, 1]} : vector<8x128xf32> to vector<8x32xf32>
    %380 = vector.extract_strided_slice %375 {offsets = [0, 96], sizes = [8, 32], strides = [1, 1]} : vector<8x128xf32> to vector<8x32xf32>
    %381 = arith.mulf %378, %362 : vector<8x32xf32>
    %382 = arith.mulf %377, %379 : vector<8x32xf32>
    %383 = arith.addf %381, %382 : vector<8x32xf32>
    %384 = math.tanh %383 : vector<8x32xf32>
    %385 = arith.mulf %380, %384 : vector<8x32xf32>
    %c0_98 = arith.constant 0 : index
    %c0_99 = arith.constant 0 : index
    %386 = vector.load %arg14[%c0_98, %c0_99] : memref<64x64xf32, #tpu.memory_space<vmem>>, vector<8x32xf32>
    tpu.vector_store %arg14[%c0_98, %c0_99], %385 {strides = array<i32>} : memref<64x64xf32, #tpu.memory_space<vmem>>, vector<8x32xf32>,
    %c56_100 = arith.constant 56 : index
    %c128 = arith.constant 128 : index
    %387 = vector.load %arg15[%c56_100, %c128] : memref<64x256xf32, #tpu.memory_space<vmem>>, vector<8x128xf32>
    %388 = vector.extract_strided_slice %367 {offsets = [0, 128], sizes = [8, 128], strides = [1, 1]} : vector<8x256xf32> to vector<8x128xf32>
    %389 = arith.addf %387, %388 : vector<8x128xf32>
    %390 = arith.negf %389 : vector<8x128xf32>
    %391 = math.exp %390 : vector<8x128xf32>
    %cst_101 = arith.constant 1.000000e+00 : f32
    %392 = vector.broadcast %cst_101 : f32 to vector<8x128xf32>
    %393 = arith.addf %392, %391 : vector<8x128xf32>
    %394 = arith.divf %392, %393 : vector<8x128xf32>
    %395 = math.tanh %389 : vector<8x128xf32>
    %396 = vector.extract_strided_slice %394 {offsets = [0, 0], sizes = [8, 32], strides = [1, 1]} : vector<8x128xf32> to vector<8x32xf32>
    %397 = vector.extract_strided_slice %394 {offsets = [0, 32], sizes = [8, 32], strides = [1, 1]} : vector<8x128xf32> to vector<8x32xf32>
    %398 = vector.extract_strided_slice %395 {offsets = [0, 64], sizes = [8, 32], strides = [1, 1]} : vector<8x128xf32> to vector<8x32xf32>
    %399 = vector.extract_strided_slice %394 {offsets = [0, 96], sizes = [8, 32], strides = [1, 1]} : vector<8x128xf32> to vector<8x32xf32>
    %400 = arith.mulf %397, %363 : vector<8x32xf32>
    %401 = arith.mulf %396, %398 : vector<8x32xf32>
    %402 = arith.addf %400, %401 : vector<8x32xf32>
    %403 = math.tanh %402 : vector<8x32xf32>
    %404 = arith.mulf %399, %403 : vector<8x32xf32>
    %c56_102 = arith.constant 56 : index
    %c32_103 = arith.constant 32 : index
    %405 = vector.load %arg14[%c56_102, %c32_103] : memref<64x64xf32, #tpu.memory_space<vmem>>, vector<8x32xf32>
    tpu.vector_store %arg14[%c56_102, %c32_103], %404 {strides = array<i32>} : memref<64x64xf32, #tpu.memory_space<vmem>>, vector<8x32xf32>,
    %406 = tpu.concatenate %385, %404 in 1 : vector<8x32xf32>, vector<8x32xf32> -> vector<8x64xf32>
    %407 = arith.truncf %406 : vector<8x64xf32> to vector<8x64xbf16>
    %c0_104 = arith.constant 0 : index
    %c0_105 = arith.constant 0 : index
    %408 = vector.load %arg9[%c0_104, %c0_105] : memref<64x256xbf16, #tpu.memory_space<vmem>>, vector<64x256xbf16>
    %cst_106 = arith.constant dense<0.000000e+00> : vector<8x256xf32>
    %409 = tpu.matmul %407, %408, %cst_106 {dimension_numbers = #tpu.dot_dimension_numbers<[1], [0], [0], [1], [0, 0, 1, 1], [], []>} : vector<8x64xbf16>, vector<64x256xbf16>, vector<8x256xf32> -> vector<8x256xf32>
    %c8_107 = arith.constant 8 : index
    %c0_108 = arith.constant 0 : index
    %410 = vector.load %arg15[%c8_107, %c0_108] : memref<64x256xf32, #tpu.memory_space<vmem>>, vector<8x128xf32>
    %411 = vector.extract_strided_slice %409 {offsets = [0, 0], sizes = [8, 128], strides = [1, 1]} : vector<8x256xf32> to vector<8x128xf32>
    %412 = arith.addf %410, %411 : vector<8x128xf32>
    %413 = arith.negf %412 : vector<8x128xf32>
    %414 = math.exp %413 : vector<8x128xf32>
    %cst_109 = arith.constant 1.000000e+00 : f32
    %415 = vector.broadcast %cst_109 : f32 to vector<8x128xf32>
    %416 = arith.addf %415, %414 : vector<8x128xf32>
    %417 = arith.divf %415, %416 : vector<8x128xf32>
    %418 = math.tanh %412 : vector<8x128xf32>
    %419 = vector.extract_strided_slice %417 {offsets = [0, 0], sizes = [8, 32], strides = [1, 1]} : vector<8x128xf32> to vector<8x32xf32>
    %420 = vector.extract_strided_slice %417 {offsets = [0, 32], sizes = [8, 32], strides = [1, 1]} : vector<8x128xf32> to vector<8x32xf32>
    %421 = vector.extract_strided_slice %418 {offsets = [0, 64], sizes = [8, 32], strides = [1, 1]} : vector<8x128xf32> to vector<8x32xf32>
    %422 = vector.extract_strided_slice %417 {offsets = [0, 96], sizes = [8, 32], strides = [1, 1]} : vector<8x128xf32> to vector<8x32xf32>
    %423 = arith.mulf %420, %383 : vector<8x32xf32>
    %424 = arith.mulf %419, %421 : vector<8x32xf32>
    %425 = arith.addf %423, %424 : vector<8x32xf32>
    %426 = math.tanh %425 : vector<8x32xf32>
    %427 = arith.mulf %422, %426 : vector<8x32xf32>
    %c8_110 = arith.constant 8 : index
    %c0_111 = arith.constant 0 : index
    %428 = vector.load %arg14[%c8_110, %c0_111] : memref<64x64xf32, #tpu.memory_space<vmem>>, vector<8x32xf32>
    tpu.vector_store %arg14[%c8_110, %c0_111], %427 {strides = array<i32>} : memref<64x64xf32, #tpu.memory_space<vmem>>, vector<8x32xf32>,
    %c48_112 = arith.constant 48 : index
    %c128_113 = arith.constant 128 : index
    %429 = vector.load %arg15[%c48_112, %c128_113] : memref<64x256xf32, #tpu.memory_space<vmem>>, vector<8x128xf32>
    %430 = vector.extract_strided_slice %409 {offsets = [0, 128], sizes = [8, 128], strides = [1, 1]} : vector<8x256xf32> to vector<8x128xf32>
    %431 = arith.addf %429, %430 : vector<8x128xf32>
    %432 = arith.negf %431 : vector<8x128xf32>
    %433 = math.exp %432 : vector<8x128xf32>
    %cst_114 = arith.constant 1.000000e+00 : f32
    %434 = vector.broadcast %cst_114 : f32 to vector<8x128xf32>
    %435 = arith.addf %434, %433 : vector<8x128xf32>
    %436 = arith.divf %434, %435 : vector<8x128xf32>
    %437 = math.tanh %431 : vector<8x128xf32>
    %438 = vector.extract_strided_slice %436 {offsets = [0, 0], sizes = [8, 32], strides = [1, 1]} : vector<8x128xf32> to vector<8x32xf32>
    %439 = vector.extract_strided_slice %436 {offsets = [0, 32], sizes = [8, 32], strides = [1, 1]} : vector<8x128xf32> to vector<8x32xf32>
    %440 = vector.extract_strided_slice %437 {offsets = [0, 64], sizes = [8, 32], strides = [1, 1]} : vector<8x128xf32> to vector<8x32xf32>
    %441 = vector.extract_strided_slice %436 {offsets = [0, 96], sizes = [8, 32], strides = [1, 1]} : vector<8x128xf32> to vector<8x32xf32>
    %442 = arith.mulf %439, %402 : vector<8x32xf32>
    %443 = arith.mulf %438, %440 : vector<8x32xf32>
    %444 = arith.addf %442, %443 : vector<8x32xf32>
    %445 = math.tanh %444 : vector<8x32xf32>
    %446 = arith.mulf %441, %445 : vector<8x32xf32>
    %c48_115 = arith.constant 48 : index
    %c32_116 = arith.constant 32 : index
    %447 = vector.load %arg14[%c48_115, %c32_116] : memref<64x64xf32, #tpu.memory_space<vmem>>, vector<8x32xf32>
    tpu.vector_store %arg14[%c48_115, %c32_116], %446 {strides = array<i32>} : memref<64x64xf32, #tpu.memory_space<vmem>>, vector<8x32xf32>,
    %448 = tpu.concatenate %427, %446 in 1 : vector<8x32xf32>, vector<8x32xf32> -> vector<8x64xf32>
    %449 = arith.truncf %448 : vector<8x64xf32> to vector<8x64xbf16>
    %c0_117 = arith.constant 0 : index
    %c0_118 = arith.constant 0 : index
    %450 = vector.load %arg9[%c0_117, %c0_118] : memref<64x256xbf16, #tpu.memory_space<vmem>>, vector<64x256xbf16>
    %cst_119 = arith.constant dense<0.000000e+00> : vector<8x256xf32>
    %451 = tpu.matmul %449, %450, %cst_119 {dimension_numbers = #tpu.dot_dimension_numbers<[1], [0], [0], [1], [0, 0, 1, 1], [], []>} : vector<8x64xbf16>, vector<64x256xbf16>, vector<8x256xf32> -> vector<8x256xf32>
    %c16_120 = arith.constant 16 : index
    %c0_121 = arith.constant 0 : index
    %452 = vector.load %arg15[%c16_120, %c0_121] : memref<64x256xf32, #tpu.memory_space<vmem>>, vector<8x128xf32>
    %453 = vector.extract_strided_slice %451 {offsets = [0, 0], sizes = [8, 128], strides = [1, 1]} : vector<8x256xf32> to vector<8x128xf32>
    %454 = arith.addf %452, %453 : vector<8x128xf32>
    %455 = arith.negf %454 : vector<8x128xf32>
    %456 = math.exp %455 : vector<8x128xf32>
    %cst_122 = arith.constant 1.000000e+00 : f32
    %457 = vector.broadcast %cst_122 : f32 to vector<8x128xf32>
    %458 = arith.addf %457, %456 : vector<8x128xf32>
    %459 = arith.divf %457, %458 : vector<8x128xf32>
    %460 = math.tanh %454 : vector<8x128xf32>
    %461 = vector.extract_strided_slice %459 {offsets = [0, 0], sizes = [8, 32], strides = [1, 1]} : vector<8x128xf32> to vector<8x32xf32>
    %462 = vector.extract_strided_slice %459 {offsets = [0, 32], sizes = [8, 32], strides = [1, 1]} : vector<8x128xf32> to vector<8x32xf32>
    %463 = vector.extract_strided_slice %460 {offsets = [0, 64], sizes = [8, 32], strides = [1, 1]} : vector<8x128xf32> to vector<8x32xf32>
    %464 = vector.extract_strided_slice %459 {offsets = [0, 96], sizes = [8, 32], strides = [1, 1]} : vector<8x128xf32> to vector<8x32xf32>
    %465 = arith.mulf %462, %425 : vector<8x32xf32>
    %466 = arith.mulf %461, %463 : vector<8x32xf32>
    %467 = arith.addf %465, %466 : vector<8x32xf32>
    %468 = math.tanh %467 : vector<8x32xf32>
    %469 = arith.mulf %464, %468 : vector<8x32xf32>
    %c16_123 = arith.constant 16 : index
    %c0_124 = arith.constant 0 : index
    %470 = vector.load %arg14[%c16_123, %c0_124] : memref<64x64xf32, #tpu.memory_space<vmem>>, vector<8x32xf32>
    tpu.vector_store %arg14[%c16_123, %c0_124], %469 {strides = array<i32>} : memref<64x64xf32, #tpu.memory_space<vmem>>, vector<8x32xf32>,
    %c40_125 = arith.constant 40 : index
    %c128_126 = arith.constant 128 : index
    %471 = vector.load %arg15[%c40_125, %c128_126] : memref<64x256xf32, #tpu.memory_space<vmem>>, vector<8x128xf32>
    %472 = vector.extract_strided_slice %451 {offsets = [0, 128], sizes = [8, 128], strides = [1, 1]} : vector<8x256xf32> to vector<8x128xf32>
    %473 = arith.addf %471, %472 : vector<8x128xf32>
    %474 = arith.negf %473 : vector<8x128xf32>
    %475 = math.exp %474 : vector<8x128xf32>
    %cst_127 = arith.constant 1.000000e+00 : f32
    %476 = vector.broadcast %cst_127 : f32 to vector<8x128xf32>
    %477 = arith.addf %476, %475 : vector<8x128xf32>
    %478 = arith.divf %476, %477 : vector<8x128xf32>
    %479 = math.tanh %473 : vector<8x128xf32>
    %480 = vector.extract_strided_slice %478 {offsets = [0, 0], sizes = [8, 32], strides = [1, 1]} : vector<8x128xf32> to vector<8x32xf32>
    %481 = vector.extract_strided_slice %478 {offsets = [0, 32], sizes = [8, 32], strides = [1, 1]} : vector<8x128xf32> to vector<8x32xf32>
    %482 = vector.extract_strided_slice %479 {offsets = [0, 64], sizes = [8, 32], strides = [1, 1]} : vector<8x128xf32> to vector<8x32xf32>
    %483 = vector.extract_strided_slice %478 {offsets = [0, 96], sizes = [8, 32], strides = [1, 1]} : vector<8x128xf32> to vector<8x32xf32>
    %484 = arith.mulf %481, %444 : vector<8x32xf32>
    %485 = arith.mulf %480, %482 : vector<8x32xf32>
    %486 = arith.addf %484, %485 : vector<8x32xf32>
    %487 = math.tanh %486 : vector<8x32xf32>
    %488 = arith.mulf %483, %487 : vector<8x32xf32>
    %c40_128 = arith.constant 40 : index
    %c32_129 = arith.constant 32 : index
    %489 = vector.load %arg14[%c40_128, %c32_129] : memref<64x64xf32, #tpu.memory_space<vmem>>, vector<8x32xf32>
    tpu.vector_store %arg14[%c40_128, %c32_129], %488 {strides = array<i32>} : memref<64x64xf32, #tpu.memory_space<vmem>>, vector<8x32xf32>,
    %490 = tpu.concatenate %469, %488 in 1 : vector<8x32xf32>, vector<8x32xf32> -> vector<8x64xf32>
    %491 = arith.truncf %490 : vector<8x64xf32> to vector<8x64xbf16>
    %c0_130 = arith.constant 0 : index
    %c0_131 = arith.constant 0 : index
    %492 = vector.load %arg9[%c0_130, %c0_131] : memref<64x256xbf16, #tpu.memory_space<vmem>>, vector<64x256xbf16>
    %cst_132 = arith.constant dense<0.000000e+00> : vector<8x256xf32>
    %493 = tpu.matmul %491, %492, %cst_132 {dimension_numbers = #tpu.dot_dimension_numbers<[1], [0], [0], [1], [0, 0, 1, 1], [], []>} : vector<8x64xbf16>, vector<64x256xbf16>, vector<8x256xf32> -> vector<8x256xf32>
    %c24_133 = arith.constant 24 : index
    %c0_134 = arith.constant 0 : index
    %494 = vector.load %arg15[%c24_133, %c0_134] : memref<64x256xf32, #tpu.memory_space<vmem>>, vector<8x128xf32>
    %495 = vector.extract_strided_slice %493 {offsets = [0, 0], sizes = [8, 128], strides = [1, 1]} : vector<8x256xf32> to vector<8x128xf32>
    %496 = arith.addf %494, %495 : vector<8x128xf32>
    %497 = arith.negf %496 : vector<8x128xf32>
    %498 = math.exp %497 : vector<8x128xf32>
    %cst_135 = arith.constant 1.000000e+00 : f32
    %499 = vector.broadcast %cst_135 : f32 to vector<8x128xf32>
    %500 = arith.addf %499, %498 : vector<8x128xf32>
    %501 = arith.divf %499, %500 : vector<8x128xf32>
    %502 = math.tanh %496 : vector<8x128xf32>
    %503 = vector.extract_strided_slice %501 {offsets = [0, 0], sizes = [8, 32], strides = [1, 1]} : vector<8x128xf32> to vector<8x32xf32>
    %504 = vector.extract_strided_slice %501 {offsets = [0, 32], sizes = [8, 32], strides = [1, 1]} : vector<8x128xf32> to vector<8x32xf32>
    %505 = vector.extract_strided_slice %502 {offsets = [0, 64], sizes = [8, 32], strides = [1, 1]} : vector<8x128xf32> to vector<8x32xf32>
    %506 = vector.extract_strided_slice %501 {offsets = [0, 96], sizes = [8, 32], strides = [1, 1]} : vector<8x128xf32> to vector<8x32xf32>
    %507 = arith.mulf %504, %467 : vector<8x32xf32>
    %508 = arith.mulf %503, %505 : vector<8x32xf32>
    %509 = arith.addf %507, %508 : vector<8x32xf32>
    %510 = math.tanh %509 : vector<8x32xf32>
    %511 = arith.mulf %506, %510 : vector<8x32xf32>
    %c24_136 = arith.constant 24 : index
    %c0_137 = arith.constant 0 : index
    %512 = vector.load %arg14[%c24_136, %c0_137] : memref<64x64xf32, #tpu.memory_space<vmem>>, vector<8x32xf32>
    tpu.vector_store %arg14[%c24_136, %c0_137], %511 {strides = array<i32>} : memref<64x64xf32, #tpu.memory_space<vmem>>, vector<8x32xf32>,
    %c32_138 = arith.constant 32 : index
    %c128_139 = arith.constant 128 : index
    %513 = vector.load %arg15[%c32_138, %c128_139] : memref<64x256xf32, #tpu.memory_space<vmem>>, vector<8x128xf32>
    %514 = vector.extract_strided_slice %493 {offsets = [0, 128], sizes = [8, 128], strides = [1, 1]} : vector<8x256xf32> to vector<8x128xf32>
    %515 = arith.addf %513, %514 : vector<8x128xf32>
    %516 = arith.negf %515 : vector<8x128xf32>
    %517 = math.exp %516 : vector<8x128xf32>
    %cst_140 = arith.constant 1.000000e+00 : f32
    %518 = vector.broadcast %cst_140 : f32 to vector<8x128xf32>
    %519 = arith.addf %518, %517 : vector<8x128xf32>
    %520 = arith.divf %518, %519 : vector<8x128xf32>
    %521 = math.tanh %515 : vector<8x128xf32>
    %522 = vector.extract_strided_slice %520 {offsets = [0, 0], sizes = [8, 32], strides = [1, 1]} : vector<8x128xf32> to vector<8x32xf32>
    %523 = vector.extract_strided_slice %520 {offsets = [0, 32], sizes = [8, 32], strides = [1, 1]} : vector<8x128xf32> to vector<8x32xf32>
    %524 = vector.extract_strided_slice %521 {offsets = [0, 64], sizes = [8, 32], strides = [1, 1]} : vector<8x128xf32> to vector<8x32xf32>
    %525 = vector.extract_strided_slice %520 {offsets = [0, 96], sizes = [8, 32], strides = [1, 1]} : vector<8x128xf32> to vector<8x32xf32>
    %526 = arith.mulf %523, %486 : vector<8x32xf32>
    %527 = arith.mulf %522, %524 : vector<8x32xf32>
    %528 = arith.addf %526, %527 : vector<8x32xf32>
    %529 = math.tanh %528 : vector<8x32xf32>
    %530 = arith.mulf %525, %529 : vector<8x32xf32>
    %c32_141 = arith.constant 32 : index
    %c32_142 = arith.constant 32 : index
    %531 = vector.load %arg14[%c32_141, %c32_142] : memref<64x64xf32, #tpu.memory_space<vmem>>, vector<8x32xf32>
    tpu.vector_store %arg14[%c32_141, %c32_142], %530 {strides = array<i32>} : memref<64x64xf32, #tpu.memory_space<vmem>>, vector<8x32xf32>,
    %532 = tpu.concatenate %511, %530 in 1 : vector<8x32xf32>, vector<8x32xf32> -> vector<8x64xf32>
    %533 = arith.truncf %532 : vector<8x64xf32> to vector<8x64xbf16>
    %c0_143 = arith.constant 0 : index
    %c0_144 = arith.constant 0 : index
    %534 = vector.load %arg9[%c0_143, %c0_144] : memref<64x256xbf16, #tpu.memory_space<vmem>>, vector<64x256xbf16>
    %cst_145 = arith.constant dense<0.000000e+00> : vector<8x256xf32>
    %535 = tpu.matmul %533, %534, %cst_145 {dimension_numbers = #tpu.dot_dimension_numbers<[1], [0], [0], [1], [0, 0, 1, 1], [], []>} : vector<8x64xbf16>, vector<64x256xbf16>, vector<8x256xf32> -> vector<8x256xf32>
    %c32_146 = arith.constant 32 : index
    %c0_147 = arith.constant 0 : index
    %536 = vector.load %arg15[%c32_146, %c0_147] : memref<64x256xf32, #tpu.memory_space<vmem>>, vector<8x128xf32>
    %537 = vector.extract_strided_slice %535 {offsets = [0, 0], sizes = [8, 128], strides = [1, 1]} : vector<8x256xf32> to vector<8x128xf32>
    %538 = arith.addf %536, %537 : vector<8x128xf32>
    %539 = arith.negf %538 : vector<8x128xf32>
    %540 = math.exp %539 : vector<8x128xf32>
    %cst_148 = arith.constant 1.000000e+00 : f32
    %541 = vector.broadcast %cst_148 : f32 to vector<8x128xf32>
    %542 = arith.addf %541, %540 : vector<8x128xf32>
    %543 = arith.divf %541, %542 : vector<8x128xf32>
    %544 = math.tanh %538 : vector<8x128xf32>
    %545 = vector.extract_strided_slice %543 {offsets = [0, 0], sizes = [8, 32], strides = [1, 1]} : vector<8x128xf32> to vector<8x32xf32>
    %546 = vector.extract_strided_slice %543 {offsets = [0, 32], sizes = [8, 32], strides = [1, 1]} : vector<8x128xf32> to vector<8x32xf32>
    %547 = vector.extract_strided_slice %544 {offsets = [0, 64], sizes = [8, 32], strides = [1, 1]} : vector<8x128xf32> to vector<8x32xf32>
    %548 = vector.extract_strided_slice %543 {offsets = [0, 96], sizes = [8, 32], strides = [1, 1]} : vector<8x128xf32> to vector<8x32xf32>
    %549 = arith.mulf %546, %509 : vector<8x32xf32>
    %550 = arith.mulf %545, %547 : vector<8x32xf32>
    %551 = arith.addf %549, %550 : vector<8x32xf32>
    %552 = math.tanh %551 : vector<8x32xf32>
    %553 = arith.mulf %548, %552 : vector<8x32xf32>
    %c32_149 = arith.constant 32 : index
    %c0_150 = arith.constant 0 : index
    %554 = vector.load %arg14[%c32_149, %c0_150] : memref<64x64xf32, #tpu.memory_space<vmem>>, vector<8x32xf32>
    tpu.vector_store %arg14[%c32_149, %c0_150], %553 {strides = array<i32>} : memref<64x64xf32, #tpu.memory_space<vmem>>, vector<8x32xf32>,
    %c24_151 = arith.constant 24 : index
    %c128_152 = arith.constant 128 : index
    %555 = vector.load %arg15[%c24_151, %c128_152] : memref<64x256xf32, #tpu.memory_space<vmem>>, vector<8x128xf32>
    %556 = vector.extract_strided_slice %535 {offsets = [0, 128], sizes = [8, 128], strides = [1, 1]} : vector<8x256xf32> to vector<8x128xf32>
    %557 = arith.addf %555, %556 : vector<8x128xf32>
    %558 = arith.negf %557 : vector<8x128xf32>
    %559 = math.exp %558 : vector<8x128xf32>
    %cst_153 = arith.constant 1.000000e+00 : f32
    %560 = vector.broadcast %cst_153 : f32 to vector<8x128xf32>
    %561 = arith.addf %560, %559 : vector<8x128xf32>
    %562 = arith.divf %560, %561 : vector<8x128xf32>
    %563 = math.tanh %557 : vector<8x128xf32>
    %564 = vector.extract_strided_slice %562 {offsets = [0, 0], sizes = [8, 32], strides = [1, 1]} : vector<8x128xf32> to vector<8x32xf32>
    %565 = vector.extract_strided_slice %562 {offsets = [0, 32], sizes = [8, 32], strides = [1, 1]} : vector<8x128xf32> to vector<8x32xf32>
    %566 = vector.extract_strided_slice %563 {offsets = [0, 64], sizes = [8, 32], strides = [1, 1]} : vector<8x128xf32> to vector<8x32xf32>
    %567 = vector.extract_strided_slice %562 {offsets = [0, 96], sizes = [8, 32], strides = [1, 1]} : vector<8x128xf32> to vector<8x32xf32>
    %568 = arith.mulf %565, %528 : vector<8x32xf32>
    %569 = arith.mulf %564, %566 : vector<8x32xf32>
    %570 = arith.addf %568, %569 : vector<8x32xf32>
    %571 = math.tanh %570 : vector<8x32xf32>
    %572 = arith.mulf %567, %571 : vector<8x32xf32>
    %c24_154 = arith.constant 24 : index
    %c32_155 = arith.constant 32 : index
    %573 = vector.load %arg14[%c24_154, %c32_155] : memref<64x64xf32, #tpu.memory_space<vmem>>, vector<8x32xf32>
    tpu.vector_store %arg14[%c24_154, %c32_155], %572 {strides = array<i32>} : memref<64x64xf32, #tpu.memory_space<vmem>>, vector<8x32xf32>,
    %574 = tpu.concatenate %553, %572 in 1 : vector<8x32xf32>, vector<8x32xf32> -> vector<8x64xf32>
    %575 = arith.truncf %574 : vector<8x64xf32> to vector<8x64xbf16>
    %c0_156 = arith.constant 0 : index
    %c0_157 = arith.constant 0 : index
    %576 = vector.load %arg9[%c0_156, %c0_157] : memref<64x256xbf16, #tpu.memory_space<vmem>>, vector<64x256xbf16>
    %cst_158 = arith.constant dense<0.000000e+00> : vector<8x256xf32>
    %577 = tpu.matmul %575, %576, %cst_158 {dimension_numbers = #tpu.dot_dimension_numbers<[1], [0], [0], [1], [0, 0, 1, 1], [], []>} : vector<8x64xbf16>, vector<64x256xbf16>, vector<8x256xf32> -> vector<8x256xf32>
    %c40_159 = arith.constant 40 : index
    %c0_160 = arith.constant 0 : index
    %578 = vector.load %arg15[%c40_159, %c0_160] : memref<64x256xf32, #tpu.memory_space<vmem>>, vector<8x128xf32>
    %579 = vector.extract_strided_slice %577 {offsets = [0, 0], sizes = [8, 128], strides = [1, 1]} : vector<8x256xf32> to vector<8x128xf32>
    %580 = arith.addf %578, %579 : vector<8x128xf32>
    %581 = arith.negf %580 : vector<8x128xf32>
    %582 = math.exp %581 : vector<8x128xf32>
    %cst_161 = arith.constant 1.000000e+00 : f32
    %583 = vector.broadcast %cst_161 : f32 to vector<8x128xf32>
    %584 = arith.addf %583, %582 : vector<8x128xf32>
    %585 = arith.divf %583, %584 : vector<8x128xf32>
    %586 = math.tanh %580 : vector<8x128xf32>
    %587 = vector.extract_strided_slice %585 {offsets = [0, 0], sizes = [8, 32], strides = [1, 1]} : vector<8x128xf32> to vector<8x32xf32>
    %588 = vector.extract_strided_slice %585 {offsets = [0, 32], sizes = [8, 32], strides = [1, 1]} : vector<8x128xf32> to vector<8x32xf32>
    %589 = vector.extract_strided_slice %586 {offsets = [0, 64], sizes = [8, 32], strides = [1, 1]} : vector<8x128xf32> to vector<8x32xf32>
    %590 = vector.extract_strided_slice %585 {offsets = [0, 96], sizes = [8, 32], strides = [1, 1]} : vector<8x128xf32> to vector<8x32xf32>
    %591 = arith.mulf %588, %551 : vector<8x32xf32>
    %592 = arith.mulf %587, %589 : vector<8x32xf32>
    %593 = arith.addf %591, %592 : vector<8x32xf32>
    %594 = math.tanh %593 : vector<8x32xf32>
    %595 = arith.mulf %590, %594 : vector<8x32xf32>
    %c40_162 = arith.constant 40 : index
    %c0_163 = arith.constant 0 : index
    %596 = vector.load %arg14[%c40_162, %c0_163] : memref<64x64xf32, #tpu.memory_space<vmem>>, vector<8x32xf32>
    tpu.vector_store %arg14[%c40_162, %c0_163], %595 {strides = array<i32>} : memref<64x64xf32, #tpu.memory_space<vmem>>, vector<8x32xf32>,
    %c16_164 = arith.constant 16 : index
    %c128_165 = arith.constant 128 : index
    %597 = vector.load %arg15[%c16_164, %c128_165] : memref<64x256xf32, #tpu.memory_space<vmem>>, vector<8x128xf32>
    %598 = vector.extract_strided_slice %577 {offsets = [0, 128], sizes = [8, 128], strides = [1, 1]} : vector<8x256xf32> to vector<8x128xf32>
    %599 = arith.addf %597, %598 : vector<8x128xf32>
    %600 = arith.negf %599 : vector<8x128xf32>
    %601 = math.exp %600 : vector<8x128xf32>
    %cst_166 = arith.constant 1.000000e+00 : f32
    %602 = vector.broadcast %cst_166 : f32 to vector<8x128xf32>
    %603 = arith.addf %602, %601 : vector<8x128xf32>
    %604 = arith.divf %602, %603 : vector<8x128xf32>
    %605 = math.tanh %599 : vector<8x128xf32>
    %606 = vector.extract_strided_slice %604 {offsets = [0, 0], sizes = [8, 32], strides = [1, 1]} : vector<8x128xf32> to vector<8x32xf32>
    %607 = vector.extract_strided_slice %604 {offsets = [0, 32], sizes = [8, 32], strides = [1, 1]} : vector<8x128xf32> to vector<8x32xf32>
    %608 = vector.extract_strided_slice %605 {offsets = [0, 64], sizes = [8, 32], strides = [1, 1]} : vector<8x128xf32> to vector<8x32xf32>
    %609 = vector.extract_strided_slice %604 {offsets = [0, 96], sizes = [8, 32], strides = [1, 1]} : vector<8x128xf32> to vector<8x32xf32>
    %610 = arith.mulf %607, %570 : vector<8x32xf32>
    %611 = arith.mulf %606, %608 : vector<8x32xf32>
    %612 = arith.addf %610, %611 : vector<8x32xf32>
    %613 = math.tanh %612 : vector<8x32xf32>
    %614 = arith.mulf %609, %613 : vector<8x32xf32>
    %c16_167 = arith.constant 16 : index
    %c32_168 = arith.constant 32 : index
    %615 = vector.load %arg14[%c16_167, %c32_168] : memref<64x64xf32, #tpu.memory_space<vmem>>, vector<8x32xf32>
    tpu.vector_store %arg14[%c16_167, %c32_168], %614 {strides = array<i32>} : memref<64x64xf32, #tpu.memory_space<vmem>>, vector<8x32xf32>,
    %616 = tpu.concatenate %595, %614 in 1 : vector<8x32xf32>, vector<8x32xf32> -> vector<8x64xf32>
    %617 = arith.truncf %616 : vector<8x64xf32> to vector<8x64xbf16>
    %c0_169 = arith.constant 0 : index
    %c0_170 = arith.constant 0 : index
    %618 = vector.load %arg9[%c0_169, %c0_170] : memref<64x256xbf16, #tpu.memory_space<vmem>>, vector<64x256xbf16>
    %cst_171 = arith.constant dense<0.000000e+00> : vector<8x256xf32>
    %619 = tpu.matmul %617, %618, %cst_171 {dimension_numbers = #tpu.dot_dimension_numbers<[1], [0], [0], [1], [0, 0, 1, 1], [], []>} : vector<8x64xbf16>, vector<64x256xbf16>, vector<8x256xf32> -> vector<8x256xf32>
    %c48_172 = arith.constant 48 : index
    %c0_173 = arith.constant 0 : index
    %620 = vector.load %arg15[%c48_172, %c0_173] : memref<64x256xf32, #tpu.memory_space<vmem>>, vector<8x128xf32>
    %621 = vector.extract_strided_slice %619 {offsets = [0, 0], sizes = [8, 128], strides = [1, 1]} : vector<8x256xf32> to vector<8x128xf32>
    %622 = arith.addf %620, %621 : vector<8x128xf32>
    %623 = arith.negf %622 : vector<8x128xf32>
    %624 = math.exp %623 : vector<8x128xf32>
    %cst_174 = arith.constant 1.000000e+00 : f32
    %625 = vector.broadcast %cst_174 : f32 to vector<8x128xf32>
    %626 = arith.addf %625, %624 : vector<8x128xf32>
    %627 = arith.divf %625, %626 : vector<8x128xf32>
    %628 = math.tanh %622 : vector<8x128xf32>
    %629 = vector.extract_strided_slice %627 {offsets = [0, 0], sizes = [8, 32], strides = [1, 1]} : vector<8x128xf32> to vector<8x32xf32>
    %630 = vector.extract_strided_slice %627 {offsets = [0, 32], sizes = [8, 32], strides = [1, 1]} : vector<8x128xf32> to vector<8x32xf32>
    %631 = vector.extract_strided_slice %628 {offsets = [0, 64], sizes = [8, 32], strides = [1, 1]} : vector<8x128xf32> to vector<8x32xf32>
    %632 = vector.extract_strided_slice %627 {offsets = [0, 96], sizes = [8, 32], strides = [1, 1]} : vector<8x128xf32> to vector<8x32xf32>
    %633 = arith.mulf %630, %593 : vector<8x32xf32>
    %634 = arith.mulf %629, %631 : vector<8x32xf32>
    %635 = arith.addf %633, %634 : vector<8x32xf32>
    %636 = math.tanh %635 : vector<8x32xf32>
    %637 = arith.mulf %632, %636 : vector<8x32xf32>
    %c48_175 = arith.constant 48 : index
    %c0_176 = arith.constant 0 : index
    %638 = vector.load %arg14[%c48_175, %c0_176] : memref<64x64xf32, #tpu.memory_space<vmem>>, vector<8x32xf32>
    tpu.vector_store %arg14[%c48_175, %c0_176], %637 {strides = array<i32>} : memref<64x64xf32, #tpu.memory_space<vmem>>, vector<8x32xf32>,
    %c8_177 = arith.constant 8 : index
    %c128_178 = arith.constant 128 : index
    %639 = vector.load %arg15[%c8_177, %c128_178] : memref<64x256xf32, #tpu.memory_space<vmem>>, vector<8x128xf32>
    %640 = vector.extract_strided_slice %619 {offsets = [0, 128], sizes = [8, 128], strides = [1, 1]} : vector<8x256xf32> to vector<8x128xf32>
    %641 = arith.addf %639, %640 : vector<8x128xf32>
    %642 = arith.negf %641 : vector<8x128xf32>
    %643 = math.exp %642 : vector<8x128xf32>
    %cst_179 = arith.constant 1.000000e+00 : f32
    %644 = vector.broadcast %cst_179 : f32 to vector<8x128xf32>
    %645 = arith.addf %644, %643 : vector<8x128xf32>
    %646 = arith.divf %644, %645 : vector<8x128xf32>
    %647 = math.tanh %641 : vector<8x128xf32>
    %648 = vector.extract_strided_slice %646 {offsets = [0, 0], sizes = [8, 32], strides = [1, 1]} : vector<8x128xf32> to vector<8x32xf32>
    %649 = vector.extract_strided_slice %646 {offsets = [0, 32], sizes = [8, 32], strides = [1, 1]} : vector<8x128xf32> to vector<8x32xf32>
    %650 = vector.extract_strided_slice %647 {offsets = [0, 64], sizes = [8, 32], strides = [1, 1]} : vector<8x128xf32> to vector<8x32xf32>
    %651 = vector.extract_strided_slice %646 {offsets = [0, 96], sizes = [8, 32], strides = [1, 1]} : vector<8x128xf32> to vector<8x32xf32>
    %652 = arith.mulf %649, %612 : vector<8x32xf32>
    %653 = arith.mulf %648, %650 : vector<8x32xf32>
    %654 = arith.addf %652, %653 : vector<8x32xf32>
    %655 = math.tanh %654 : vector<8x32xf32>
    %656 = arith.mulf %651, %655 : vector<8x32xf32>
    %c8_180 = arith.constant 8 : index
    %c32_181 = arith.constant 32 : index
    %657 = vector.load %arg14[%c8_180, %c32_181] : memref<64x64xf32, #tpu.memory_space<vmem>>, vector<8x32xf32>
    tpu.vector_store %arg14[%c8_180, %c32_181], %656 {strides = array<i32>} : memref<64x64xf32, #tpu.memory_space<vmem>>, vector<8x32xf32>,
    %658 = tpu.concatenate %637, %656 in 1 : vector<8x32xf32>, vector<8x32xf32> -> vector<8x64xf32>
    %659 = arith.truncf %658 : vector<8x64xf32> to vector<8x64xbf16>
    %c0_182 = arith.constant 0 : index
    %c0_183 = arith.constant 0 : index
    %660 = vector.load %arg9[%c0_182, %c0_183] : memref<64x256xbf16, #tpu.memory_space<vmem>>, vector<64x256xbf16>
    %cst_184 = arith.constant dense<0.000000e+00> : vector<8x256xf32>
    %661 = tpu.matmul %659, %660, %cst_184 {dimension_numbers = #tpu.dot_dimension_numbers<[1], [0], [0], [1], [0, 0, 1, 1], [], []>} : vector<8x64xbf16>, vector<64x256xbf16>, vector<8x256xf32> -> vector<8x256xf32>
    %c56_185 = arith.constant 56 : index
    %c0_186 = arith.constant 0 : index
    %662 = vector.load %arg15[%c56_185, %c0_186] : memref<64x256xf32, #tpu.memory_space<vmem>>, vector<8x128xf32>
    %663 = vector.extract_strided_slice %661 {offsets = [0, 0], sizes = [8, 128], strides = [1, 1]} : vector<8x256xf32> to vector<8x128xf32>
    %664 = arith.addf %662, %663 : vector<8x128xf32>
    %665 = arith.negf %664 : vector<8x128xf32>
    %666 = math.exp %665 : vector<8x128xf32>
    %cst_187 = arith.constant 1.000000e+00 : f32
    %667 = vector.broadcast %cst_187 : f32 to vector<8x128xf32>
    %668 = arith.addf %667, %666 : vector<8x128xf32>
    %669 = arith.divf %667, %668 : vector<8x128xf32>
    %670 = math.tanh %664 : vector<8x128xf32>
    %671 = vector.extract_strided_slice %669 {offsets = [0, 0], sizes = [8, 32], strides = [1, 1]} : vector<8x128xf32> to vector<8x32xf32>
    %672 = vector.extract_strided_slice %669 {offsets = [0, 32], sizes = [8, 32], strides = [1, 1]} : vector<8x128xf32> to vector<8x32xf32>
    %673 = vector.extract_strided_slice %670 {offsets = [0, 64], sizes = [8, 32], strides = [1, 1]} : vector<8x128xf32> to vector<8x32xf32>
    %674 = vector.extract_strided_slice %669 {offsets = [0, 96], sizes = [8, 32], strides = [1, 1]} : vector<8x128xf32> to vector<8x32xf32>
    %675 = arith.mulf %672, %635 : vector<8x32xf32>
    %676 = arith.mulf %671, %673 : vector<8x32xf32>
    %677 = arith.addf %675, %676 : vector<8x32xf32>
    %678 = math.tanh %677 : vector<8x32xf32>
    %679 = arith.mulf %674, %678 : vector<8x32xf32>
    %c56_188 = arith.constant 56 : index
    %c0_189 = arith.constant 0 : index
    %680 = vector.load %arg14[%c56_188, %c0_189] : memref<64x64xf32, #tpu.memory_space<vmem>>, vector<8x32xf32>
    tpu.vector_store %arg14[%c56_188, %c0_189], %679 {strides = array<i32>} : memref<64x64xf32, #tpu.memory_space<vmem>>, vector<8x32xf32>,
    %c0_190 = arith.constant 0 : index
    %c128_191 = arith.constant 128 : index
    %681 = vector.load %arg15[%c0_190, %c128_191] : memref<64x256xf32, #tpu.memory_space<vmem>>, vector<8x128xf32>
    %682 = vector.extract_strided_slice %661 {offsets = [0, 128], sizes = [8, 128], strides = [1, 1]} : vector<8x256xf32> to vector<8x128xf32>
    %683 = arith.addf %681, %682 : vector<8x128xf32>
    %684 = arith.negf %683 : vector<8x128xf32>
    %685 = math.exp %684 : vector<8x128xf32>
    %cst_192 = arith.constant 1.000000e+00 : f32
    %686 = vector.broadcast %cst_192 : f32 to vector<8x128xf32>
    %687 = arith.addf %686, %685 : vector<8x128xf32>
    %688 = arith.divf %686, %687 : vector<8x128xf32>
    %689 = math.tanh %683 : vector<8x128xf32>
    %690 = vector.extract_strided_slice %688 {offsets = [0, 0], sizes = [8, 32], strides = [1, 1]} : vector<8x128xf32> to vector<8x32xf32>
    %691 = vector.extract_strided_slice %688 {offsets = [0, 32], sizes = [8, 32], strides = [1, 1]} : vector<8x128xf32> to vector<8x32xf32>
    %692 = vector.extract_strided_slice %689 {offsets = [0, 64], sizes = [8, 32], strides = [1, 1]} : vector<8x128xf32> to vector<8x32xf32>
    %693 = vector.extract_strided_slice %688 {offsets = [0, 96], sizes = [8, 32], strides = [1, 1]} : vector<8x128xf32> to vector<8x32xf32>
    %694 = arith.mulf %691, %654 : vector<8x32xf32>
    %695 = arith.mulf %690, %692 : vector<8x32xf32>
    %696 = arith.addf %694, %695 : vector<8x32xf32>
    %697 = math.tanh %696 : vector<8x32xf32>
    %698 = arith.mulf %693, %697 : vector<8x32xf32>
    %c0_193 = arith.constant 0 : index
    %c32_194 = arith.constant 32 : index
    %699 = vector.load %arg14[%c0_193, %c32_194] : memref<64x64xf32, #tpu.memory_space<vmem>>, vector<8x32xf32>
    tpu.vector_store %arg14[%c0_193, %c32_194], %698 {strides = array<i32>} : memref<64x64xf32, #tpu.memory_space<vmem>>, vector<8x32xf32>,
    %c0_195 = arith.constant 0 : index
    %c0_196 = arith.constant 0 : index
    %700 = vector.load %arg14[%c0_195, %c0_196] : memref<64x64xf32, #tpu.memory_space<vmem>>, vector<64x64xf32>
    %701 = arith.truncf %700 : vector<64x64xf32> to vector<64x64xbf16>
    %c0_197 = arith.constant 0 : index
    %c0_198 = arith.constant 0 : index
    %702 = vector.load %arg10[%c0_197, %c0_198] : memref<64x128xbf16, #tpu.memory_space<vmem>>, vector<64x128xbf16>
    %cst_199 = arith.constant dense<0.000000e+00> : vector<64x128xf32>
    %703 = tpu.matmul %701, %702, %cst_199 {dimension_numbers = #tpu.dot_dimension_numbers<[1], [0], [0], [1], [0, 0, 1, 1], [], []>} : vector<64x64xbf16>, vector<64x128xbf16>, vector<64x128xf32> -> vector<64x128xf32>
    %c0_200 = arith.constant 0 : index
    %c0_201 = arith.constant 0 : index
    %704 = vector.load %arg11[%c0_200, %c0_201] : memref<1x128xf32, #tpu.memory_space<vmem>>, vector<1x128xf32>
    %705 = vector.broadcast %704 : vector<1x128xf32> to vector<64x128xf32>
    %706 = arith.addf %703, %705 : vector<64x128xf32>
    %cst_202 = arith.constant dense<0xFF800000> : vector<64xf32>
    %707 = vector.multi_reduction <maximumf>, %706, %cst_202 [1] : vector<64x128xf32> to vector<64xf32>
    %708 = vector.shape_cast %707 : vector<64xf32> to vector<64x1xf32>
    %709 = vector.broadcast %708 : vector<64x1xf32> to vector<64x128xf32>
    %710 = arith.subf %706, %709 : vector<64x128xf32>
    %711 = math.exp %710 : vector<64x128xf32>
    %cst_203 = arith.constant dense<0.000000e+00> : vector<64xf32>
    %712 = vector.multi_reduction <add>, %711, %cst_203 [1] : vector<64x128xf32> to vector<64xf32>
    %713 = vector.shape_cast %712 : vector<64xf32> to vector<64x1xf32>
    %714 = math.log %713 : vector<64x1xf32>
    %715 = vector.broadcast %714 : vector<64x1xf32> to vector<64x128xf32>
    %716 = arith.subf %710, %715 : vector<64x128xf32>
    %c0_204 = arith.constant 0 : index
    %c0_205 = arith.constant 0 : index
    %717 = vector.load %arg12[%c0_204, %c0_205] : memref<64x128xf32, #tpu.memory_space<vmem>>, vector<64x128xf32>
    tpu.vector_store %arg12[%c0_204, %c0_205], %716 {strides = array<i32>} : memref<64x128xf32, #tpu.memory_space<vmem>>, vector<64x128xf32>,
    return
  }
  func.func @transform_0(%arg0: i32) -> (i32, i32) {
    %c0_i32 = arith.constant 0 : i32
    %c0_i32_0 = arith.constant 0 : i32
    %c0_i32_1 = arith.constant 0 : i32
    return %c0_i32, %c0_i32_0 : i32, i32
  }
  func.func @transform_1(%arg0: i32) -> (i32, i32) {
    %c0_i32 = arith.constant 0 : i32
    %c0_i32_0 = arith.constant 0 : i32
    %c0_i32_1 = arith.constant 0 : i32
    return %c0_i32, %c0_i32_0 : i32, i32
  }
  func.func @transform_2(%arg0: i32) -> (i32, i32) {
    %c0_i32 = arith.constant 0 : i32
    %c0_i32_0 = arith.constant 0 : i32
    %c0_i32_1 = arith.constant 0 : i32
    return %c0_i32, %c0_i32_0 : i32, i32
  }
  func.func @transform_3(%arg0: i32) -> (i32, i32) {
    %c0_i32 = arith.constant 0 : i32
    %c0_i32_0 = arith.constant 0 : i32
    %c0_i32_1 = arith.constant 0 : i32
    return %c0_i32, %c0_i32_0 : i32, i32
  }
  func.func @transform_4(%arg0: i32) -> (i32, i32) {
    %c0_i32 = arith.constant 0 : i32
    %c0_i32_0 = arith.constant 0 : i32
    %c0_i32_1 = arith.constant 0 : i32
    return %c0_i32, %c0_i32_0 : i32, i32
  }
  func.func @transform_5(%arg0: i32) -> (i32, i32) {
    %c0_i32 = arith.constant 0 : i32
    %c0_i32_0 = arith.constant 0 : i32
    %c0_i32_1 = arith.constant 0 : i32
    return %c0_i32, %c0_i32_0 : i32, i32
  }
  func.func @transform_6(%arg0: i32) -> (i32, i32) {
    %c0_i32 = arith.constant 0 : i32
    %c0_i32_0 = arith.constant 0 : i32
    %c0_i32_1 = arith.constant 0 : i32
    return %c0_i32, %c0_i32_0 : i32, i32
  }
  func.func @transform_7(%arg0: i32) -> (i32, i32) {
    %c0_i32 = arith.constant 0 : i32
    %c0_i32_0 = arith.constant 0 : i32
    %c0_i32_1 = arith.constant 0 : i32
    return %c0_i32, %c0_i32_0 : i32, i32
  }
  func.func @transform_8(%arg0: i32) -> (i32, i32) {
    %c0_i32 = arith.constant 0 : i32
    %c0_i32_0 = arith.constant 0 : i32
    %c0_i32_1 = arith.constant 0 : i32
    return %c0_i32, %c0_i32_0 : i32, i32
  }
  func.func @transform_9(%arg0: i32) -> (i32, i32) {
    %c0_i32 = arith.constant 0 : i32
    %c0_i32_0 = arith.constant 0 : i32
    %c0_i32_1 = arith.constant 0 : i32
    return %c0_i32, %c0_i32_0 : i32, i32
  }
  func.func @transform_10(%arg0: i32) -> (i32, i32) {
    %c0_i32 = arith.constant 0 : i32
    %c0_i32_0 = arith.constant 0 : i32
    %c0_i32_1 = arith.constant 0 : i32
    return %c0_i32, %c0_i32_0 : i32, i32
  }
  func.func @transform_11(%arg0: i32) -> (i32, i32) {
    %c0_i32 = arith.constant 0 : i32
    %c0_i32_0 = arith.constant 0 : i32
    %c0_i32_1 = arith.constant 0 : i32
    return %c0_i32, %c0_i32_0 : i32, i32
  }
}

</mosaic_0001>

<bundles_post_ra>
// kernel: text_decoder_forward.1
= control target key start
LH: loop header
LB: loop body
LE: loop exit
PB: predicated region body
PF: predicated region fallthrough
CT: control target
= control target key end

     0   :  { %16 = vsyncpa [#allocation6], 0  ;;  %s4740_s0 = inlined_call_operand.vmem [shape: f32[8,128], index: 0, kind: input, shape index: {}]   ;;  %s4741_s1 = inlined_call_operand.vmem [shape: f32[128,32], index: 1, kind: input, shape index: {}]   ;;  %s4742_s2 = inlined_call_operand.vmem [shape: f32[1,32], index: 2, kind: input, shape index: {}]   ;;  %s4743_s3 = inlined_call_operand.hbm [shape: bf16[32,256], index: 3, kind: input, shape index: {}]   ;;  %s4744_s4 = inlined_call_operand.hbm [shape: f32[1,256], index: 4, kind: input, shape index: {}]   ;;  %s4745_s5 = inlined_call_operand.vmem [shape: bf16[64,256], index: 5, kind: input, shape index: {}]   ;;  %s4746_s6 = inlined_call_operand.vmem [shape: bf16[64,256], index: 6, kind: input, shape index: {}]   ;;  %s4747_s7 = inlined_call_operand.hbm [shape: f32[1,256], index: 7, kind: input, shape index: {}]   ;;  %s4748_s8 = inlined_call_operand.vmem [shape: bf16[64,256], index: 8, kind: input, shape index: {}]   ;;  %s4749_s9 = inlined_call_operand.hbm [shape: bf16[64,128], index: 9, kind: input, shape index: {}]   ;;  %s4750_s10 = inlined_call_operand.vmem [shape: f32[1,128], index: 10, kind: input, shape index: {}]   ;;  %s4751_s11 = inlined_call_operand.vmem [shape: f32[64,128], index: 11, kind: output, shape index: {}]  }
   0x1   :  { %17 = vsyncpa [#allocation8], 0 }
   0x2   :  { %18 = vsyncpa [#allocation11], 0  ;;  %s3904_s17 = smov [#allocation7]   ;;  %s3905_s19 = smov [#allocation5]  }
   0x3   :  { %s43_s18 = sshll.u32 %s3904_s17, 4  ;;  %s30_s20 = sshll.u32 %s3905_s19, 4  ;;  %s44_s18 = int_to_ptr.vmem [resolvable:$true] %s43_s18  ;;  %s3977_s20 = int_to_ptr.vmem [resolvable:$true] %s30_s20 }
   0x4   :  { %s3810_s23 = scalar_lea.hbm %s4744_s4, 32 }
   0x5   :  { %p3811_p0 = scmp.ne.s32.totalorder %s4744_s4, %s3810_s23  ;;  %p3814_p1 = scmp.lt.u32.totalorder %s3810_s23, %s4744_s4 }
   0x7   :  { %p3816_p2 = pnand %p3814_p1, %p3811_p0 }
   0x9   :  { %3819 = shalt.err (!%p3816_p2)
}
   0xa   :  { %s3820_s28 = scalar_lea.vmem %s44_s18, 32  ;;  %p3825_p4 = scmp.lt.s32.totalorder %s44_s18, %s44_s18 }
   0xb   :  { %p3821_p3 = scmp.ne.s32.totalorder %s44_s18, %s3820_s28  ;;  %p3826_p5 = scmp.lt.s32.totalorder %s3820_s28, %s3820_s28 }
   0xd   :  { %p3827_p6 = por %p3826_p5, %p3825_p4 }
   0xf   :  { %p3828_p7 = pnand %p3827_p6, %p3821_p3 }
  0x11   :  { %3831 = shalt.err (!%p3828_p7)
}
  0x12   :  { %46 = dma.hbm_to_vmem [thread:$0]  %s4744_s4, 32, %s44_s18, [#allocation8]  }
  0x13   :  { %s3832_s14 = scalar_lea.hbm %s4743_s3, 512 }
  0x14   :  { %p3833_p8 = scmp.ne.s32.totalorder %s4743_s3, %s3832_s14  ;;  %p3836_p9 = scmp.lt.u32.totalorder %s3832_s14, %s4743_s3 }
  0x16   :  { %p3838_p10 = pnand %p3836_p9, %p3833_p8 }
  0x18   :  { %3841 = shalt.err (!%p3838_p10)
}
  0x19   :  { %s3842_s21 = scalar_lea.vmem %s3977_s20, 512  ;;  %p3847_p12 = scmp.lt.s32.totalorder %s3977_s20, %s3977_s20 }
  0x1a   :  { %p3843_p11 = scmp.ne.s32.totalorder %s3977_s20, %s3842_s21  ;;  %p3848_p13 = scmp.lt.s32.totalorder %s3842_s21, %s3842_s21 }
  0x1c   :  { %p3849_p0 = por %p3848_p13, %p3847_p12 }
  0x1e   :  { %p3850_p1 = pnand %p3849_p0, %p3843_p11 }
  0x20   :  { %3853 = shalt.err (!%p3850_p1)
}
  0x21   :  { %s3906_s4 = smov 128   ;;  %s3907_s18 = smov 8  }
  0x22   :  { %36 = dma.hbm_to_vmem [thread:$0]  %s4743_s3, 512, %s3977_s20, [#allocation6], %s3906_s4, %s3906_s4, %s3907_s18  }
  0x23   :  { %s3908_s24 = smov [#allocation9]   ;;  %s3909_s26 = smov [#allocation10]  }
  0x24   :  { %s57_s25 = sshll.u32 %s3908_s24, 4  ;;  %s68_s27 = sshll.u32 %s3909_s26, 4  ;;  %s58_s25 = int_to_ptr.vmem [resolvable:$true] %s57_s25  ;;  %s4008_s27 = int_to_ptr.vmem [resolvable:$true] %s68_s27 }
  0x25   :  { %s3854_s30 = scalar_lea.hbm %s4747_s7, 32 }
  0x26   :  { %p3855_p2 = scmp.ne.s32.totalorder %s4747_s7, %s3854_s30  ;;  %p3858_p3 = scmp.lt.u32.totalorder %s3854_s30, %s4747_s7 }
  0x28   :  { %p3860_p4 = pnand %p3858_p3, %p3855_p2 }
  0x2a   :  { %3863 = shalt.err (!%p3860_p4)
}
  0x2b   :  { %s3864_s3 = scalar_lea.vmem %s58_s25, 32  ;;  %p3869_p6 = scmp.lt.s32.totalorder %s58_s25, %s58_s25 }
  0x2c   :  { %p3865_p5 = scmp.ne.s32.totalorder %s58_s25, %s3864_s3  ;;  %p3870_p7 = scmp.lt.s32.totalorder %s3864_s3, %s3864_s3 }
  0x2e   :  { %p3871_p8 = por %p3870_p7, %p3869_p6 }
  0x30   :  { %p3872_p9 = pnand %p3871_p8, %p3865_p5 }
  0x32   :  { %3875 = shalt.err (!%p3872_p9)
}
  0x33   :  { %60 = dma.hbm_to_vmem [thread:$0]  %s4747_s7, 32, %s58_s25, [#allocation8]  }
  0x34   :  { %s3876_s21 = scalar_lea.hbm %s4749_s9, 512 }
  0x35   :  { %p3877_p10 = scmp.ne.s32.totalorder %s4749_s9, %s3876_s21  ;;  %p3880_p11 = scmp.lt.u32.totalorder %s3876_s21, %s4749_s9 }
  0x37   :  { %p3882_p12 = pnand %p3880_p11, %p3877_p10 }
  0x39   :  { %3885 = shalt.err (!%p3882_p12)
}
  0x3a   :  { %s3886_s24 = scalar_lea.vmem %s4008_s27, 512  ;;  %p3891_p0 = scmp.lt.s32.totalorder %s4008_s27, %s4008_s27 }
  0x3b   :  { %p3887_p13 = scmp.ne.s32.totalorder %s4008_s27, %s3886_s24  ;;  %p3892_p1 = scmp.lt.s32.totalorder %s3886_s24, %s3886_s24 }
  0x3d   :  { %p3893_p2 = por %p3892_p1, %p3891_p0 }
  0x3f   :  { %p3894_p3 = pnand %p3893_p2, %p3887_p13 }
  0x41   :  { %3897 = shalt.err (!%p3894_p3)
}
  0x42   :  { %s3910_s7 = smov 64   ;;  %s3911_s25 = smov 4  }
  0x43   :  { %74 = dma.hbm_to_vmem [thread:$0]  %s4749_s9, 512, %s4008_s27, [#allocation11], %s3910_s7, %s3910_s7, %s3911_s25  }
  0x44   :  { %3898 = dma.done.wait [#allocation6], 512  }
  0x45   :  { %3899 = vsyncadd [#allocation6], 4294966784 }
  0x46   :  { %3900 = dma.done.wait [#allocation8], 64  }
  0x47   :  { %3901 = vsyncadd [#allocation8], 4294967232 }
  0x48   :  { %3902 = dma.done.wait [#allocation11], 512  }
  0x49   :  { %3903 = vsyncadd [#allocation11], 4294966784  ;;  %v3912_v0 = vmov 0.0|0.0   ;;  %vm3913_vm0 = vmmov 0   ;;  %v3914_v1 = vmov 0.0   ;;  %v91_v2 = vld [vmem:[%s4741_s1] sm:$0xff]  ;;  %v191_v45 = vlaneseq }
  0x4a   :  { %3415 = vmatprep.subr.bf16.mxu0 %v3912_v0  ;;  %3396 = vmatprep.mubr.msk.f32.mxu0 %vm3913_vm0, %v3914_v1  ;;  %v92_v3 = vld [vmem:[%s4741_s1 + $0x8] sm:$0xff]  ;;  %v93_v4 = vld [vmem:[%s4741_s1 + $0x10] sm:$0xff]  ;;  %v94_v6 = vld [vmem:[%s4741_s1 + $0x18] sm:$0xff]  ;;  %v3915_v32 = vmov 0   ;;  %vm221_vm1 = vcmask 261120   ;;  %vm419_vm2 = vcmask 523520  }
  0x4b   :  { %v3416_v5 = vpack.c.bf16 %v92_v3, %v91_v2  ;;  %v3419_v7 = vpack.c.bf16 %v94_v6, %v93_v4  ;;  %v95_v8 = vld [vmem:[%s4741_s1 + $0x20] sm:$0xff]  ;;  %v96_v9 = vld [vmem:[%s4741_s1 + $0x28] sm:$0xff]  ;;  %v97_v10 = vld [vmem:[%s4741_s1 + $0x30] sm:$0xff]  ;;  %257 = vmatprep.mubr.bf16.mxu1 %v3915_v32  ;;  %v4175_v49 = vshrl.u32 %v191_v45, 7  ;;  %vm315_vm3 = vcmask 523264  }
  0x4c   :  { %v3452_v11 = vld [vmem:[#allocation5 + $0x4] ss:$8 sps:$4 sm:$0xff]   ;;  %v3454_v12 = vld [vmem:[#allocation5] ss:$8 sps:$4 sm:$0xff]   ;;  %v3422_v13 = vpack.c.bf16 %v96_v9, %v95_v8  ;;  %v98_v14 = vld [vmem:[%s4741_s1 + $0x38] sm:$0xff] }
  0x4d   :  { %3417 = vmatpush3.bf16.msra.mxu0 %v3416_v5  ;;  %225 = vmatprep.subr.bf16.mxu1 %v3452_v11  ;;  %v99_v15 = vld [vmem:[%s4741_s1 + $0x40] sm:$0xff]  ;;  %v100_v16 = vld [vmem:[%s4741_s1 + $0x48] sm:$0xff]  ;;  %v3425_v17 = vpack.c.bf16 %v98_v14, %v97_v10  ;;  %v101_v18 = vld [vmem:[%s4741_s1 + $0x50] sm:$0xff]  ;;  %v193_v51 = vsub.s32 0, %v4175_v49  ;;  %v197_v53 = vsub.s32 1, %v4175_v49 }
  0x4e   :  { %3418 = vmatprep.subr.bf16.mxu0 %v3912_v0  ;;  %226 = vmatpush1.bf16.msra.mxu1 %v3454_v12  ;;  %v102_v19 = vld [vmem:[%s4741_s1 + $0x58] sm:$0xff]  ;;  %v3428_v20 = vpack.c.bf16 %v100_v16, %v99_v15  ;;  %v103_v21 = vld [vmem:[%s4741_s1 + $0x60] sm:$0xff]  ;;  %v104_v22 = vld [vmem:[%s4741_s1 + $0x68] sm:$0xff] }
  0x4f   :  { %v3431_v23 = vpack.c.bf16 %v102_v19, %v101_v18  ;;  %v3434_v24 = vpack.c.bf16 %v104_v22, %v103_v21  ;;  %v105_v25 = vld [vmem:[%s4741_s1 + $0x70] sm:$0xff]  ;;  %v106_v26 = vld [vmem:[%s4741_s1 + $0x78] sm:$0xff]  ;;  %v90_v28 = vld [vmem:[%s4740_s0] sm:$0xff] }
  0x50   :  { %v3437_v27 = vpack.c.bf16 %v106_v26, %v105_v25  ;;  %v3455_v29 = vld [vmem:[#allocation5 + $0x14] ss:$8 sps:$4 sm:$0xff]   ;;  %v3457_v30 = vld [vmem:[#allocation5 + $0x10] ss:$8 sps:$4 sm:$0xff]   ;;  %v4103_v31 = vld [vmem:[%s4745_s5 + $0x4] ss:$8 sps:$4 sm:$0xff]  }
  0x51   :  { %3420 = vmatpush3.bf16.msra.mxu0 %v3419_v7  ;;  %227 = vmatprep.subr.bf16.mxu1 %v3455_v29  ;;  %v4109_v33 = vld [vmem:[%s4745_s5] ss:$8 sps:$4 sm:$0xff]   ;;  %v4117_v34 = vld [vmem:[%s4745_s5 + $0x14] ss:$8 sps:$4 sm:$0xff]   ;;  %v4123_v35 = vld [vmem:[%s4745_s5 + $0x10] ss:$8 sps:$4 sm:$0xff]  }
  0x52   :  { %3421 = vmatprep.subr.bf16.mxu0 %v3912_v0  ;;  %228 = vmatpush1.bf16.msra.mxu1 %v3457_v30  ;;  %v4129_v36 = vld [vmem:[%s4745_s5 + $0x24] ss:$8 sps:$4 sm:$0xff]   ;;  %v4135_v37 = vld [vmem:[%s4745_s5 + $0x20] ss:$8 sps:$4 sm:$0xff]   ;;  %v4141_v38 = vld [vmem:[%s4745_s5 + $0x34] ss:$8 sps:$4 sm:$0xff]  }
  0x53   :  { %319 = vmatprep.subr.bf16.mxu1 %v4103_v31  ;;  %v4147_v39 = vld [vmem:[%s4745_s5 + $0x30] ss:$8 sps:$4 sm:$0xff]   ;;  %v3138_v40 = vld [vmem:[%s4742_s2] ss:$0 sm:$0xff]  ;;  %s3916_s2 = smov 32  }
  0x54   :  { %v189_v52 = vld [vmem:[#allocation7] sm:$0x3] }
  0x55   :  { %3423 = vmatpush3.bf16.msra.mxu0 %v3422_v13  ;;  %v194_v54 = vrot.slane %v189_v52, %v193_v51  ;;  %v198_v55 = vrot.slane %v189_v52, %v197_v53 }
  0x56   :  { %3424 = vmatprep.subr.bf16.mxu0 %v3912_v0 }
  0x59   :  { %3426 = vmatpush3.bf16.msra.mxu0 %v3425_v17 }
  0x5a   :  { %3427 = vmatprep.subr.bf16.mxu0 %v3912_v0 }
  0x5d   :  { %3429 = vmatpush3.bf16.msra.mxu0 %v3428_v20 }
  0x5e   :  { %3430 = vmatprep.subr.bf16.mxu0 %v3912_v0 }
  0x61   :  { %3432 = vmatpush3.bf16.msra.mxu0 %v3431_v23 }
  0x62   :  { %3433 = vmatprep.subr.bf16.mxu0 %v3912_v0 }
  0x65   :  { %3435 = vmatpush3.bf16.msra.mxu0 %v3434_v24 }
  0x66   :  { %3436 = vmatprep.subr.bf16.mxu0 %v3912_v0 }
  0x69   :  { %3438 = vmatpush3.bf16.msra.mxu0 %v3437_v27 }
  0x6a   :  { %628 = vmatprep.subr.bf16.mxu0 %v4103_v31 }
  0x6c   :  { %3397 = vmatmul.mubr.f32.vlgmr.msra.gmra.mrb[0].mxu0 %v90_v28 }
  0x6d   :  { %660 = vmatprep.mubr.bf16.mxu0 %v3915_v32  ;;  %629 = vmatpush1.bf16.msra.mxu0 %v4109_v33 }
  0x6e   :  { %630 = vmatprep.subr.bf16.mxu0 %v4117_v34 }
  0x71   :  { %631 = vmatpush1.bf16.msra.mxu0 %v4123_v35 }
  0x72   :  { %632 = vmatprep.subr.bf16.mxu0 %v4129_v36 }
  0x75   :  { %633 = vmatpush1.bf16.msra.mxu0 %v4135_v37 }
  0x76   :  { %634 = vmatprep.subr.bf16.mxu0 %v4141_v38 }
  0x79   :  { %635 = vmatpush1.bf16.msra.mxu0 %v4147_v39 }
  0x7a   :  { %936 = vmatprep.subr.bf16.mxu0 %v4103_v31 }
 0x13f   :  { %v180_v41 = vpop.f32.mrb[0].mxu0 }
 0x140   :  { %v181_v42 = vadd.f32 %v3138_v40, %v180_v41  ;;  %v3398_v43 = vpop.f32.mrb[1].mxu0 }
 0x142   :  { %v184_v44 = vpack.c.bf16 %v181_v42, %v181_v42 }
 0x144   :  { %3143 = vmatmul.mubr.msk.bf16.vlgmr.msra.gmra.mrb[0].mxu1 %vm221_vm1, %v184_v44 }
 0x145   :  { %320 = vmatpush1.bf16.msra.mxu1 %v4109_v33  ;;  %351 = vmatprep.mubr.bf16.mxu1 %v3915_v32 }
 0x146   :  { %321 = vmatprep.subr.bf16.mxu1 %v4117_v34 }
 0x149   :  { %322 = vmatpush1.bf16.msra.mxu1 %v4123_v35 }
 0x14a   :  { %323 = vmatprep.subr.bf16.mxu1 %v4129_v36 }
 0x14d   :  { %324 = vmatpush1.bf16.msra.mxu1 %v4135_v37 }
 0x14e   :  { %325 = vmatprep.subr.bf16.mxu1 %v4141_v38 }
 0x151   :  { %326 = vmatpush1.bf16.msra.mxu1 %v4147_v39 }
 0x152   :  { %474 = vmatprep.subr.bf16.mxu1 %v4103_v31 }
 0x154   :  { %352 = vmatmul.mubr.bf16.vlgmr.msra.gmra.mrb[4].mxu1 %v3912_v0 }
 0x155   :  { %475 = vmatpush1.bf16.msra.mxu1 %v4109_v33  ;;  %506 = vmatprep.mubr.bf16.mxu1 %v3915_v32 }
 0x156   :  { %476 = vmatprep.subr.bf16.mxu1 %v4117_v34 }
 0x159   :  { %477 = vmatpush1.bf16.msra.mxu1 %v4123_v35 }
 0x15a   :  { %478 = vmatprep.subr.bf16.mxu1 %v4129_v36 }
 0x15d   :  { %479 = vmatpush1.bf16.msra.mxu1 %v4135_v37 }
 0x15e   :  { %480 = vmatprep.subr.bf16.mxu1 %v4141_v38 }
 0x161   :  { %481 = vmatpush1.bf16.msra.mxu1 %v4147_v39 }
 0x162   :  { %782 = vmatprep.subr.bf16.mxu1 %v4103_v31 }
 0x217   :  { %v259_v46 = vpop.f32.mrb[0].mxu1 }
 0x218   :  { %v261_v47 = vpop.f32.mrb[1].mxu1  ;;  %v4183_v56 = vadd.f32 %v259_v46, %v194_v54 }
 0x219   :  { %v263_v48 = vpop.f32.mrb[2].mxu1  ;;  %v4185_v58 = vadd.f32 %v261_v47, %v198_v55 }
 0x21a   :  { %v264_v50 = vpop.f32.mrb[3].mxu1 }
 0x227   :  { %v353_v57 = vpop.f32.mrb[4].mxu1 }
 0x228   :  { %v360_v59 = vadd.f32 %v353_v57, %v4183_v56  ;;  %v355_v60 = vpop.f32.mrb[5].mxu1 }
 0x229   :  { %v357_v61 = vpop.f32.mrb[6].mxu1  ;;  %v390_v62 = vadd.f32 %v355_v60, %v4185_v58 }
 0x22a   :  { %v358_v63 = vpop.f32.mrb[7].mxu1  ;;  %3522 = vtanh.f32 %v360_v59  ;;  %v3152_v3 = vmul.f32 -1.442695, %v360_v59 }
 0x22b   :  { %3524 = vtanh.f32 %v390_v62  ;;  %v3153_v4 = vmul.f32 -1.442695, %v390_v62 }
 0x22c   :  { %3526 = vpow2.f32 %v3152_v3 }
 0x22d   :  { %3528 = vpow2.f32 %v3153_v4 }
 0x234   :  { %v3523_v1 = vpop.eup %3522 }
 0x235   :  { %370 = vrot.lane.b32.xlu0 %v3523_v1, %s3910_s7  ;;  %v3525_v2 = vpop.eup %3524 }
 0x236   :  { %v3527_v5 = vpop.eup %3526 }
 0x237   :  { %v364_v6 = vadd.f32 1.0, %v3527_v5  ;;  %v3529_v7 = vpop.eup %3528 }
 0x238   :  { %v394_v8 = vadd.f32 1.0, %v3529_v7 }
 0x239   :  { %400 = vrot.lane.b32.xlu0 %v3525_v2, %s3910_s7  ;;  %3530 = vrcp.f32 %v364_v6 }
 0x23a   :  { %3532 = vrcp.f32 %v394_v8 }
 0x243   :  { %v3531_v9 = vpop.eup %3530 }
 0x244   :  { %v3533_v12 = vpop.eup %3532  ;;  %v368_v15 = vmul.f32 0.0, %v3531_v9 }
 0x245   :  { %v398_v18 = vmul.f32 0.0, %v3533_v12 }
 0x2a7   :  { %v371_v10 = vpop.permute.xlu0 %370 }
 0x2a8   :  { %v373_v11 = vmul.f32 %v3531_v9, %v371_v10 }
 0x2aa   :  { %375 = vrot.lane.b32.xlu1 %v373_v11, %s3916_s2 }
 0x2ab   :  { %v401_v13 = vpop.permute.xlu0 %400 }
 0x2ac   :  { %v403_v14 = vmul.f32 %v3533_v12, %v401_v13 }
 0x2ae   :  { %405 = vrot.lane.b32.xlu1 %v403_v14, %s3916_s2 }
 0x31c   :  { %v376_v16 = vpop.permute.xlu1 %375 }
 0x31d   :  { %v4193_v17 = vadd.f32 %v376_v16, %v368_v15 }
 0x31f   :  { %3534 = vtanh.f32 %v4193_v17 }
 0x320   :  { %v406_v19 = vpop.permute.xlu1 %405 }
 0x321   :  { %v408_v20 = vadd.f32 %v406_v19, %v398_v18 }
 0x323   :  { %3536 = vtanh.f32 %v408_v20 }
 0x329   :  { %v3535_v21 = vpop.eup %3534 }
 0x32a   :  { %381 = vrot.lane.b32.xlu0 %v3535_v21, %s3910_s7 }
 0x32d   :  { %v3537_v22 = vpop.eup %3536 }
 0x32e   :  { %411 = vrot.lane.b32.xlu1 %v3537_v22, %s3910_s7 }
 0x39c   :  { %v382_v23 = vpop.permute.xlu0 %381 }
 0x39d   :  { %v384_v24 = vmul.f32 %v3531_v9, %v382_v23 }
 0x39f   :  { %386 = vrot.lane.b32.xlu0 %v384_v24, %s3916_s2 }
 0x3a0   :  { %v412_v25 = vpop.permute.xlu1 %411 }
 0x3a1   :  { %v414_v26 = vmul.f32 %v3533_v12, %v412_v25 }
 0x3a3   :  { %416 = vrot.lane.b32.xlu1 %v414_v26, %s3910_s7 }
 0x411   :  { %v387_v27 = vpop.permute.xlu0 %386 }
 0x412   :  { %389 = vst.msk [vmem:[#allocation2] sm:$0xff] %vm221_vm1, %v387_v27 }
 0x415   :  { %v417_v28 = vpop.permute.xlu1 %416 }
 0x416   :  { %420 = vst.msk [vmem:[#allocation2 + $0x38] sm:$0xff] %vm419_vm2, %v417_v28  ;;  %v421_v29 = vsel %vm221_vm1, %v387_v27, %v417_v28 }
 0x417   :  { %v422_v30 = vpack.c.bf16 %v421_v29, %v421_v29 }
 0x419   :  { %3162 = vmatmul.mubr.msk.bf16.vlgmr.msra.gmra.mrb[8].mxu1 %vm315_vm3, %v422_v30 }
 0x41a   :  { %783 = vmatpush1.bf16.msra.mxu1 %v4109_v33  ;;  %814 = vmatprep.mubr.bf16.mxu1 %v3915_v32 }
 0x41b   :  { %784 = vmatprep.subr.bf16.mxu1 %v4117_v34 }
 0x41e   :  { %785 = vmatpush1.bf16.msra.mxu1 %v4123_v35 }
 0x41f   :  { %786 = vmatprep.subr.bf16.mxu1 %v4129_v36 }
 0x422   :  { %787 = vmatpush1.bf16.msra.mxu1 %v4135_v37 }
 0x423   :  { %788 = vmatprep.subr.bf16.mxu1 %v4141_v38 }
 0x426   :  { %789 = vmatpush1.bf16.msra.mxu1 %v4147_v39 }
 0x427   :  { %1090 = vmatprep.subr.bf16.mxu1 %v4103_v31 }
 0x4ec   :  { %v508_v40 = vpop.f32.mrb[8].mxu1 }
 0x4ed   :  { %v515_v41 = vadd.f32 %v508_v40, %v4183_v56  ;;  %v510_v42 = vpop.f32.mrb[9].mxu1 }
 0x4ee   :  { %v545_v43 = vadd.f32 %v510_v42, %v4185_v58  ;;  %v512_v44 = vpop.f32.mrb[10].mxu1 }
 0x4ef   :  { %3538 = vtanh.f32 %v515_v41  ;;  %v513_v45 = vpop.f32.mrb[11].mxu1  ;;  %v3163_v48 = vmul.f32 -1.442695, %v515_v41 }
 0x4f0   :  { %3540 = vtanh.f32 %v545_v43  ;;  %v3164_v50 = vmul.f32 -1.442695, %v545_v43 }
 0x4f1   :  { %3542 = vpow2.f32 %v3163_v48 }
 0x4f2   :  { %3544 = vpow2.f32 %v3164_v50 }
 0x4f9   :  { %v3539_v46 = vpop.eup %3538 }
 0x4fa   :  { %v3541_v47 = vpop.eup %3540  ;;  %525 = vrot.lane.b32.xlu0 %v3539_v46, %s3910_s7 }
 0x4fb   :  { %555 = vrot.lane.b32.xlu1 %v3541_v47, %s3910_s7  ;;  %v3543_v52 = vpop.eup %3542 }
 0x4fc   :  { %v3545_v54 = vpop.eup %3544  ;;  %v519_v55 = vadd.f32 1.0, %v3543_v52 }
 0x4fd   :  { %v549_v57 = vadd.f32 1.0, %v3545_v54 }
 0x4fe   :  { %3546 = vrcp.f32 %v519_v55 }
 0x4ff   :  { %3548 = vrcp.f32 %v549_v57 }
 0x508   :  { %v3547_v59 = vpop.eup %3546 }
 0x509   :  { %v3549_v61 = vpop.eup %3548  ;;  %v523_v2 = vmul.f32 %v3547_v59, %v4193_v17 }
 0x50a   :  { %v553_v4 = vmul.f32 %v3549_v61, %v408_v20 }
 0x56c   :  { %v526_v60 = vpop.permute.xlu0 %525 }
 0x56d   :  { %v528_v62 = vmul.f32 %v3547_v59, %v526_v60  ;;  %v556_v63 = vpop.permute.xlu1 %555 }
 0x56e   :  { %v558_v1 = vmul.f32 %v3549_v61, %v556_v63 }
 0x56f   :  { %530 = vrot.lane.b32.xlu0 %v528_v62, %s3916_s2 }
 0x570   :  { %560 = vrot.lane.b32.xlu1 %v558_v1, %s3916_s2 }
 0x5e1   :  { %v531_v3 = vpop.permute.xlu0 %530 }
 0x5e2   :  { %v533_v5 = vadd.f32 %v531_v3, %v523_v2  ;;  %v561_v6 = vpop.permute.xlu1 %560 }
 0x5e3   :  { %v563_v7 = vadd.f32 %v561_v6, %v553_v4 }
 0x5e4   :  { %3550 = vtanh.f32 %v533_v5 }
 0x5e5   :  { %3552 = vtanh.f32 %v563_v7 }
 0x5ee   :  { %v3551_v8 = vpop.eup %3550 }
 0x5ef   :  { %v3553_v9 = vpop.eup %3552  ;;  %536 = vrot.lane.b32.xlu0 %v3551_v8, %s3910_s7 }
 0x5f0   :  { %566 = vrot.lane.b32.xlu1 %v3553_v9, %s3910_s7 }
 0x661   :  { %v537_v10 = vpop.permute.xlu0 %536 }
 0x662   :  { %v539_v11 = vmul.f32 %v3547_v59, %v537_v10  ;;  %v567_v12 = vpop.permute.xlu1 %566 }
 0x663   :  { %v569_v13 = vmul.f32 %v3549_v61, %v567_v12 }
 0x664   :  { %541 = vrot.lane.b32.xlu0 %v539_v11, %s3916_s2 }
 0x665   :  { %571 = vrot.lane.b32.xlu1 %v569_v13, %s3910_s7 }
 0x6d6   :  { %v542_v14 = vpop.permute.xlu0 %541 }
 0x6d7   :  { %544 = vst.msk [vmem:[#allocation2 + $0x8] sm:$0xff] %vm221_vm1, %v542_v14  ;;  %v572_v15 = vpop.permute.xlu1 %571 }
 0x6d8   :  { %574 = vst.msk [vmem:[#allocation2 + $0x30] sm:$0xff] %vm419_vm2, %v572_v15  ;;  %v575_v16 = vsel %vm221_vm1, %v542_v14, %v572_v15 }
 0x6d9   :  { %v576_v17 = vpack.c.bf16 %v575_v16, %v575_v16 }
 0x6db   :  { %3173 = vmatmul.mubr.msk.bf16.vlgmr.msra.gmra.mrb[4].mxu0 %vm315_vm3, %v576_v17 }
 0x6dc   :  { %937 = vmatpush1.bf16.msra.mxu0 %v4109_v33  ;;  %968 = vmatprep.mubr.bf16.mxu0 %v3915_v32 }
 0x6dd   :  { %938 = vmatprep.subr.bf16.mxu0 %v4117_v34 }
 0x6e0   :  { %939 = vmatpush1.bf16.msra.mxu0 %v4123_v35 }
 0x6e1   :  { %940 = vmatprep.subr.bf16.mxu0 %v4129_v36 }
 0x6e4   :  { %941 = vmatpush1.bf16.msra.mxu0 %v4135_v37 }
 0x6e5   :  { %942 = vmatprep.subr.bf16.mxu0 %v4141_v38 }
 0x6e8   :  { %943 = vmatpush1.bf16.msra.mxu0 %v4147_v39 }
 0x6e9   :  { %1244 = vmatprep.subr.bf16.mxu0 %v4103_v31 }
 0x7ae   :  { %v662_v18 = vpop.f32.mrb[4].mxu0 }
 0x7af   :  { %v669_v19 = vadd.f32 %v662_v18, %v4183_v56  ;;  %v664_v20 = vpop.f32.mrb[5].mxu0 }
 0x7b0   :  { %v699_v21 = vadd.f32 %v664_v20, %v4185_v58  ;;  %v666_v22 = vpop.f32.mrb[6].mxu0 }
 0x7b1   :  { %3554 = vtanh.f32 %v669_v19  ;;  %v667_v23 = vpop.f32.mrb[7].mxu0  ;;  %v3174_v26 = vmul.f32 -1.442695, %v669_v19 }
 0x7b2   :  { %3556 = vtanh.f32 %v699_v21  ;;  %v3175_v27 = vmul.f32 -1.442695, %v699_v21 }
 0x7b3   :  { %3558 = vpow2.f32 %v3174_v26 }
 0x7b4   :  { %3560 = vpow2.f32 %v3175_v27 }
 0x7bb   :  { %v3555_v24 = vpop.eup %3554 }
 0x7bc   :  { %v3557_v25 = vpop.eup %3556  ;;  %679 = vrot.lane.b32.xlu0 %v3555_v24, %s3910_s7 }
 0x7bd   :  { %709 = vrot.lane.b32.xlu1 %v3557_v25, %s3910_s7  ;;  %v3559_v31 = vpop.eup %3558 }
 0x7be   :  { %v3561_v28 = vpop.eup %3560  ;;  %v673_v29 = vadd.f32 1.0, %v3559_v31 }
 0x7bf   :  { %v703_v30 = vadd.f32 1.0, %v3561_v28 }
 0x7c0   :  { %3562 = vrcp.f32 %v673_v29 }
 0x7c1   :  { %3564 = vrcp.f32 %v703_v30 }
 0x7ca   :  { %v3563_v40 = vpop.eup %3562 }
 0x7cb   :  { %v3565_v42 = vpop.eup %3564  ;;  %v677_v46 = vmul.f32 %v3563_v40, %v533_v5 }
 0x7cc   :  { %v707_v48 = vmul.f32 %v3565_v42, %v563_v7 }
 0x82e   :  { %v680_v41 = vpop.permute.xlu0 %679 }
 0x82f   :  { %v682_v43 = vmul.f32 %v3563_v40, %v680_v41  ;;  %v710_v44 = vpop.permute.xlu1 %709 }
 0x830   :  { %v712_v45 = vmul.f32 %v3565_v42, %v710_v44 }
 0x831   :  { %684 = vrot.lane.b32.xlu0 %v682_v43, %s3916_s2 }
 0x832   :  { %714 = vrot.lane.b32.xlu1 %v712_v45, %s3916_s2 }
 0x8a3   :  { %v685_v47 = vpop.permute.xlu0 %684 }
 0x8a4   :  { %v687_v50 = vadd.f32 %v685_v47, %v677_v46  ;;  %v715_v52 = vpop.permute.xlu1 %714 }
 0x8a5   :  { %v717_v54 = vadd.f32 %v715_v52, %v707_v48 }
 0x8a6   :  { %3566 = vtanh.f32 %v687_v50 }
 0x8a7   :  { %3568 = vtanh.f32 %v717_v54 }
 0x8b0   :  { %v3567_v55 = vpop.eup %3566 }
 0x8b1   :  { %v3569_v57 = vpop.eup %3568  ;;  %690 = vrot.lane.b32.xlu0 %v3567_v55, %s3910_s7 }
 0x8b2   :  { %720 = vrot.lane.b32.xlu1 %v3569_v57, %s3910_s7 }
 0x923   :  { %v691_v59 = vpop.permute.xlu0 %690 }
 0x924   :  { %v693_v60 = vmul.f32 %v3563_v40, %v691_v59  ;;  %v721_v61 = vpop.permute.xlu1 %720 }
 0x925   :  { %v723_v62 = vmul.f32 %v3565_v42, %v721_v61 }
 0x926   :  { %695 = vrot.lane.b32.xlu0 %v693_v60, %s3916_s2 }
 0x927   :  { %725 = vrot.lane.b32.xlu1 %v723_v62, %s3910_s7 }
 0x998   :  { %v696_v63 = vpop.permute.xlu0 %695 }
 0x999   :  { %698 = vst.msk [vmem:[#allocation2 + $0x10] sm:$0xff] %vm221_vm1, %v696_v63  ;;  %v726_v1 = vpop.permute.xlu1 %725 }
 0x99a   :  { %728 = vst.msk [vmem:[#allocation2 + $0x28] sm:$0xff] %vm419_vm2, %v726_v1  ;;  %v729_v2 = vsel %vm221_vm1, %v696_v63, %v726_v1 }
 0x99b   :  { %v730_v3 = vpack.c.bf16 %v729_v2, %v729_v2 }
 0x99d   :  { %3184 = vmatmul.mubr.msk.bf16.vlgmr.msra.gmra.mrb[12].mxu1 %vm315_vm3, %v730_v3 }
 0x99e   :  { %1091 = vmatpush1.bf16.msra.mxu1 %v4109_v33  ;;  %1122 = vmatprep.mubr.bf16.mxu1 %v3915_v32 }
 0x99f   :  { %1092 = vmatprep.subr.bf16.mxu1 %v4117_v34 }
 0x9a2   :  { %1093 = vmatpush1.bf16.msra.mxu1 %v4123_v35 }
 0x9a3   :  { %1094 = vmatprep.subr.bf16.mxu1 %v4129_v36 }
 0x9a6   :  { %1095 = vmatpush1.bf16.msra.mxu1 %v4135_v37 }
 0x9a7   :  { %1096 = vmatprep.subr.bf16.mxu1 %v4141_v38 }
 0x9aa   :  { %1097 = vmatpush1.bf16.msra.mxu1 %v4147_v39 }
 0xa70   :  { %v816_v4 = vpop.f32.mrb[12].mxu1 }
 0xa71   :  { %v823_v5 = vadd.f32 %v816_v4, %v4183_v56  ;;  %v818_v6 = vpop.f32.mrb[13].mxu1 }
 0xa72   :  { %v853_v7 = vadd.f32 %v818_v6, %v4185_v58  ;;  %v820_v8 = vpop.f32.mrb[14].mxu1 }
 0xa73   :  { %3570 = vtanh.f32 %v823_v5  ;;  %v821_v9 = vpop.f32.mrb[15].mxu1  ;;  %v3185_v12 = vmul.f32 -1.442695, %v823_v5 }
 0xa74   :  { %3572 = vtanh.f32 %v853_v7  ;;  %v3186_v13 = vmul.f32 -1.442695, %v853_v7 }
 0xa75   :  { %3574 = vpow2.f32 %v3185_v12 }
 0xa76   :  { %3576 = vpow2.f32 %v3186_v13 }
 0xa7d   :  { %v3571_v10 = vpop.eup %3570 }
 0xa7e   :  { %v3573_v11 = vpop.eup %3572  ;;  %833 = vrot.lane.b32.xlu0 %v3571_v10, %s3910_s7 }
 0xa7f   :  { %863 = vrot.lane.b32.xlu1 %v3573_v11, %s3910_s7  ;;  %v3575_v14 = vpop.eup %3574 }
 0xa80   :  { %v3577_v15 = vpop.eup %3576  ;;  %v827_v16 = vadd.f32 1.0, %v3575_v14 }
 0xa81   :  { %v857_v17 = vadd.f32 1.0, %v3577_v15 }
 0xa82   :  { %3578 = vrcp.f32 %v827_v16 }
 0xa83   :  { %3580 = vrcp.f32 %v857_v17 }
 0xa8c   :  { %v3579_v18 = vpop.eup %3578 }
 0xa8d   :  { %v3581_v20 = vpop.eup %3580  ;;  %v831_v24 = vmul.f32 %v3579_v18, %v687_v50 }
 0xa8e   :  { %v861_v26 = vmul.f32 %v3581_v20, %v717_v54 }
 0xaf0   :  { %v834_v19 = vpop.permute.xlu0 %833 }
 0xaf1   :  { %v836_v21 = vmul.f32 %v3579_v18, %v834_v19  ;;  %v864_v22 = vpop.permute.xlu1 %863 }
 0xaf2   :  { %v866_v23 = vmul.f32 %v3581_v20, %v864_v22 }
 0xaf3   :  { %838 = vrot.lane.b32.xlu0 %v836_v21, %s3916_s2 }
 0xaf4   :  { %868 = vrot.lane.b32.xlu1 %v866_v23, %s3916_s2 }
 0xb65   :  { %v839_v25 = vpop.permute.xlu0 %838 }
 0xb66   :  { %v841_v27 = vadd.f32 %v839_v25, %v831_v24  ;;  %v869_v31 = vpop.permute.xlu1 %868 }
 0xb67   :  { %v871_v28 = vadd.f32 %v869_v31, %v861_v26 }
 0xb68   :  { %3582 = vtanh.f32 %v841_v27 }
 0xb69   :  { %3584 = vtanh.f32 %v871_v28 }
 0xb72   :  { %v3583_v29 = vpop.eup %3582 }
 0xb73   :  { %v3585_v30 = vpop.eup %3584  ;;  %844 = vrot.lane.b32.xlu0 %v3583_v29, %s3910_s7 }
 0xb74   :  { %874 = vrot.lane.b32.xlu1 %v3585_v30, %s3910_s7 }
 0xbe5   :  { %v845_v40 = vpop.permute.xlu0 %844 }
 0xbe6   :  { %v847_v41 = vmul.f32 %v3579_v18, %v845_v40  ;;  %v875_v42 = vpop.permute.xlu1 %874 }
 0xbe7   :  { %v877_v43 = vmul.f32 %v3581_v20, %v875_v42 }
 0xbe8   :  { %849 = vrot.lane.b32.xlu0 %v847_v41, %s3916_s2 }
 0xbe9   :  { %879 = vrot.lane.b32.xlu1 %v877_v43, %s3910_s7 }
 0xc5a   :  { %v850_v44 = vpop.permute.xlu0 %849 }
 0xc5b   :  { %852 = vst.msk [vmem:[#allocation2 + $0x18] sm:$0xff] %vm221_vm1, %v850_v44  ;;  %v880_v45 = vpop.permute.xlu1 %879 }
 0xc5c   :  { %882 = vst.msk [vmem:[#allocation2 + $0x20] sm:$0xff] %vm419_vm2, %v880_v45  ;;  %v883_v46 = vsel %vm221_vm1, %v850_v44, %v880_v45 }
 0xc5d   :  { %v884_v47 = vpack.c.bf16 %v883_v46, %v883_v46 }
 0xc5f   :  { %3195 = vmatmul.mubr.msk.bf16.vlgmr.msra.gmra.mrb[8].mxu0 %vm315_vm3, %v884_v47 }
 0xc60   :  { %1245 = vmatpush1.bf16.msra.mxu0 %v4109_v33  ;;  %1276 = vmatprep.mubr.bf16.mxu0 %v3915_v32 }
 0xc61   :  { %1246 = vmatprep.subr.bf16.mxu0 %v4117_v34 }
 0xc64   :  { %1247 = vmatpush1.bf16.msra.mxu0 %v4123_v35 }
 0xc65   :  { %1248 = vmatprep.subr.bf16.mxu0 %v4129_v36 }
 0xc68   :  { %1249 = vmatpush1.bf16.msra.mxu0 %v4135_v37 }
 0xc69   :  { %1250 = vmatprep.subr.bf16.mxu0 %v4141_v38 }
 0xc6c   :  { %1251 = vmatpush1.bf16.msra.mxu0 %v4147_v39 }
 0xd32   :  { %v970_v48 = vpop.f32.mrb[8].mxu0 }
 0xd33   :  { %v977_v50 = vadd.f32 %v970_v48, %v4183_v56  ;;  %v972_v52 = vpop.f32.mrb[9].mxu0 }
 0xd34   :  { %v1007_v33 = vadd.f32 %v972_v52, %v4185_v58  ;;  %v974_v54 = vpop.f32.mrb[10].mxu0 }
 0xd35   :  { %3586 = vtanh.f32 %v977_v50  ;;  %v975_v55 = vpop.f32.mrb[11].mxu0  ;;  %v3196_v36 = vmul.f32 -1.442695, %v977_v50 }
 0xd36   :  { %3588 = vtanh.f32 %v1007_v33  ;;  %v3197_v37 = vmul.f32 -1.442695, %v1007_v33 }
 0xd37   :  { %3590 = vpow2.f32 %v3196_v36 }
 0xd38   :  { %3592 = vpow2.f32 %v3197_v37 }
 0xd3f   :  { %v3587_v34 = vpop.eup %3586 }
 0xd40   :  { %v3589_v35 = vpop.eup %3588  ;;  %987 = vrot.lane.b32.xlu0 %v3587_v34, %s3910_s7 }
 0xd41   :  { %1017 = vrot.lane.b32.xlu1 %v3589_v35, %s3910_s7  ;;  %v3591_v38 = vpop.eup %3590 }
 0xd42   :  { %v3593_v39 = vpop.eup %3592  ;;  %v981_v57 = vadd.f32 1.0, %v3591_v38 }
 0xd43   :  { %v1011_v59 = vadd.f32 1.0, %v3593_v39 }
 0xd44   :  { %3594 = vrcp.f32 %v981_v57 }
 0xd45   :  { %3596 = vrcp.f32 %v1011_v59 }
 0xd4e   :  { %v3595_v60 = vpop.eup %3594 }
 0xd4f   :  { %v3597_v62 = vpop.eup %3596  ;;  %v985_v3 = vmul.f32 %v3595_v60, %v841_v27 }
 0xd50   :  { %v1015_v5 = vmul.f32 %v3597_v62, %v871_v28 }
 0xdb2   :  { %v988_v61 = vpop.permute.xlu0 %987 }
 0xdb3   :  { %v990_v63 = vmul.f32 %v3595_v60, %v988_v61  ;;  %v1018_v1 = vpop.permute.xlu1 %1017 }
 0xdb4   :  { %v1020_v2 = vmul.f32 %v3597_v62, %v1018_v1 }
 0xdb5   :  { %992 = vrot.lane.b32.xlu0 %v990_v63, %s3916_s2 }
 0xdb6   :  { %1022 = vrot.lane.b32.xlu1 %v1020_v2, %s3916_s2 }
 0xe27   :  { %v993_v4 = vpop.permute.xlu0 %992 }
 0xe28   :  { %v995_v6 = vadd.f32 %v993_v4, %v985_v3  ;;  %v1023_v7 = vpop.permute.xlu1 %1022 }
 0xe29   :  { %v1025_v8 = vadd.f32 %v1023_v7, %v1015_v5 }
 0xe2a   :  { %3598 = vtanh.f32 %v995_v6 }
 0xe2b   :  { %3600 = vtanh.f32 %v1025_v8 }
 0xe34   :  { %v3599_v9 = vpop.eup %3598 }
 0xe35   :  { %v3601_v10 = vpop.eup %3600  ;;  %998 = vrot.lane.b32.xlu0 %v3599_v9, %s3910_s7 }
 0xe36   :  { %1028 = vrot.lane.b32.xlu1 %v3601_v10, %s3910_s7 }
 0xea7   :  { %v999_v11 = vpop.permute.xlu0 %998 }
 0xea8   :  { %v1001_v12 = vmul.f32 %v3595_v60, %v999_v11  ;;  %v1029_v13 = vpop.permute.xlu1 %1028 }
 0xea9   :  { %v1031_v14 = vmul.f32 %v3597_v62, %v1029_v13 }
 0xeaa   :  { %1003 = vrot.lane.b32.xlu0 %v1001_v12, %s3916_s2 }
 0xeab   :  { %1033 = vrot.lane.b32.xlu1 %v1031_v14, %s3910_s7 }
 0xf1c   :  { %v1004_v15 = vpop.permute.xlu0 %1003 }
 0xf1d   :  { %1006 = vst.msk [vmem:[#allocation2 + $0x20] sm:$0xff] %vm221_vm1, %v1004_v15  ;;  %v1034_v16 = vpop.permute.xlu1 %1033 }
 0xf1e   :  { %1036 = vst.msk [vmem:[#allocation2 + $0x18] sm:$0xff] %vm419_vm2, %v1034_v16  ;;  %v1037_v17 = vsel %vm221_vm1, %v1004_v15, %v1034_v16 }
 0xf1f   :  { %v1038_v18 = vpack.c.bf16 %v1037_v17, %v1037_v17 }
 0xf21   :  { %3206 = vmatmul.mubr.msk.bf16.vlgmr.msra.gmra.mrb[16].mxu1 %vm315_vm3, %v1038_v18 }
 0xf22   :  { %1430 = vmatprep.mubr.bf16.mxu1 %v3915_v32 }
 0xff4   :  { %v1124_v19 = vpop.f32.mrb[16].mxu1 }
 0xff5   :  { %v1131_v20 = vadd.f32 %v1124_v19, %v4183_v56  ;;  %v1126_v21 = vpop.f32.mrb[17].mxu1 }
 0xff6   :  { %v1161_v22 = vadd.f32 %v1126_v21, %v4185_v58  ;;  %v1128_v23 = vpop.f32.mrb[18].mxu1 }
 0xff7   :  { %3602 = vtanh.f32 %v1131_v20  ;;  %v1129_v24 = vpop.f32.mrb[19].mxu1  ;;  %v3207_v27 = vmul.f32 -1.442695, %v1131_v20 }
 0xff8   :  { %3604 = vtanh.f32 %v1161_v22  ;;  %v3208_v31 = vmul.f32 -1.442695, %v1161_v22  ;;  %v3470_v24 = vld [vmem:[%s4745_s5] ss:$8 sps:$4 sm:$0xff]  }
 0xff9   :  { %3606 = vpow2.f32 %v3207_v27  ;;  %v3473_v27 = vld [vmem:[%s4745_s5 + $0x10] ss:$8 sps:$4 sm:$0xff]  }
 0xffa   :  { %3608 = vpow2.f32 %v3208_v31  ;;  %v3478_v31 = vld [vmem:[%s4745_s5 + $0x24] ss:$8 sps:$4 sm:$0xff]  }
0x1001   :  { %v3603_v25 = vpop.eup %3602 }
0x1002   :  { %v3605_v26 = vpop.eup %3604  ;;  %1141 = vrot.lane.b32.xlu0 %v3603_v25, %s3910_s7  ;;  %v3472_v25 = vld [vmem:[%s4745_s5 + $0x4] ss:$8 sps:$4 sm:$0xff]  }
0x1003   :  { %1171 = vrot.lane.b32.xlu1 %v3605_v26, %s3910_s7  ;;  %v3607_v28 = vpop.eup %3606  ;;  %v3475_v26 = vld [vmem:[%s4745_s5 + $0x14] ss:$8 sps:$4 sm:$0xff]   ;;  %1398 = vmatprep.subr.bf16.mxu1 %v3472_v25  ;;  %v3500_v25 = vld [vmem:[%s4746_s6 + $0x30] ss:$8 sps:$4 sm:$0xff]  }
0x1004   :  { %v3609_v29 = vpop.eup %3608  ;;  %v1135_v30 = vadd.f32 1.0, %v3607_v28  ;;  %1399 = vmatpush1.bf16.msra.mxu1 %v3470_v24  ;;  %v3476_v28 = vld [vmem:[%s4745_s5 + $0x20] ss:$8 sps:$4 sm:$0xff]   ;;  %v4424_v24 = vld [vmem:[%s4748_s8 + $0x34] ss:$8 sps:$4 sm:$0xff]  }
0x1005   :  { %v1165_v40 = vadd.f32 1.0, %v3609_v29  ;;  %1400 = vmatprep.subr.bf16.mxu1 %v3475_v26  ;;  %v4434_v26 = vld [vmem:[%s4748_s8 + $0x30] ss:$8 sps:$4 sm:$0xff]  }
0x1006   :  { %3610 = vrcp.f32 %v1135_v30 }
0x1007   :  { %3612 = vrcp.f32 %v1165_v40  ;;  %v3481_v40 = vld [vmem:[%s4745_s5 + $0x34] ss:$8 sps:$4 sm:$0xff]  }
0x1008   :  { %1401 = vmatpush1.bf16.msra.mxu1 %v3473_v27 }
0x1009   :  { %1402 = vmatprep.subr.bf16.mxu1 %v3478_v31 }
0x100c   :  { %1403 = vmatpush1.bf16.msra.mxu1 %v3476_v28 }
0x100d   :  { %1404 = vmatprep.subr.bf16.mxu1 %v3481_v40 }
0x1010   :  { %v3611_v41 = vpop.eup %3610 }
0x1011   :  { %v3613_v43 = vpop.eup %3612  ;;  %v1139_v47 = vmul.f32 %v3611_v41, %v995_v6 }
0x1012   :  { %v1169_v50 = vmul.f32 %v3613_v43, %v1025_v8 }
0x1074   :  { %v1142_v42 = vpop.permute.xlu0 %1141 }
0x1075   :  { %v1144_v44 = vmul.f32 %v3611_v41, %v1142_v42  ;;  %v1172_v45 = vpop.permute.xlu1 %1171 }
0x1076   :  { %v1174_v46 = vmul.f32 %v3613_v43, %v1172_v45 }
0x1077   :  { %1146 = vrot.lane.b32.xlu0 %v1144_v44, %s3916_s2 }
0x1078   :  { %1176 = vrot.lane.b32.xlu1 %v1174_v46, %s3916_s2 }
0x10e9   :  { %v1147_v48 = vpop.permute.xlu0 %1146 }
0x10ea   :  { %v1149_v52 = vadd.f32 %v1147_v48, %v1139_v47  ;;  %v1177_v33 = vpop.permute.xlu1 %1176 }
0x10eb   :  { %v1179_v54 = vadd.f32 %v1177_v33, %v1169_v50 }
0x10ec   :  { %3614 = vtanh.f32 %v1149_v52 }
0x10ed   :  { %3616 = vtanh.f32 %v1179_v54 }
0x10f6   :  { %v3615_v55 = vpop.eup %3614 }
0x10f7   :  { %v3617_v34 = vpop.eup %3616  ;;  %1152 = vrot.lane.b32.xlu0 %v3615_v55, %s3910_s7 }
0x10f8   :  { %1182 = vrot.lane.b32.xlu1 %v3617_v34, %s3910_s7 }
0x1169   :  { %v1153_v35 = vpop.permute.xlu0 %1152 }
0x116a   :  { %v1155_v36 = vmul.f32 %v3611_v41, %v1153_v35  ;;  %v1183_v37 = vpop.permute.xlu1 %1182  ;;  %v3479_v41 = vld [vmem:[%s4745_s5 + $0x30] ss:$8 sps:$4 sm:$0xff]  }
0x116b   :  { %v1185_v38 = vmul.f32 %v3613_v43, %v1183_v37  ;;  %1405 = vmatpush1.bf16.msra.mxu1 %v3479_v41 }
0x116c   :  { %1157 = vrot.lane.b32.xlu0 %v1155_v36, %s3916_s2 }
0x116d   :  { %1187 = vrot.lane.b32.xlu1 %v1185_v38, %s3910_s7 }
0x11de   :  { %v1158_v39 = vpop.permute.xlu0 %1157 }
0x11df   :  { %1160 = vst.msk [vmem:[#allocation2 + $0x28] sm:$0xff] %vm221_vm1, %v1158_v39  ;;  %v1188_v57 = vpop.permute.xlu1 %1187 }
0x11e0   :  { %1190 = vst.msk [vmem:[#allocation2 + $0x10] sm:$0xff] %vm419_vm2, %v1188_v57  ;;  %v1191_v59 = vsel %vm221_vm1, %v1158_v39, %v1188_v57 }
0x11e1   :  { %v1192_v60 = vpack.c.bf16 %v1191_v59, %v1191_v59 }
0x11e3   :  { %3217 = vmatmul.mubr.msk.bf16.vlgmr.msra.gmra.mrb[12].mxu0 %vm315_vm3, %v1192_v60 }
0x11e4   :  { %1615 = vmatprep.mubr.bf16.mxu0 %v3915_v32 }
0x12b6   :  { %v1278_v61 = vpop.f32.mrb[12].mxu0 }
0x12b7   :  { %v1285_v62 = vadd.f32 %v1278_v61, %v4183_v56  ;;  %v1280_v63 = vpop.f32.mrb[13].mxu0 }
0x12b8   :  { %v1315_v1 = vadd.f32 %v1280_v63, %v4185_v58  ;;  %v1282_v2 = vpop.f32.mrb[14].mxu0 }
0x12b9   :  { %3618 = vtanh.f32 %v1285_v62  ;;  %v1283_v3 = vpop.f32.mrb[15].mxu0  ;;  %v3218_v6 = vmul.f32 -1.442695, %v1285_v62 }
0x12ba   :  { %3620 = vtanh.f32 %v1315_v1  ;;  %v3219_v7 = vmul.f32 -1.442695, %v1315_v1 }
0x12bb   :  { %3622 = vpow2.f32 %v3218_v6 }
0x12bc   :  { %3624 = vpow2.f32 %v3219_v7 }
0x12c3   :  { %v3619_v4 = vpop.eup %3618 }
0x12c4   :  { %v3621_v5 = vpop.eup %3620  ;;  %1295 = vrot.lane.b32.xlu0 %v3619_v4, %s3910_s7 }
0x12c5   :  { %1325 = vrot.lane.b32.xlu1 %v3621_v5, %s3910_s7  ;;  %v3623_v8 = vpop.eup %3622 }
0x12c6   :  { %v3625_v9 = vpop.eup %3624  ;;  %v1289_v10 = vadd.f32 1.0, %v3623_v8 }
0x12c7   :  { %v1319_v11 = vadd.f32 1.0, %v3625_v9  ;;  %v3482_v9 = vld [vmem:[%s4746_s6] ss:$8 sps:$4 sm:$0xff]  }
0x12c8   :  { %3626 = vrcp.f32 %v1289_v10  ;;  %v3484_v10 = vld [vmem:[%s4746_s6 + $0x4] ss:$8 sps:$4 sm:$0xff]  }
0x12c9   :  { %3628 = vrcp.f32 %v1319_v11  ;;  %v4373_v11 = vld [vmem:[%s4748_s8] ss:$8 sps:$4 sm:$0xff]   ;;  %1583 = vmatprep.subr.bf16.mxu0 %v3484_v10 }
0x12ca   :  { %1584 = vmatpush1.bf16.msra.mxu0 %v3482_v9 }
0x12d2   :  { %v3627_v12 = vpop.eup %3626 }
0x12d3   :  { %v3629_v14 = vpop.eup %3628  ;;  %v1293_v18 = vmul.f32 %v3627_v12, %v1149_v52 }
0x12d4   :  { %v1323_v20 = vmul.f32 %v3629_v14, %v1179_v54 }
0x1336   :  { %v1296_v13 = vpop.permute.xlu0 %1295 }
0x1337   :  { %v1298_v15 = vmul.f32 %v3627_v12, %v1296_v13  ;;  %v1326_v16 = vpop.permute.xlu1 %1325  ;;  %v3490_v13 = vld [vmem:[%s4746_s6 + $0x14] ss:$8 sps:$4 sm:$0xff]  }
0x1338   :  { %v1328_v17 = vmul.f32 %v3629_v14, %v1326_v16  ;;  %1585 = vmatprep.subr.bf16.mxu0 %v3490_v13 }
0x1339   :  { %1300 = vrot.lane.b32.xlu0 %v1298_v15, %s3916_s2 }
0x133a   :  { %1330 = vrot.lane.b32.xlu1 %v1328_v17, %s3916_s2  ;;  %v4393_v17 = vld [vmem:[%s4748_s8 + $0x14] ss:$8 sps:$4 sm:$0xff]  }
0x13ab   :  { %v1301_v19 = vpop.permute.xlu0 %1300 }
0x13ac   :  { %v4317_v21 = vadd.f32 %v1301_v19, %v1293_v18  ;;  %v1331_v22 = vpop.permute.xlu1 %1330  ;;  %v4398_v18 = vld [vmem:[%s4748_s8 + $0x10] ss:$8 sps:$4 sm:$0xff]   ;;  %v3494_v19 = vld [vmem:[%s4746_s6 + $0x20] ss:$8 sps:$4 sm:$0xff]  }
0x13ad   :  { %v4319_v23 = vadd.f32 %v1331_v22, %v1323_v20  ;;  %v3496_v20 = vld [vmem:[%s4746_s6 + $0x24] ss:$8 sps:$4 sm:$0xff]  }
0x13ae   :  { %3630 = vtanh.f32 %v4317_v21  ;;  %v4416_v22 = vld [vmem:[%s4748_s8 + $0x24] ss:$8 sps:$4 sm:$0xff]  }
0x13af   :  { %3632 = vtanh.f32 %v4319_v23 }
0x13b8   :  { %v3631_v29 = vpop.eup %3630 }
0x13b9   :  { %v3633_v30 = vpop.eup %3632  ;;  %1306 = vrot.lane.b32.xlu0 %v3631_v29, %s3910_s7 }
0x13ba   :  { %1336 = vrot.lane.b32.xlu1 %v3633_v30, %s3910_s7 }
0x142b   :  { %v1307_v42 = vpop.permute.xlu0 %1306 }
0x142c   :  { %v1309_v43 = vmul.f32 %v3627_v12, %v1307_v42  ;;  %v1337_v44 = vpop.permute.xlu1 %1336  ;;  %v4378_v12 = vld [vmem:[%s4748_s8 + $0x4] ss:$8 sps:$4 sm:$0xff]  }
0x142d   :  { %v1339_v45 = vmul.f32 %v3629_v14, %v1337_v44  ;;  %1720 = vmatprep.subr.bf16.mxu1 %v4378_v12  ;;  %v3488_v14 = vld [vmem:[%s4746_s6 + $0x10] ss:$8 sps:$4 sm:$0xff]  }
0x142e   :  { %1311 = vrot.lane.b32.xlu0 %v1309_v43, %s3916_s2  ;;  %1586 = vmatpush1.bf16.msra.mxu0 %v3488_v14  ;;  %v1501_v43 = vld [vmem:[#allocation2 + $0x10] sm:$0xff]  ;;  %v1502_v44 = vld [vmem:[#allocation2 + $0x18] sm:$0xff] }
0x142f   :  { %1341 = vrot.lane.b32.xlu1 %v1339_v45, %s3910_s7  ;;  %1587 = vmatprep.subr.bf16.mxu0 %v3496_v20  ;;  %v1508_v45 = vpack.c.bf16 %v1502_v44, %v1501_v43 }
0x1432   :  { %1588 = vmatpush1.bf16.msra.mxu0 %v3494_v19 }
0x14a0   :  { %v1312_v46 = vpop.permute.xlu0 %1311 }
0x14a1   :  { %1314 = vst.msk [vmem:[#allocation2 + $0x30] sm:$0xff] %vm221_vm1, %v1312_v46  ;;  %v1342_v47 = vpop.permute.xlu1 %1341 }
0x14a2   :  { %1344 = vst.msk [vmem:[#allocation2 + $0x8] sm:$0xff] %vm419_vm2, %v1342_v47  ;;  %v1345_v48 = vsel %vm221_vm1, %v1312_v46, %v1342_v47  ;;  %v1504_v46 = vld [vmem:[#allocation2 + $0x28] sm:$0xff]  ;;  %v1503_v47 = vld [vmem:[#allocation2 + $0x20] sm:$0xff] }
0x14a3   :  { %v1346_v50 = vpack.c.bf16 %v1345_v48, %v1345_v48  ;;  %v1509_v48 = vpack.c.bf16 %v1504_v46, %v1503_v47 }
0x14a5   :  { %3228 = vmatmul.mubr.msk.bf16.vlgmr.msra.gmra.mrb[20].mxu1 %vm315_vm3, %v1346_v50 }
0x14a6   :  { %1752 = vmatprep.mubr.bf16.mxu1 %v3915_v32  ;;  %1721 = vmatpush1.bf16.msra.mxu1 %v4373_v11 }
0x14a7   :  { %1722 = vmatprep.subr.bf16.mxu1 %v4393_v17 }
0x14a9   :  { %v1500_v41 = vld [vmem:[#allocation2 + $0x8] sm:$0xff] }
0x14aa   :  { %1723 = vmatpush1.bf16.msra.mxu1 %v4398_v18 }
0x14ab   :  { %1724 = vmatprep.subr.bf16.mxu1 %v4416_v22 }
0x1578   :  { %v1432_v52 = vpop.f32.mrb[20].mxu1 }
0x1579   :  { %v1439_v33 = vadd.f32 %v1432_v52, %v4183_v56  ;;  %v1434_v54 = vpop.f32.mrb[21].mxu1  ;;  %v1505_v52 = vld [vmem:[#allocation2 + $0x30] sm:$0xff] }
0x157a   :  { %v1469_v55 = vadd.f32 %v1434_v54, %v4185_v58  ;;  %v1436_v34 = vpop.f32.mrb[22].mxu1 }
0x157b   :  { %3634 = vtanh.f32 %v1439_v33  ;;  %v1437_v35 = vpop.f32.mrb[23].mxu1  ;;  %v3229_v38 = vmul.f32 -1.442695, %v1439_v33 }
0x157c   :  { %3636 = vtanh.f32 %v1469_v55  ;;  %v3230_v39 = vmul.f32 -1.442695, %v1469_v55 }
0x157d   :  { %3638 = vpow2.f32 %v3229_v38 }
0x157e   :  { %3640 = vpow2.f32 %v3230_v39 }
0x1585   :  { %v3635_v36 = vpop.eup %3634 }
0x1586   :  { %v3637_v37 = vpop.eup %3636  ;;  %1449 = vrot.lane.b32.xlu1 %v3635_v36, %s3910_s7  ;;  %v1519_v36 = vld [vmem:[#allocation9] sm:$0x3] }
0x1587   :  { %1479 = vrot.lane.b32.xlu0 %v3637_v37, %s3910_s7  ;;  %v3639_v57 = vpop.eup %3638  ;;  %v1524_v37 = vrot.slane %v1519_v36, %v193_v51  ;;  %v1528_v38 = vrot.slane %v1519_v36, %v197_v53 }
0x1588   :  { %v3641_v59 = vpop.eup %3640  ;;  %v1443_v56 = vadd.f32 1.0, %v3639_v57 }
0x1589   :  { %v1473_v60 = vadd.f32 1.0, %v3641_v59 }
0x158a   :  { %3642 = vrcp.f32 %v1443_v56 }
0x158b   :  { %3644 = vrcp.f32 %v1473_v60 }
0x1594   :  { %v3643_v58 = vpop.eup %3642 }
0x1595   :  { %v3645_v62 = vpop.eup %3644  ;;  %v1447_v3 = vmul.f32 %v3643_v58, %v4317_v21  ;;  %v4411_v21 = vld [vmem:[%s4748_s8 + $0x20] ss:$8 sps:$4 sm:$0xff]  }
0x1596   :  { %v1477_v5 = vmul.f32 %v3645_v62, %v4319_v23  ;;  %v3502_v23 = vld [vmem:[%s4746_s6 + $0x34] ss:$8 sps:$4 sm:$0xff]   ;;  %1725 = vmatpush1.bf16.msra.mxu1 %v4411_v21 }
0x1597   :  { %1589 = vmatprep.subr.bf16.mxu0 %v3502_v23  ;;  %1726 = vmatprep.subr.bf16.mxu1 %v4424_v24 }
0x1598   :  { %1590 = vmatpush1.bf16.msra.mxu0 %v3500_v25 }
0x1599   :  { %2032 = vmatprep.subr.bf16.mxu0 %v4378_v12 }
0x159a   :  { %1727 = vmatpush1.bf16.msra.mxu1 %v4434_v26 }
0x159b   :  { %1876 = vmatprep.subr.bf16.mxu1 %v4378_v12 }
0x159d   :  { %1753 = vmatmul.mubr.bf16.vlgmr.msra.gmra.mrb[24].mxu1 %v3912_v0 }
0x159e   :  { %1877 = vmatpush1.bf16.msra.mxu1 %v4373_v11  ;;  %1908 = vmatprep.mubr.bf16.mxu1 %v3915_v32 }
0x159f   :  { %1878 = vmatprep.subr.bf16.mxu1 %v4393_v17 }
0x15a2   :  { %1879 = vmatpush1.bf16.msra.mxu1 %v4398_v18 }
0x15a3   :  { %1880 = vmatprep.subr.bf16.mxu1 %v4416_v22 }
0x15a6   :  { %1881 = vmatpush1.bf16.msra.mxu1 %v4411_v21 }
0x15a7   :  { %1882 = vmatprep.subr.bf16.mxu1 %v4424_v24 }
0x15aa   :  { %1883 = vmatpush1.bf16.msra.mxu1 %v4434_v26 }
0x15ab   :  { %2188 = vmatprep.subr.bf16.mxu1 %v4378_v12 }
0x15f8   :  { %v1450_v61 = vpop.permute.xlu1 %1449 }
0x15f9   :  { %v1452_v63 = vmul.f32 %v3643_v58, %v1450_v61  ;;  %v1480_v1 = vpop.permute.xlu0 %1479 }
0x15fa   :  { %v1482_v2 = vmul.f32 %v3645_v62, %v1480_v1 }
0x15fb   :  { %1454 = vrot.lane.b32.xlu1 %v1452_v63, %s3916_s2 }
0x15fc   :  { %1484 = vrot.lane.b32.xlu0 %v1482_v2, %s3916_s2 }
0x166d   :  { %v1455_v4 = vpop.permute.xlu1 %1454 }
0x166e   :  { %v1457_v6 = vadd.f32 %v1455_v4, %v1447_v3  ;;  %v1485_v7 = vpop.permute.xlu0 %1484 }
0x166f   :  { %v1487_v8 = vadd.f32 %v1485_v7, %v1477_v5 }
0x1670   :  { %3646 = vtanh.f32 %v1457_v6  ;;  %v1754_v54 = vpop.f32.mrb[24].mxu1 }
0x1671   :  { %3648 = vtanh.f32 %v1487_v8  ;;  %v1756_v55 = vpop.f32.mrb[25].mxu1 }
0x1672   :  { %v1758_v34 = vpop.f32.mrb[26].mxu1 }
0x1673   :  { %v1759_v35 = vpop.f32.mrb[27].mxu1 }
0x167a   :  { %v3647_v15 = vpop.eup %3646 }
0x167b   :  { %v3649_v16 = vpop.eup %3648  ;;  %1460 = vrot.lane.b32.xlu1 %v3647_v15, %s3910_s7 }
0x167c   :  { %1490 = vrot.lane.b32.xlu0 %v3649_v16, %s3910_s7 }
0x16ed   :  { %v1461_v27 = vpop.permute.xlu1 %1460 }
0x16ee   :  { %v1463_v31 = vmul.f32 %v3643_v58, %v1461_v27  ;;  %v1491_v28 = vpop.permute.xlu0 %1490 }
0x16ef   :  { %v1493_v29 = vmul.f32 %v3645_v62, %v1491_v28 }
0x16f0   :  { %1465 = vrot.lane.b32.xlu1 %v1463_v31, %s3916_s2 }
0x16f1   :  { %1495 = vrot.lane.b32.xlu0 %v1493_v29, %s3910_s7 }
0x1762   :  { %v1466_v0 = vpop.permute.xlu1 %1465 }
0x1763   :  { %1468 = vst.msk [vmem:[#allocation2 + $0x38] sm:$0xff] %vm221_vm1, %v1466_v0  ;;  %v1496_v30 = vpop.permute.xlu0 %1495 }
0x1764   :  { %1498 = vst.msk [vmem:[#allocation2] sm:$0xff] %vm419_vm2, %v1496_v30 }
0x176a   :  { %v1506_v50 = vld [vmem:[#allocation2 + $0x38] sm:$0xff] }
0x176b   :  { %v1499_v40 = vld [vmem:[#allocation2] sm:$0xff]  ;;  %v1510_v33 = vpack.c.bf16 %v1506_v50, %v1505_v52 }
0x176c   :  { %v1507_v42 = vpack.c.bf16 %v1500_v41, %v1499_v40 }
0x176e   :  { %3239 = vmatmul.mubr.msk.bf16.vlgmr.msra.gmra.mrb[16].mxu0 %vm315_vm3, %v1507_v42 }
0x176f   :  { %1625 = vmatprep.mubr.bf16.mxu0 %v3915_v32  ;;  %2033 = vmatpush1.bf16.msra.mxu0 %v4373_v11 }
0x1770   :  { %2034 = vmatprep.subr.bf16.mxu0 %v4393_v17 }
0x1773   :  { %2035 = vmatpush1.bf16.msra.mxu0 %v4398_v18 }
0x1774   :  { %2036 = vmatprep.subr.bf16.mxu0 %v4416_v22 }
0x1776   :  { %3240 = vmatmul.mubr.msk.bf16.gmra.mrb[20].mxu0 %vm315_vm3, %v1508_v45 }
0x1777   :  { %1635 = vmatprep.mubr.bf16.mxu0 %v3915_v32  ;;  %2037 = vmatpush1.bf16.msra.mxu0 %v4411_v21 }
0x1778   :  { %2038 = vmatprep.subr.bf16.mxu0 %v4424_v24 }
0x177b   :  { %2039 = vmatpush1.bf16.msra.mxu0 %v4434_v26 }
0x177c   :  { %2344 = vmatprep.subr.bf16.mxu0 %v4378_v12 }
0x177e   :  { %3241 = vmatmul.mubr.msk.bf16.gmra.mrb[24].mxu0 %vm315_vm3, %v1509_v48 }
0x177f   :  { %1645 = vmatprep.mubr.bf16.mxu0 %v3915_v32 }
0x1786   :  { %3242 = vmatmul.mubr.msk.bf16.gmra.mrb[28].mxu0 %vm315_vm3, %v1510_v33 }
0x1787   :  { %2064 = vmatprep.mubr.bf16.mxu0 %v3915_v32 }
0x1841   :  { %v1617_v39 = vpop.f32.mrb[16].mxu0 }
0x1842   :  { %v1618_v57 = vadd.f32 %v1617_v39, %v1524_v37  ;;  %v1619_v59 = vpop.f32.mrb[17].mxu0 }
0x1843   :  { %v4474_v56 = vadd.f32 %v1619_v59, %v1528_v38  ;;  %v1621_v60 = vpop.f32.mrb[18].mxu0 }
0x1844   :  { %v4476_v58 = vadd.f32 %v1621_v60, %v1524_v37  ;;  %v1762_v61 = vadd.f32 %v1754_v54, %v1618_v57  ;;  %v1623_v62 = vpop.f32.mrb[19].mxu0 }
0x1845   :  { %v4478_v63 = vadd.f32 %v1623_v62, %v1528_v38 }
0x1846   :  { %3650 = vtanh.f32 %v1762_v61  ;;  %v3251_v40 = vmul.f32 -1.442695, %v1762_v61 }
0x1849   :  { %v1627_v1 = vpop.f32.mrb[20].mxu0 }
0x184a   :  { %v4480_v2 = vadd.f32 %v1627_v1, %v1524_v37  ;;  %v1629_v51 = vpop.f32.mrb[21].mxu0 }
0x184b   :  { %v4482_v3 = vadd.f32 %v1629_v51, %v1528_v38  ;;  %v1631_v49 = vpop.f32.mrb[22].mxu0 }
0x184c   :  { %v4484_v53 = vadd.f32 %v1631_v49, %v1524_v37  ;;  %v1633_v4 = vpop.f32.mrb[23].mxu0 }
0x184d   :  { %v4486_v5 = vadd.f32 %v1633_v4, %v1528_v38 }
0x1850   :  { %v3651_v6 = vpop.eup %3650 }
0x1851   :  { %v1637_v7 = vpop.f32.mrb[24].mxu0  ;;  %1772 = vrot.lane.b32.xlu0 %v3651_v6, %s3910_s7 }
0x1852   :  { %v4489_v8 = vadd.f32 %v1637_v7, %v1524_v37  ;;  %v1639_v9 = vpop.f32.mrb[25].mxu0 }
0x1853   :  { %v4491_v10 = vadd.f32 %v1639_v9, %v1528_v38  ;;  %v1641_v13 = vpop.f32.mrb[26].mxu0 }
0x1854   :  { %v4493_v14 = vadd.f32 %v1641_v13, %v1524_v37  ;;  %v1643_v15 = vpop.f32.mrb[27].mxu0 }
0x1855   :  { %v4495_v16 = vadd.f32 %v1643_v15, %v1528_v38 }
0x1859   :  { %v1647_v19 = vpop.f32.mrb[28].mxu0 }
0x185a   :  { %v4497_v20 = vadd.f32 %v1647_v19, %v1524_v37  ;;  %v1649_v23 = vpop.f32.mrb[29].mxu0 }
0x185b   :  { %v4499_v25 = vadd.f32 %v1649_v23, %v1528_v38  ;;  %v1651_v27 = vpop.f32.mrb[30].mxu0 }
0x185c   :  { %v4501_v31 = vadd.f32 %v1651_v27, %v1524_v37  ;;  %v1653_v28 = vpop.f32.mrb[31].mxu0 }
0x185d   :  { %v1654_v29 = vadd.f32 %v1653_v28, %v1528_v38 }
0x185f   :  { %v1793_v0 = vadd.f32 %v1756_v55, %v1654_v29 }
0x1861   :  { %3652 = vtanh.f32 %v1793_v0  ;;  %v3252_v43 = vmul.f32 -1.442695, %v1793_v0 }
0x1862   :  { %3654 = vpow2.f32 %v3251_v40 }
0x186b   :  { %v3653_v30 = vpop.eup %3652 }
0x186c   :  { %1803 = vrot.lane.b32.xlu1 %v3653_v30, %s3910_s7  ;;  %v3655_v41 = vpop.eup %3654 }
0x186d   :  { %v1766_v42 = vadd.f32 1.0, %v3655_v41 }
0x186f   :  { %3656 = vrcp.f32 %v1766_v42 }
0x1870   :  { %3658 = vpow2.f32 %v3252_v43 }
0x1879   :  { %v3657_v44 = vpop.eup %3656 }
0x187a   :  { %v3659_v47 = vpop.eup %3658  ;;  %v1770_v54 = vmul.f32 0.0, %v3657_v44 }
0x187b   :  { %v1797_v48 = vadd.f32 1.0, %v3659_v47 }
0x187d   :  { %3660 = vrcp.f32 %v1797_v48 }
0x1887   :  { %v3661_v50 = vpop.eup %3660 }
0x1888   :  { %v1801_v36 = vmul.f32 0.0, %v3661_v50 }
0x18c3   :  { %v1773_v45 = vpop.permute.xlu0 %1772 }
0x18c4   :  { %v1775_v46 = vmul.f32 %v3657_v44, %v1773_v45 }
0x18c6   :  { %1777 = vrot.lane.b32.xlu0 %v1775_v46, %s3916_s2 }
0x18de   :  { %v1804_v52 = vpop.permute.xlu1 %1803 }
0x18df   :  { %v1806_v33 = vmul.f32 %v3661_v50, %v1804_v52 }
0x18e1   :  { %1808 = vrot.lane.b32.xlu1 %v1806_v33, %s3916_s2 }
0x1938   :  { %v1778_v55 = vpop.permute.xlu0 %1777 }
0x1939   :  { %v1780_v34 = vadd.f32 %v1778_v55, %v1770_v54 }
0x193b   :  { %3662 = vtanh.f32 %v1780_v34 }
0x1945   :  { %v3663_v35 = vpop.eup %3662 }
0x1946   :  { %1783 = vrot.lane.b32.xlu0 %v3663_v35, %s3910_s7 }
0x1953   :  { %v1809_v37 = vpop.permute.xlu1 %1808 }
0x1954   :  { %v1811_v38 = vadd.f32 %v1809_v37, %v1801_v36 }
0x1956   :  { %3664 = vtanh.f32 %v1811_v38 }
0x1960   :  { %v3665_v39 = vpop.eup %3664 }
0x1961   :  { %1814 = vrot.lane.b32.xlu1 %v3665_v39, %s3910_s7 }
0x19b8   :  { %v1784_v57 = vpop.permute.xlu0 %1783 }
0x19b9   :  { %v1786_v59 = vmul.f32 %v3657_v44, %v1784_v57 }
0x19bb   :  { %1788 = vrot.lane.b32.xlu0 %v1786_v59, %s3916_s2 }
0x19d3   :  { %v1815_v60 = vpop.permute.xlu1 %1814 }
0x19d4   :  { %v1817_v61 = vmul.f32 %v3661_v50, %v1815_v60 }
0x19d6   :  { %1819 = vrot.lane.b32.xlu1 %v1817_v61, %s3910_s7 }
0x1a2d   :  { %v1789_v62 = vpop.permute.xlu0 %1788 }
0x1a2e   :  { %1791 = vst.msk [vmem:[#allocation3] sm:$0xff] %vm221_vm1, %v1789_v62 }
0x1a48   :  { %v1820_v1 = vpop.permute.xlu1 %1819 }
0x1a49   :  { %1822 = vst.msk [vmem:[#allocation3 + $0x38] sm:$0xff] %vm419_vm2, %v1820_v1  ;;  %v1823_v51 = vsel %vm221_vm1, %v1789_v62, %v1820_v1 }
0x1a4a   :  { %v1824_v49 = vpack.c.bf16 %v1823_v51, %v1823_v51 }
0x1a4c   :  { %3261 = vmatmul.mubr.msk.bf16.vlgmr.msra.gmra.mrb[28].mxu1 %vm315_vm3, %v1824_v49 }
0x1a4d   :  { %2189 = vmatpush1.bf16.msra.mxu1 %v4373_v11  ;;  %2220 = vmatprep.mubr.bf16.mxu1 %v3915_v32 }
0x1a4e   :  { %2190 = vmatprep.subr.bf16.mxu1 %v4393_v17 }
0x1a51   :  { %2191 = vmatpush1.bf16.msra.mxu1 %v4398_v18 }
0x1a52   :  { %2192 = vmatprep.subr.bf16.mxu1 %v4416_v22 }
0x1a55   :  { %2193 = vmatpush1.bf16.msra.mxu1 %v4411_v21 }
0x1a56   :  { %2194 = vmatprep.subr.bf16.mxu1 %v4424_v24 }
0x1a59   :  { %2195 = vmatpush1.bf16.msra.mxu1 %v4434_v26 }
0x1a5a   :  { %2500 = vmatprep.subr.bf16.mxu1 %v4378_v12 }
0x1b1f   :  { %v1910_v4 = vpop.f32.mrb[28].mxu1 }
0x1b20   :  { %v1918_v6 = vadd.f32 %v1910_v4, %v4476_v58  ;;  %v1912_v7 = vpop.f32.mrb[29].mxu1 }
0x1b21   :  { %v1949_v9 = vadd.f32 %v1912_v7, %v4499_v25  ;;  %v1914_v13 = vpop.f32.mrb[30].mxu1 }
0x1b22   :  { %3666 = vtanh.f32 %v1918_v6  ;;  %v1915_v15 = vpop.f32.mrb[31].mxu1  ;;  %v3262_v27 = vmul.f32 -1.442695, %v1918_v6 }
0x1b23   :  { %3668 = vtanh.f32 %v1949_v9  ;;  %v3263_v28 = vmul.f32 -1.442695, %v1949_v9 }
0x1b24   :  { %3670 = vpow2.f32 %v3262_v27 }
0x1b25   :  { %3672 = vpow2.f32 %v3263_v28 }
0x1b2c   :  { %v3667_v19 = vpop.eup %3666 }
0x1b2d   :  { %v3669_v23 = vpop.eup %3668  ;;  %1928 = vrot.lane.b32.xlu0 %v3667_v19, %s3910_s7 }
0x1b2e   :  { %1959 = vrot.lane.b32.xlu1 %v3669_v23, %s3910_s7  ;;  %v3671_v29 = vpop.eup %3670 }
0x1b2f   :  { %v3673_v0 = vpop.eup %3672  ;;  %v1922_v58 = vadd.f32 1.0, %v3671_v29 }
0x1b30   :  { %v1953_v30 = vadd.f32 1.0, %v3673_v0 }
0x1b31   :  { %3674 = vrcp.f32 %v1922_v58 }
0x1b32   :  { %3676 = vrcp.f32 %v1953_v30 }
0x1b3b   :  { %v3675_v25 = vpop.eup %3674 }
0x1b3c   :  { %v3677_v41 = vpop.eup %3676  ;;  %v1926_v45 = vmul.f32 %v3675_v25, %v1780_v34 }
0x1b3d   :  { %v1957_v47 = vmul.f32 %v3677_v41, %v1811_v38 }
0x1b9f   :  { %v1929_v40 = vpop.permute.xlu0 %1928 }
0x1ba0   :  { %v1931_v42 = vmul.f32 %v3675_v25, %v1929_v40  ;;  %v1960_v43 = vpop.permute.xlu1 %1959 }
0x1ba1   :  { %v1962_v44 = vmul.f32 %v3677_v41, %v1960_v43 }
0x1ba2   :  { %1933 = vrot.lane.b32.xlu0 %v1931_v42, %s3916_s2 }
0x1ba3   :  { %1964 = vrot.lane.b32.xlu1 %v1962_v44, %s3916_s2 }
0x1c14   :  { %v1934_v46 = vpop.permute.xlu0 %1933 }
0x1c15   :  { %v1936_v48 = vadd.f32 %v1934_v46, %v1926_v45  ;;  %v1965_v50 = vpop.permute.xlu1 %1964 }
0x1c16   :  { %v1967_v52 = vadd.f32 %v1965_v50, %v1957_v47 }
0x1c17   :  { %3678 = vtanh.f32 %v1936_v48 }
0x1c18   :  { %3680 = vtanh.f32 %v1967_v52 }
0x1c21   :  { %v3679_v33 = vpop.eup %3678 }
0x1c22   :  { %v3681_v54 = vpop.eup %3680  ;;  %1939 = vrot.lane.b32.xlu0 %v3679_v33, %s3910_s7 }
0x1c23   :  { %1970 = vrot.lane.b32.xlu1 %v3681_v54, %s3910_s7 }
0x1c94   :  { %v1940_v55 = vpop.permute.xlu0 %1939 }
0x1c95   :  { %v1942_v35 = vmul.f32 %v3675_v25, %v1940_v55  ;;  %v1971_v36 = vpop.permute.xlu1 %1970 }
0x1c96   :  { %v1973_v37 = vmul.f32 %v3677_v41, %v1971_v36 }
0x1c97   :  { %1944 = vrot.lane.b32.xlu0 %v1942_v35, %s3916_s2 }
0x1c98   :  { %1975 = vrot.lane.b32.xlu1 %v1973_v37, %s3910_s7 }
0x1d09   :  { %v1945_v34 = vpop.permute.xlu0 %1944 }
0x1d0a   :  { %1947 = vst.msk [vmem:[#allocation3 + $0x8] sm:$0xff] %vm221_vm1, %v1945_v34  ;;  %v1976_v38 = vpop.permute.xlu1 %1975 }
0x1d0b   :  { %1978 = vst.msk [vmem:[#allocation3 + $0x30] sm:$0xff] %vm419_vm2, %v1976_v38  ;;  %v1979_v39 = vsel %vm221_vm1, %v1945_v34, %v1976_v38 }
0x1d0c   :  { %v1980_v57 = vpack.c.bf16 %v1979_v39, %v1979_v39 }
0x1d0e   :  { %3272 = vmatmul.mubr.msk.bf16.vlgmr.msra.gmra.mrb[32].mxu0 %vm315_vm3, %v1980_v57 }
0x1d0f   :  { %2345 = vmatpush1.bf16.msra.mxu0 %v4373_v11  ;;  %2376 = vmatprep.mubr.bf16.mxu0 %v3915_v32 }
0x1d10   :  { %2346 = vmatprep.subr.bf16.mxu0 %v4393_v17 }
0x1d13   :  { %2347 = vmatpush1.bf16.msra.mxu0 %v4398_v18 }
0x1d14   :  { %2348 = vmatprep.subr.bf16.mxu0 %v4416_v22 }
0x1d17   :  { %2349 = vmatpush1.bf16.msra.mxu0 %v4411_v21 }
0x1d18   :  { %2350 = vmatprep.subr.bf16.mxu0 %v4424_v24 }
0x1d1b   :  { %2351 = vmatpush1.bf16.msra.mxu0 %v4434_v26 }
0x1d1c   :  { %2656 = vmatprep.subr.bf16.mxu0 %v4378_v12 }
0x1de1   :  { %v2066_v59 = vpop.f32.mrb[32].mxu0 }
0x1de2   :  { %v2074_v60 = vadd.f32 %v2066_v59, %v4480_v2  ;;  %v2068_v61 = vpop.f32.mrb[33].mxu0 }
0x1de3   :  { %v2105_v62 = vadd.f32 %v2068_v61, %v4495_v16  ;;  %v2070_v1 = vpop.f32.mrb[34].mxu0 }
0x1de4   :  { %3682 = vtanh.f32 %v2074_v60  ;;  %v2071_v51 = vpop.f32.mrb[35].mxu0  ;;  %v3273_v6 = vmul.f32 -1.442695, %v2074_v60 }
0x1de5   :  { %3684 = vtanh.f32 %v2105_v62  ;;  %v3274_v7 = vmul.f32 -1.442695, %v2105_v62 }
0x1de6   :  { %3686 = vpow2.f32 %v3273_v6 }
0x1de7   :  { %3688 = vpow2.f32 %v3274_v7 }
0x1dee   :  { %v3683_v49 = vpop.eup %3682 }
0x1def   :  { %v3685_v4 = vpop.eup %3684  ;;  %2084 = vrot.lane.b32.xlu0 %v3683_v49, %s3910_s7 }
0x1df0   :  { %2115 = vrot.lane.b32.xlu1 %v3685_v4, %s3910_s7  ;;  %v3687_v12 = vpop.eup %3686 }
0x1df1   :  { %v3689_v9 = vpop.eup %3688  ;;  %v2078_v2 = vadd.f32 1.0, %v3687_v12 }
0x1df2   :  { %v2109_v13 = vadd.f32 1.0, %v3689_v9 }
0x1df3   :  { %3690 = vrcp.f32 %v2078_v2 }
0x1df4   :  { %3692 = vrcp.f32 %v2109_v13 }
0x1dfd   :  { %v3691_v16 = vpop.eup %3690 }
0x1dfe   :  { %v3693_v19 = vpop.eup %3692  ;;  %v2082_v29 = vmul.f32 %v3691_v16, %v1936_v48 }
0x1dff   :  { %v2113_v58 = vmul.f32 %v3693_v19, %v1967_v52 }
0x1e61   :  { %v2085_v15 = vpop.permute.xlu0 %2084 }
0x1e62   :  { %v2087_v23 = vmul.f32 %v3691_v16, %v2085_v15  ;;  %v2116_v27 = vpop.permute.xlu1 %2115 }
0x1e63   :  { %v2118_v28 = vmul.f32 %v3693_v19, %v2116_v27 }
0x1e64   :  { %2089 = vrot.lane.b32.xlu0 %v2087_v23, %s3916_s2 }
0x1e65   :  { %2120 = vrot.lane.b32.xlu1 %v2118_v28, %s3916_s2 }
0x1ed6   :  { %v2090_v0 = vpop.permute.xlu0 %2089 }
0x1ed7   :  { %v2092_v30 = vadd.f32 %v2090_v0, %v2082_v29  ;;  %v2121_v25 = vpop.permute.xlu1 %2120 }
0x1ed8   :  { %v2123_v40 = vadd.f32 %v2121_v25, %v2113_v58 }
0x1ed9   :  { %3694 = vtanh.f32 %v2092_v30 }
0x1eda   :  { %3696 = vtanh.f32 %v2123_v40 }
0x1ee3   :  { %v3695_v41 = vpop.eup %3694 }
0x1ee4   :  { %v3697_v42 = vpop.eup %3696  ;;  %2095 = vrot.lane.b32.xlu0 %v3695_v41, %s3910_s7 }
0x1ee5   :  { %2126 = vrot.lane.b32.xlu1 %v3697_v42, %s3910_s7 }
0x1f56   :  { %v2096_v43 = vpop.permute.xlu0 %2095 }
0x1f57   :  { %v2098_v44 = vmul.f32 %v3691_v16, %v2096_v43  ;;  %v2127_v45 = vpop.permute.xlu1 %2126 }
0x1f58   :  { %v2129_v46 = vmul.f32 %v3693_v19, %v2127_v45 }
0x1f59   :  { %2100 = vrot.lane.b32.xlu0 %v2098_v44, %s3916_s2 }
0x1f5a   :  { %2131 = vrot.lane.b32.xlu1 %v2129_v46, %s3910_s7 }
0x1fcb   :  { %v2101_v47 = vpop.permute.xlu0 %2100 }
0x1fcc   :  { %2103 = vst.msk [vmem:[#allocation3 + $0x10] sm:$0xff] %vm221_vm1, %v2101_v47  ;;  %v2132_v48 = vpop.permute.xlu1 %2131 }
0x1fcd   :  { %2134 = vst.msk [vmem:[#allocation3 + $0x28] sm:$0xff] %vm419_vm2, %v2132_v48  ;;  %v2135_v50 = vsel %vm221_vm1, %v2101_v47, %v2132_v48 }
0x1fce   :  { %v2136_v52 = vpack.c.bf16 %v2135_v50, %v2135_v50 }
0x1fd0   :  { %3283 = vmatmul.mubr.msk.bf16.vlgmr.msra.gmra.mrb[32].mxu1 %vm315_vm3, %v2136_v52 }
0x1fd1   :  { %2501 = vmatpush1.bf16.msra.mxu1 %v4373_v11  ;;  %2532 = vmatprep.mubr.bf16.mxu1 %v3915_v32 }
0x1fd2   :  { %2502 = vmatprep.subr.bf16.mxu1 %v4393_v17 }
0x1fd5   :  { %2503 = vmatpush1.bf16.msra.mxu1 %v4398_v18 }
0x1fd6   :  { %2504 = vmatprep.subr.bf16.mxu1 %v4416_v22 }
0x1fd9   :  { %2505 = vmatpush1.bf16.msra.mxu1 %v4411_v21 }
0x1fda   :  { %2506 = vmatprep.subr.bf16.mxu1 %v4424_v24 }
0x1fdd   :  { %2507 = vmatpush1.bf16.msra.mxu1 %v4434_v26 }
0x20a3   :  { %v2222_v33 = vpop.f32.mrb[32].mxu1 }
0x20a4   :  { %v2230_v54 = vadd.f32 %v2222_v33, %v4484_v53  ;;  %v2224_v55 = vpop.f32.mrb[33].mxu1 }
0x20a5   :  { %v2261_v35 = vadd.f32 %v2224_v55, %v4491_v10  ;;  %v2226_v36 = vpop.f32.mrb[34].mxu1 }
0x20a6   :  { %3698 = vtanh.f32 %v2230_v54  ;;  %v2227_v37 = vpop.f32.mrb[35].mxu1  ;;  %v3284_v39 = vmul.f32 -1.442695, %v2230_v54 }
0x20a7   :  { %3700 = vtanh.f32 %v2261_v35  ;;  %v3285_v57 = vmul.f32 -1.442695, %v2261_v35 }
0x20a8   :  { %3702 = vpow2.f32 %v3284_v39 }
0x20a9   :  { %3704 = vpow2.f32 %v3285_v57 }
0x20b0   :  { %v3699_v34 = vpop.eup %3698 }
0x20b1   :  { %v3701_v38 = vpop.eup %3700  ;;  %2240 = vrot.lane.b32.xlu0 %v3699_v34, %s3910_s7 }
0x20b2   :  { %2271 = vrot.lane.b32.xlu1 %v3701_v38, %s3910_s7  ;;  %v3703_v59 = vpop.eup %3702 }
0x20b3   :  { %v3705_v60 = vpop.eup %3704  ;;  %v2234_v53 = vadd.f32 1.0, %v3703_v59 }
0x20b4   :  { %v2265_v61 = vadd.f32 1.0, %v3705_v60 }
0x20b5   :  { %3706 = vrcp.f32 %v2234_v53 }
0x20b6   :  { %3708 = vrcp.f32 %v2265_v61 }
0x20bf   :  { %v3707_v10 = vpop.eup %3706 }
0x20c0   :  { %v3709_v1 = vpop.eup %3708  ;;  %v2238_v6 = vmul.f32 %v3707_v10, %v2092_v30 }
0x20c1   :  { %v2269_v12 = vmul.f32 %v3709_v1, %v2123_v40 }
0x2123   :  { %v2241_v62 = vpop.permute.xlu0 %2240 }
0x2124   :  { %v2243_v51 = vmul.f32 %v3707_v10, %v2241_v62  ;;  %v2272_v49 = vpop.permute.xlu1 %2271 }
0x2125   :  { %v2274_v4 = vmul.f32 %v3709_v1, %v2272_v49 }
0x2126   :  { %2245 = vrot.lane.b32.xlu0 %v2243_v51, %s3916_s2 }
0x2127   :  { %2276 = vrot.lane.b32.xlu1 %v2274_v4, %s3916_s2 }
0x2198   :  { %v2246_v7 = vpop.permute.xlu0 %2245 }
0x2199   :  { %v2248_v9 = vadd.f32 %v2246_v7, %v2238_v6  ;;  %v2277_v2 = vpop.permute.xlu1 %2276 }
0x219a   :  { %v2279_v13 = vadd.f32 %v2277_v2, %v2269_v12 }
0x219b   :  { %3710 = vtanh.f32 %v2248_v9 }
0x219c   :  { %3712 = vtanh.f32 %v2279_v13 }
0x21a5   :  { %v3711_v16 = vpop.eup %3710 }
0x21a6   :  { %v3713_v15 = vpop.eup %3712  ;;  %2251 = vrot.lane.b32.xlu0 %v3711_v16, %s3910_s7 }
0x21a7   :  { %2282 = vrot.lane.b32.xlu1 %v3713_v15, %s3910_s7 }
0x2218   :  { %v2252_v19 = vpop.permute.xlu0 %2251 }
0x2219   :  { %v2254_v23 = vmul.f32 %v3707_v10, %v2252_v19  ;;  %v2283_v27 = vpop.permute.xlu1 %2282 }
0x221a   :  { %v2285_v28 = vmul.f32 %v3709_v1, %v2283_v27 }
0x221b   :  { %2256 = vrot.lane.b32.xlu0 %v2254_v23, %s3916_s2 }
0x221c   :  { %2287 = vrot.lane.b32.xlu1 %v2285_v28, %s3910_s7 }
0x228d   :  { %v2257_v29 = vpop.permute.xlu0 %2256 }
0x228e   :  { %2259 = vst.msk [vmem:[#allocation3 + $0x18] sm:$0xff] %vm221_vm1, %v2257_v29  ;;  %v2288_v0 = vpop.permute.xlu1 %2287 }
0x228f   :  { %2290 = vst.msk [vmem:[#allocation3 + $0x20] sm:$0xff] %vm419_vm2, %v2288_v0  ;;  %v2291_v58 = vsel %vm221_vm1, %v2257_v29, %v2288_v0 }
0x2290   :  { %v2292_v30 = vpack.c.bf16 %v2291_v58, %v2291_v58 }
0x2292   :  { %3294 = vmatmul.mubr.msk.bf16.vlgmr.msra.gmra.mrb[36].mxu0 %vm315_vm3, %v2292_v30 }
0x2293   :  { %2657 = vmatpush1.bf16.msra.mxu0 %v4373_v11  ;;  %2688 = vmatprep.mubr.bf16.mxu0 %v3915_v32 }
0x2294   :  { %2658 = vmatprep.subr.bf16.mxu0 %v4393_v17 }
0x2297   :  { %2659 = vmatpush1.bf16.msra.mxu0 %v4398_v18 }
0x2298   :  { %2660 = vmatprep.subr.bf16.mxu0 %v4416_v22 }
0x229b   :  { %2661 = vmatpush1.bf16.msra.mxu0 %v4411_v21 }
0x229c   :  { %2662 = vmatprep.subr.bf16.mxu0 %v4424_v24 }
0x229f   :  { %2663 = vmatpush1.bf16.msra.mxu0 %v4434_v26 }
0x2365   :  { %v2378_v25 = vpop.f32.mrb[36].mxu0 }
0x2366   :  { %v2386_v40 = vadd.f32 %v2378_v25, %v4489_v8  ;;  %v2380_v41 = vpop.f32.mrb[37].mxu0 }
0x2367   :  { %v2417_v11 = vadd.f32 %v2380_v41, %v4486_v5  ;;  %v2382_v42 = vpop.f32.mrb[38].mxu0 }
0x2368   :  { %3714 = vtanh.f32 %v2386_v40  ;;  %v2383_v43 = vpop.f32.mrb[39].mxu0  ;;  %v3295_v21 = vmul.f32 -1.442695, %v2386_v40 }
0x2369   :  { %3716 = vtanh.f32 %v2417_v11  ;;  %v3296_v22 = vmul.f32 -1.442695, %v2417_v11 }
0x236a   :  { %3718 = vpow2.f32 %v3295_v21 }
0x236b   :  { %3720 = vpow2.f32 %v3296_v22 }
0x2372   :  { %v3715_v17 = vpop.eup %3714 }
0x2373   :  { %v3717_v18 = vpop.eup %3716  ;;  %2396 = vrot.lane.b32.xlu0 %v3715_v17, %s3910_s7 }
0x2374   :  { %2427 = vrot.lane.b32.xlu1 %v3717_v18, %s3910_s7  ;;  %v3719_v24 = vpop.eup %3718 }
0x2375   :  { %v3721_v26 = vpop.eup %3720  ;;  %v2390_v8 = vadd.f32 1.0, %v3719_v24 }
0x2376   :  { %v2421_v44 = vadd.f32 1.0, %v3721_v26 }
0x2377   :  { %3722 = vrcp.f32 %v2390_v8 }
0x2378   :  { %3724 = vrcp.f32 %v2421_v44 }
0x2381   :  { %v3723_v5 = vpop.eup %3722 }
0x2382   :  { %v3725_v46 = vpop.eup %3724  ;;  %v2394_v52 = vmul.f32 %v3723_v5, %v2248_v9 }
0x2383   :  { %v2425_v54 = vmul.f32 %v3725_v46, %v2279_v13 }
0x23e5   :  { %v2397_v45 = vpop.permute.xlu0 %2396 }
0x23e6   :  { %v2399_v47 = vmul.f32 %v3723_v5, %v2397_v45  ;;  %v2428_v48 = vpop.permute.xlu1 %2427 }
0x23e7   :  { %v2430_v50 = vmul.f32 %v3725_v46, %v2428_v48 }
0x23e8   :  { %2401 = vrot.lane.b32.xlu0 %v2399_v47, %s3916_s2 }
0x23e9   :  { %2432 = vrot.lane.b32.xlu1 %v2430_v50, %s3916_s2 }
0x245a   :  { %v2402_v33 = vpop.permute.xlu0 %2401 }
0x245b   :  { %v2404_v55 = vadd.f32 %v2402_v33, %v2394_v52  ;;  %v2433_v35 = vpop.permute.xlu1 %2432 }
0x245c   :  { %v2435_v36 = vadd.f32 %v2433_v35, %v2425_v54 }
0x245d   :  { %3726 = vtanh.f32 %v2404_v55 }
0x245e   :  { %3728 = vtanh.f32 %v2435_v36 }
0x2467   :  { %v3727_v37 = vpop.eup %3726 }
0x2468   :  { %v3729_v34 = vpop.eup %3728  ;;  %2407 = vrot.lane.b32.xlu0 %v3727_v37, %s3910_s7 }
0x2469   :  { %2438 = vrot.lane.b32.xlu1 %v3729_v34, %s3910_s7 }
0x24da   :  { %v2408_v38 = vpop.permute.xlu0 %2407 }
0x24db   :  { %v2410_v39 = vmul.f32 %v3723_v5, %v2408_v38  ;;  %v2439_v57 = vpop.permute.xlu1 %2438 }
0x24dc   :  { %v2441_v59 = vmul.f32 %v3725_v46, %v2439_v57 }
0x24dd   :  { %2412 = vrot.lane.b32.xlu0 %v2410_v39, %s3916_s2 }
0x24de   :  { %2443 = vrot.lane.b32.xlu1 %v2441_v59, %s3910_s7 }
0x254f   :  { %v2413_v60 = vpop.permute.xlu0 %2412 }
0x2550   :  { %2415 = vst.msk [vmem:[#allocation3 + $0x20] sm:$0xff] %vm221_vm1, %v2413_v60  ;;  %v2444_v53 = vpop.permute.xlu1 %2443 }
0x2551   :  { %2446 = vst.msk [vmem:[#allocation3 + $0x18] sm:$0xff] %vm419_vm2, %v2444_v53  ;;  %v2447_v61 = vsel %vm221_vm1, %v2413_v60, %v2444_v53 }
0x2552   :  { %v2448_v10 = vpack.c.bf16 %v2447_v61, %v2447_v61 }
0x2554   :  { %3305 = vmatmul.mubr.msk.bf16.vlgmr.msra.gmra.mrb[36].mxu1 %vm315_vm3, %v2448_v10 }
0x2555   :  { %2844 = vmatprep.mubr.bf16.mxu1 %v3915_v32 }
0x2627   :  { %v2534_v62 = vpop.f32.mrb[36].mxu1 }
0x2628   :  { %v2542_v1 = vadd.f32 %v2534_v62, %v4493_v14  ;;  %v2536_v51 = vpop.f32.mrb[37].mxu1  ;;  %v3506_v62 = vld [vmem:[%s4748_s8] ss:$8 sps:$4 sm:$0xff]  }
0x2629   :  { %v2573_v49 = vadd.f32 %v2536_v51, %v4482_v3  ;;  %v2538_v4 = vpop.f32.mrb[38].mxu1  ;;  %v3511_v51 = vld [vmem:[%s4748_s8 + $0x14] ss:$8 sps:$4 sm:$0xff]  }
0x262a   :  { %3730 = vtanh.f32 %v2542_v1  ;;  %v2539_v6 = vpop.f32.mrb[39].mxu1  ;;  %v3306_v9 = vmul.f32 -1.442695, %v2542_v1  ;;  %v3508_v1 = vld [vmem:[%s4748_s8 + $0x4] ss:$8 sps:$4 sm:$0xff]  }
0x262b   :  { %3732 = vtanh.f32 %v2573_v49  ;;  %v3307_v2 = vmul.f32 -1.442695, %v2573_v49  ;;  %2812 = vmatprep.subr.bf16.mxu1 %v3508_v1  ;;  %v3509_v49 = vld [vmem:[%s4748_s8 + $0x10] ss:$8 sps:$4 sm:$0xff]   ;;  %v3514_v4 = vld [vmem:[%s4748_s8 + $0x24] ss:$8 sps:$4 sm:$0xff]  }
0x262c   :  { %3734 = vpow2.f32 %v3306_v9  ;;  %2813 = vmatpush1.bf16.msra.mxu1 %v3506_v62  ;;  %v3512_v6 = vld [vmem:[%s4748_s8 + $0x20] ss:$8 sps:$4 sm:$0xff]   ;;  %v3517_v9 = vld [vmem:[%s4748_s8 + $0x34] ss:$8 sps:$4 sm:$0xff]  }
0x262d   :  { %3736 = vpow2.f32 %v3307_v2  ;;  %2814 = vmatprep.subr.bf16.mxu1 %v3511_v51  ;;  %v3515_v2 = vld [vmem:[%s4748_s8 + $0x30] ss:$8 sps:$4 sm:$0xff]  }
0x2630   :  { %2815 = vmatpush1.bf16.msra.mxu1 %v3509_v49 }
0x2631   :  { %2816 = vmatprep.subr.bf16.mxu1 %v3514_v4  ;;  %v3330_v4 = vld [vmem:[%s4750_s10] ss:$0 sm:$0xff] }
0x2634   :  { %v3731_v7 = vpop.eup %3730  ;;  %2817 = vmatpush1.bf16.msra.mxu1 %v3512_v6 }
0x2635   :  { %v3733_v12 = vpop.eup %3732  ;;  %2552 = vrot.lane.b32.xlu0 %v3731_v7, %s3910_s7  ;;  %2818 = vmatprep.subr.bf16.mxu1 %v3517_v9 }
0x2636   :  { %2583 = vrot.lane.b32.xlu1 %v3733_v12, %s3910_s7  ;;  %v3735_v32 = vpop.eup %3734 }
0x2637   :  { %v3737_v13 = vpop.eup %3736  ;;  %v2546_v14 = vadd.f32 1.0, %v3735_v32 }
0x2638   :  { %v2577_v16 = vadd.f32 1.0, %v3737_v13  ;;  %2819 = vmatpush1.bf16.msra.mxu1 %v3515_v2 }
0x2639   :  { %3738 = vrcp.f32 %v2546_v14 }
0x263a   :  { %3740 = vrcp.f32 %v2577_v16 }
0x2643   :  { %v3739_v3 = vpop.eup %3738 }
0x2644   :  { %v3741_v19 = vpop.eup %3740  ;;  %v2550_v29 = vmul.f32 %v3739_v3, %v2404_v55 }
0x2645   :  { %v2581_v58 = vmul.f32 %v3741_v19, %v2435_v36 }
0x26a7   :  { %v2553_v15 = vpop.permute.xlu0 %2552 }
0x26a8   :  { %v2555_v23 = vmul.f32 %v3739_v3, %v2553_v15  ;;  %v2584_v27 = vpop.permute.xlu1 %2583 }
0x26a9   :  { %v2586_v28 = vmul.f32 %v3741_v19, %v2584_v27 }
0x26aa   :  { %2557 = vrot.lane.b32.xlu0 %v2555_v23, %s3916_s2 }
0x26ab   :  { %2588 = vrot.lane.b32.xlu1 %v2586_v28, %s3916_s2 }
0x271c   :  { %v2558_v0 = vpop.permute.xlu0 %2557 }
0x271d   :  { %v2560_v30 = vadd.f32 %v2558_v0, %v2550_v29  ;;  %v2589_v25 = vpop.permute.xlu1 %2588 }
0x271e   :  { %v2591_v40 = vadd.f32 %v2589_v25, %v2581_v58 }
0x271f   :  { %3742 = vtanh.f32 %v2560_v30 }
0x2720   :  { %3744 = vtanh.f32 %v2591_v40 }
0x2729   :  { %v3743_v41 = vpop.eup %3742 }
0x272a   :  { %v3745_v11 = vpop.eup %3744  ;;  %2563 = vrot.lane.b32.xlu0 %v3743_v41, %s3910_s7 }
0x272b   :  { %2594 = vrot.lane.b32.xlu1 %v3745_v11, %s3910_s7 }
0x279c   :  { %v2564_v42 = vpop.permute.xlu0 %2563 }
0x279d   :  { %v2566_v43 = vmul.f32 %v3739_v3, %v2564_v42  ;;  %v2595_v17 = vpop.permute.xlu1 %2594 }
0x279e   :  { %v2597_v18 = vmul.f32 %v3741_v19, %v2595_v17 }
0x279f   :  { %2568 = vrot.lane.b32.xlu0 %v2566_v43, %s3916_s2 }
0x27a0   :  { %2599 = vrot.lane.b32.xlu1 %v2597_v18, %s3910_s7 }
0x2811   :  { %v2569_v21 = vpop.permute.xlu0 %2568 }
0x2812   :  { %2571 = vst.msk [vmem:[#allocation3 + $0x28] sm:$0xff] %vm221_vm1, %v2569_v21  ;;  %v2600_v22 = vpop.permute.xlu1 %2599 }
0x2813   :  { %2602 = vst.msk [vmem:[#allocation3 + $0x10] sm:$0xff] %vm419_vm2, %v2600_v22  ;;  %v2603_v24 = vsel %vm221_vm1, %v2569_v21, %v2600_v22 }
0x2814   :  { %v2604_v26 = vpack.c.bf16 %v2603_v24, %v2603_v24 }
0x2816   :  { %3316 = vmatmul.mubr.msk.bf16.vlgmr.msra.gmra.mrb[40].mxu0 %vm315_vm3, %v2604_v26 }
0x28e9   :  { %v2690_v8 = vpop.f32.mrb[40].mxu0 }
0x28ea   :  { %v2698_v44 = vadd.f32 %v2690_v8, %v4497_v20  ;;  %v2692_v5 = vpop.f32.mrb[41].mxu0 }
0x28eb   :  { %v2729_v45 = vadd.f32 %v2692_v5, %v4478_v63  ;;  %v2694_v46 = vpop.f32.mrb[42].mxu0 }
0x28ec   :  { %3746 = vtanh.f32 %v2698_v44  ;;  %v2695_v47 = vpop.f32.mrb[43].mxu0  ;;  %v3317_v52 = vmul.f32 -1.442695, %v2698_v44 }
0x28ed   :  { %3748 = vtanh.f32 %v2729_v45  ;;  %v3318_v33 = vmul.f32 -1.442695, %v2729_v45 }
0x28ee   :  { %3750 = vpow2.f32 %v3317_v52 }
0x28ef   :  { %3752 = vpow2.f32 %v3318_v33  ;;  %v3519_v33 = vld [vmem:[#allocation10 + $0x8] sm:$0xff]  }
0x28f6   :  { %v3747_v48 = vpop.eup %3746 }
0x28f7   :  { %v3749_v50 = vpop.eup %3748  ;;  %2708 = vrot.lane.b32.xlu0 %v3747_v48, %s3910_s7  ;;  %v3518_v48 = vld [vmem:[#allocation10] sm:$0xff]  }
0x28f8   :  { %2739 = vrot.lane.b32.xlu1 %v3749_v50, %s3910_s7  ;;  %v3751_v54 = vpop.eup %3750  ;;  %3399 = vmatprep.subr.bf16.mxu0 %v3518_v48 }
0x28f9   :  { %v3753_v55 = vpop.eup %3752  ;;  %v2702_v20 = vadd.f32 1.0, %v3751_v54  ;;  %3400 = vmatpush3.bf16.msra.mxu0 %v3518_v48  ;;  %v3520_v54 = vld [vmem:[#allocation10 + $0x10] sm:$0xff]  }
0x28fa   :  { %v2733_v35 = vadd.f32 1.0, %v3753_v55  ;;  %3401 = vmatprep.subr.bf16.mxu0 %v3519_v33  ;;  %v3521_v55 = vld [vmem:[#allocation10 + $0x18] sm:$0xff]  }
0x28fb   :  { %3754 = vrcp.f32 %v2702_v20 }
0x28fc   :  { %3756 = vrcp.f32 %v2733_v35 }
0x28fd   :  { %3402 = vmatpush3.bf16.msra.mxu0 %v3519_v33 }
0x28fe   :  { %3403 = vmatprep.subr.bf16.mxu0 %v3520_v54 }
0x2901   :  { %3404 = vmatpush3.bf16.msra.mxu0 %v3520_v54 }
0x2902   :  { %3405 = vmatprep.subr.bf16.mxu0 %v3521_v55 }
0x2905   :  { %v3755_v63 = vpop.eup %3754  ;;  %3406 = vmatpush3.bf16.msra.mxu0 %v3521_v55 }
0x2906   :  { %v3757_v37 = vpop.eup %3756  ;;  %v2706_v57 = vmul.f32 %v3755_v63, %v2560_v30 }
0x2907   :  { %v2737_v60 = vmul.f32 %v3757_v37, %v2591_v40 }
0x2969   :  { %v2709_v36 = vpop.permute.xlu0 %2708 }
0x296a   :  { %v2711_v34 = vmul.f32 %v3755_v63, %v2709_v36  ;;  %v2740_v38 = vpop.permute.xlu1 %2739 }
0x296b   :  { %v2742_v39 = vmul.f32 %v3757_v37, %v2740_v38  ;;  %v2917_v38 = vld [vmem:[#allocation3 + $0x10] sm:$0xff] }
0x296c   :  { %2713 = vrot.lane.b32.xlu0 %v2711_v34, %s3916_s2 }
0x296d   :  { %2744 = vrot.lane.b32.xlu1 %v2742_v39, %s3916_s2 }
0x29de   :  { %v2714_v59 = vpop.permute.xlu0 %2713 }
0x29df   :  { %v4625_v53 = vadd.f32 %v2714_v59, %v2706_v57  ;;  %v2745_v61 = vpop.permute.xlu1 %2744  ;;  %v2920_v59 = vld [vmem:[#allocation3 + $0x28] sm:$0xff] }
0x29e0   :  { %v4627_v10 = vadd.f32 %v2745_v61, %v2737_v60 }
0x29e1   :  { %3758 = vtanh.f32 %v4625_v53 }
0x29e2   :  { %3760 = vtanh.f32 %v4627_v10 }
0x29eb   :  { %v3759_v7 = vpop.eup %3758 }
0x29ec   :  { %v3761_v12 = vpop.eup %3760  ;;  %2719 = vrot.lane.b32.xlu0 %v3759_v7, %s3910_s7 }
0x29ed   :  { %2750 = vrot.lane.b32.xlu1 %v3761_v12, %s3910_s7 }
0x2a5e   :  { %v2720_v32 = vpop.permute.xlu0 %2719 }
0x2a5f   :  { %v2722_v13 = vmul.f32 %v3755_v63, %v2720_v32  ;;  %v2751_v14 = vpop.permute.xlu1 %2750 }
0x2a60   :  { %v2753_v16 = vmul.f32 %v3757_v37, %v2751_v14 }
0x2a61   :  { %2724 = vrot.lane.b32.xlu0 %v2722_v13, %s3916_s2 }
0x2a62   :  { %2755 = vrot.lane.b32.xlu1 %v2753_v16, %s3910_s7 }
0x2ad3   :  { %v2725_v3 = vpop.permute.xlu0 %2724 }
0x2ad4   :  { %2727 = vst.msk [vmem:[#allocation3 + $0x30] sm:$0xff] %vm221_vm1, %v2725_v3  ;;  %v2756_v15 = vpop.permute.xlu1 %2755 }
0x2ad5   :  { %2758 = vst.msk [vmem:[#allocation3 + $0x8] sm:$0xff] %vm419_vm2, %v2756_v15  ;;  %v2759_v19 = vsel %vm221_vm1, %v2725_v3, %v2756_v15 }
0x2ad6   :  { %v2760_v23 = vpack.c.bf16 %v2759_v19, %v2759_v19 }
0x2ad8   :  { %3327 = vmatmul.mubr.msk.bf16.vlgmr.msra.gmra.mrb[40].mxu1 %vm315_vm3, %v2760_v23 }
0x2adb   :  { %v2921_v51 = vld [vmem:[#allocation3 + $0x30] sm:$0xff] }
0x2adc   :  { %v2916_v57 = vld [vmem:[#allocation3 + $0x8] sm:$0xff] }
0x2bab   :  { %v2846_v27 = vpop.f32.mrb[40].mxu1 }
0x2bac   :  { %v2854_v28 = vadd.f32 %v2846_v27, %v4501_v31  ;;  %v2848_v29 = vpop.f32.mrb[41].mxu1 }
0x2bad   :  { %v2885_v0 = vadd.f32 %v2848_v29, %v4474_v56  ;;  %v2850_v58 = vpop.f32.mrb[42].mxu1 }
0x2bae   :  { %3762 = vtanh.f32 %v2854_v28  ;;  %v2851_v30 = vpop.f32.mrb[43].mxu1  ;;  %v3328_v41 = vmul.f32 -1.442695, %v2854_v28 }
0x2baf   :  { %3764 = vtanh.f32 %v2885_v0  ;;  %v3329_v11 = vmul.f32 -1.442695, %v2885_v0 }
0x2bb0   :  { %3766 = vpow2.f32 %v3328_v41 }
0x2bb1   :  { %3768 = vpow2.f32 %v3329_v11 }
0x2bb8   :  { %v3763_v25 = vpop.eup %3762 }
0x2bb9   :  { %v3765_v40 = vpop.eup %3764  ;;  %2864 = vrot.lane.b32.xlu1 %v3763_v25, %s3910_s7 }
0x2bba   :  { %2895 = vrot.lane.b32.xlu0 %v3765_v40, %s3910_s7  ;;  %v3767_v42 = vpop.eup %3766 }
0x2bbb   :  { %v3769_v43 = vpop.eup %3768  ;;  %v2858_v31 = vadd.f32 1.0, %v3767_v42 }
0x2bbc   :  { %v2889_v17 = vadd.f32 1.0, %v3769_v43 }
0x2bbd   :  { %3770 = vrcp.f32 %v2858_v31 }
0x2bbe   :  { %3772 = vrcp.f32 %v2889_v17 }
0x2bc7   :  { %v3771_v56 = vpop.eup %3770 }
0x2bc8   :  { %v3773_v21 = vpop.eup %3772  ;;  %v2862_v8 = vmul.f32 %v3771_v56, %v4625_v53  ;;  %v2918_v53 = vld [vmem:[#allocation3 + $0x18] sm:$0xff] }
0x2bc9   :  { %v2893_v5 = vmul.f32 %v3773_v21, %v4627_v10  ;;  %v2924_v61 = vpack.c.bf16 %v2918_v53, %v2917_v38  ;;  %v2919_v10 = vld [vmem:[#allocation3 + $0x20] sm:$0xff] }
0x2bca   :  { %v2925_v62 = vpack.c.bf16 %v2920_v59, %v2919_v10 }
0x2c2b   :  { %v2865_v18 = vpop.permute.xlu1 %2864 }
0x2c2c   :  { %v2867_v22 = vmul.f32 %v3771_v56, %v2865_v18  ;;  %v2896_v24 = vpop.permute.xlu0 %2895 }
0x2c2d   :  { %v2898_v26 = vmul.f32 %v3773_v21, %v2896_v24 }
0x2c2e   :  { %2869 = vrot.lane.b32.xlu1 %v2867_v22, %s3916_s2 }
0x2c2f   :  { %2900 = vrot.lane.b32.xlu0 %v2898_v26, %s3916_s2 }
0x2ca0   :  { %v2870_v44 = vpop.permute.xlu1 %2869 }
0x2ca1   :  { %v2872_v45 = vadd.f32 %v2870_v44, %v2862_v8  ;;  %v2901_v46 = vpop.permute.xlu0 %2900 }
0x2ca2   :  { %v2903_v47 = vadd.f32 %v2901_v46, %v2893_v5 }
0x2ca3   :  { %3774 = vtanh.f32 %v2872_v45 }
0x2ca4   :  { %3776 = vtanh.f32 %v2903_v47 }
0x2cad   :  { %v3775_v50 = vpop.eup %3774 }
0x2cae   :  { %v3777_v52 = vpop.eup %3776  ;;  %2875 = vrot.lane.b32.xlu1 %v3775_v50, %s3910_s7 }
0x2caf   :  { %2906 = vrot.lane.b32.xlu0 %v3777_v52, %s3910_s7 }
0x2d20   :  { %v2876_v20 = vpop.permute.xlu1 %2875 }
0x2d21   :  { %v2878_v35 = vmul.f32 %v3771_v56, %v2876_v20  ;;  %v2907_v63 = vpop.permute.xlu0 %2906 }
0x2d22   :  { %v2909_v36 = vmul.f32 %v3773_v21, %v2907_v63 }
0x2d23   :  { %2880 = vrot.lane.b32.xlu1 %v2878_v35, %s3916_s2 }
0x2d24   :  { %2911 = vrot.lane.b32.xlu0 %v2909_v36, %s3910_s7 }
0x2d95   :  { %v2881_v37 = vpop.permute.xlu1 %2880 }
0x2d96   :  { %2883 = vst.msk [vmem:[#allocation3 + $0x38] sm:$0xff] %vm221_vm1, %v2881_v37  ;;  %v2912_v34 = vpop.permute.xlu0 %2911 }
0x2d97   :  { %2914 = vst.msk [vmem:[#allocation3] sm:$0xff] %vm419_vm2, %v2912_v34 }
0x2d9d   :  { %v2922_v1 = vld [vmem:[#allocation3 + $0x38] sm:$0xff] }
0x2d9e   :  { %v2915_v39 = vld [vmem:[#allocation3] sm:$0xff]  ;;  %v2926_v49 = vpack.c.bf16 %v2922_v1, %v2921_v51 }
0x2d9f   :  { %v2923_v60 = vpack.c.bf16 %v2916_v57, %v2915_v39 }
0x2da1   :  { %3407 = vmatprep.mubr.msk.bf16.mxu0 %vm315_vm3, %v2923_v60 }
0x2da2   :  { %3408 = vmatmul.mubr.msk.bf16.vlgmr.msra.gmra.mrb[44].mxu0 %vm315_vm3, %v2924_v61 }
0x2da3   :  { %3411 = vmatprep.mubr.msk.bf16.mxu0 %vm315_vm3, %v2925_v62 }
0x2daa   :  { %3412 = vmatmul.mubr.msk.bf16.gmra.mrb[48].mxu0 %vm315_vm3, %v2926_v49 }
0x2e75   :  { %v3409_v6 = vpop.f32.mrb[44].mxu0 }
0x2e76   :  { %v3021_v7 = vadd.f32 %v3409_v6, %v3330_v4  ;;  %v3012_v12 = vpop.f32.mrb[45].mxu0 }
0x2e77   :  { %v3410_v9 = vpop.f32.mrb[46].mxu0  ;;  %v3013_v13 = vadd.f32 %v3330_v4, %v3012_v12 }
0x2e78   :  { %3047 = vmax.xlane.f32.xlu0 %v3021_v7  ;;  %v3015_v2 = vpop.f32.mrb[47].mxu0  ;;  %v3024_v16 = vadd.f32 %v3410_v9, %v3330_v4 }
0x2e79   :  { %v3016_v32 = vadd.f32 %v3330_v4, %v3015_v2 }
0x2e7b   :  { %3045 = vmax.xlane.f32.xlu1 %v3016_v32 }
0x2e7c   :  { %3043 = vmax.xlane.f32.xlu0 %v3013_v13 }
0x2e7d   :  { %v3413_v14 = vpop.f32.mrb[48].mxu0 }
0x2e7e   :  { %v3028_v3 = vpop.f32.mrb[49].mxu0  ;;  %v3037_v28 = vadd.f32 %v3413_v14, %v3330_v4 }
0x2e7f   :  { %v3029_v15 = vadd.f32 %v3330_v4, %v3028_v3  ;;  %v3414_v19 = vpop.f32.mrb[50].mxu0 }
0x2e80   :  { %v3031_v23 = vpop.f32.mrb[51].mxu0  ;;  %3049 = vmax.xlane.f32.xlu0 %v3024_v16  ;;  %v3040_v29 = vadd.f32 %v3414_v19, %v3330_v4 }
0x2e81   :  { %v3032_v27 = vadd.f32 %v3330_v4, %v3031_v23  ;;  %3051 = vmax.xlane.f32.xlu1 %v3029_v15 }
0x2e84   :  { %3053 = vmax.xlane.f32.xlu0 %v3032_v27 }
0x2e85   :  { %3055 = vmax.xlane.f32.xlu1 %v3037_v28 }
0x2e88   :  { %3057 = vmax.xlane.f32.xlu0 %v3040_v29 }
0x2f05   :  { %v3048_v0 = vpop.xlane.xlu0 %3047 }
0x2f06   :  { %v4684_v58 = vsub.f32 %v3021_v7, %v3048_v0 }
0x2f08   :  { %v3071_v30 = vmul.f32 1.442695, %v4684_v58  ;;  %v3046_v40 = vpop.xlane.xlu1 %3045 }
0x2f09   :  { %v3044_v25 = vpop.xlane.xlu0 %3043  ;;  %v4690_v43 = vsub.f32 %v3016_v32, %v3046_v40 }
0x2f0a   :  { %3778 = vpow2.f32 %v3071_v30  ;;  %v4687_v41 = vsub.f32 %v3013_v13, %v3044_v25 }
0x2f0b   :  { %v3069_v24 = vmul.f32 1.442695, %v4690_v43 }
0x2f0c   :  { %v3067_v11 = vmul.f32 1.442695, %v4687_v41 }
0x2f0d   :  { %v3050_v42 = vpop.xlane.xlu0 %3049 }
0x2f0e   :  { %3780 = vpow2.f32 %v3067_v11  ;;  %v4692_v31 = vsub.f32 %v3024_v16, %v3050_v42  ;;  %v3052_v17 = vpop.xlane.xlu1 %3051 }
0x2f0f   :  { %v4694_v56 = vsub.f32 %v3029_v15, %v3052_v17 }
0x2f10   :  { %v3073_v18 = vmul.f32 1.442695, %v4692_v31 }
0x2f11   :  { %v3075_v21 = vmul.f32 1.442695, %v4694_v56  ;;  %v3054_v22 = vpop.xlane.xlu0 %3053 }
0x2f12   :  { %3782 = vpow2.f32 %v3073_v18  ;;  %v4699_v26 = vsub.f32 %v3032_v27, %v3054_v22  ;;  %v3056_v8 = vpop.xlane.xlu1 %3055 }
0x2f13   :  { %3784 = vpow2.f32 %v3075_v21  ;;  %v4701_v44 = vsub.f32 %v3037_v28, %v3056_v8 }
0x2f14   :  { %v3779_v5 = vpop.eup %3778  ;;  %3786 = vpow2.f32 %v3069_v24  ;;  %v3077_v47 = vmul.f32 1.442695, %v4699_v26 }
0x2f15   :  { %v3079_v45 = vmul.f32 1.442695, %v4701_v44  ;;  %3087 = vadd.xlane.f32.xlu1 %v3779_v5  ;;  %v3058_v46 = vpop.xlane.xlu0 %3057 }
0x2f16   :  { %v4705_v48 = vsub.f32 %v3040_v29, %v3058_v46 }
0x2f17   :  { %3788 = vpow2.f32 %v3079_v45 }
0x2f18   :  { %v3781_v50 = vpop.eup %3780  ;;  %3790 = vpow2.f32 %v3077_v47  ;;  %v3081_v52 = vmul.f32 1.442695, %v4705_v48 }
0x2f19   :  { %3083 = vadd.xlane.f32.xlu1 %v3781_v50 }
0x2f1a   :  { %3792 = vpow2.f32 %v3081_v52 }
0x2f1c   :  { %v3783_v33 = vpop.eup %3782 }
0x2f1d   :  { %v3785_v54 = vpop.eup %3784  ;;  %3089 = vadd.xlane.f32.xlu0 %v3783_v33 }
0x2f1e   :  { %3091 = vadd.xlane.f32.xlu1 %v3785_v54  ;;  %v3787_v55 = vpop.eup %3786 }
0x2f21   :  { %v3789_v20 = vpop.eup %3788  ;;  %3085 = vadd.xlane.f32.xlu0 %v3787_v55 }
0x2f22   :  { %3095 = vadd.xlane.f32.xlu1 %v3789_v20  ;;  %v3791_v35 = vpop.eup %3790 }
0x2f24   :  { %v3793_v63 = vpop.eup %3792 }
0x2f25   :  { %3093 = vadd.xlane.f32.xlu0 %v3791_v35 }
0x2f29   :  { %3097 = vadd.xlane.f32.xlu0 %v3793_v63 }
0x2fa2   :  { %v3088_v36 = vpop.xlane.xlu1 %3087 }
0x2fa3   :  { %3794 = vlog2.f32 %v3088_v36 }
0x2fa6   :  { %v3084_v37 = vpop.xlane.xlu1 %3083 }
0x2fa7   :  { %3796 = vlog2.f32 %v3084_v37 }
0x2faa   :  { %v3090_v34 = vpop.xlane.xlu0 %3089 }
0x2fab   :  { %3798 = vlog2.f32 %v3090_v34  ;;  %v3092_v38 = vpop.xlane.xlu1 %3091 }
0x2fac   :  { %3800 = vlog2.f32 %v3092_v38 }
0x2fad   :  { %v3795_v39 = vpop.eup %3794 }
0x2fae   :  { %v3104_v57 = vmul.f32 0.6931472, %v3795_v39  ;;  %v3086_v59 = vpop.xlane.xlu0 %3085 }
0x2faf   :  { %3802 = vlog2.f32 %v3086_v59  ;;  %v3096_v60 = vpop.xlane.xlu1 %3095 }
0x2fb0   :  { %v3117_v53 = vsub.f32 %v4684_v58, %v3104_v57  ;;  %3804 = vlog2.f32 %v3096_v60 }
0x2fb1   :  { %v3797_v61 = vpop.eup %3796 }
0x2fb2   :  { %3125 = vst [vmem:[%s4751_s11 + $0x10] sm:$0xff] %v3117_v53  ;;  %v3100_v10 = vmul.f32 0.6931472, %v3797_v61  ;;  %v3094_v62 = vpop.xlane.xlu0 %3093 }
0x2fb3   :  { %3806 = vlog2.f32 %v3094_v62 }
0x2fb4   :  { %v3115_v1 = vsub.f32 %v4687_v41, %v3100_v10 }
0x2fb5   :  { %v3799_v51 = vpop.eup %3798 }
0x2fb6   :  { %v3801_v49 = vpop.eup %3800  ;;  %3123 = vst [vmem:[%s4751_s11] sm:$0xff] %v3115_v1  ;;  %v3106_v4 = vmul.f32 0.6931472, %v3799_v51  ;;  %v3098_v6 = vpop.xlane.xlu0 %3097 }
0x2fb7   :  { %v3108_v7 = vmul.f32 0.6931472, %v3801_v49  ;;  %3808 = vlog2.f32 %v3098_v6 }
0x2fb8   :  { %v3118_v12 = vsub.f32 %v4692_v31, %v3106_v4 }
0x2fb9   :  { %v3803_v9 = vpop.eup %3802  ;;  %v3119_v2 = vsub.f32 %v4694_v56, %v3108_v7 }
0x2fba   :  { %v3805_v32 = vpop.eup %3804  ;;  %3126 = vst [vmem:[%s4751_s11 + $0x18] sm:$0xff] %v3118_v12  ;;  %v3102_v13 = vmul.f32 0.6931472, %v3803_v9 }
0x2fbb   :  { %3127 = vst [vmem:[%s4751_s11 + $0x20] sm:$0xff] %v3119_v2  ;;  %v3112_v14 = vmul.f32 0.6931472, %v3805_v32 }
0x2fbc   :  { %v3116_v16 = vsub.f32 %v4690_v43, %v3102_v13 }
0x2fbd   :  { %v3807_v3 = vpop.eup %3806  ;;  %v3121_v15 = vsub.f32 %v4701_v44, %v3112_v14 }
0x2fbe   :  { %3124 = vst [vmem:[%s4751_s11 + $0x8] sm:$0xff] %v3116_v16  ;;  %v3110_v19 = vmul.f32 0.6931472, %v3807_v3 }
0x2fbf   :  { %3129 = vst [vmem:[%s4751_s11 + $0x30] sm:$0xff] %v3121_v15 }
0x2fc0   :  { %v3120_v23 = vsub.f32 %v4699_v26, %v3110_v19 }
0x2fc1   :  { %v3809_v27 = vpop.eup %3808 }
0x2fc2   :  { %3128 = vst [vmem:[%s4751_s11 + $0x28] sm:$0xff] %v3120_v23  ;;  %v3114_v28 = vmul.f32 0.6931472, %v3809_v27 }
0x2fc4   :  { %v3122_v29 = vsub.f32 %v4705_v48, %v3114_v28 }
0x2fc6   :  { %3130 = vst [vmem:[%s4751_s11 + $0x38] sm:$0xff] %v3122_v29 }
0x2fc7   :  { %3135 = vsyncpa [#allocation6], 1 }
0x2fc8   :  { %3136 = vsyncpa [#allocation8], 1 }
0x2fc9   :  { %3137 = vsyncpa [#allocation11], 1 }

</bundles_post_ra>
